<compile_context>
chip_gen: v7x
topology: tpu7x:2x2x1
jax: 0.10.0
libtpu: 0.0.40
codegen_flags: <defaults>
</compile_context>

<pallas_src>
import functools
import math

import jax
import jax.numpy as jnp
from jax.experimental import pallas as pl
from jax.experimental.pallas import tpu as pltpu


# ------------------------------- Pallas kernel -------------------------------

def _cbam_kernel(x_ref, w1_ref, w2_ref, sw_ref, o_ref, pad_ref, *, H, W):
    """Fused CBAM forward for one batch image, native NCHW layout.

    x_ref  : (1, C, H, W)    VMEM  input feature map
    w1_ref : (C, hid)        VMEM  fc1 weight (PyTorch (hid, C) transposed)
    w2_ref : (C, hid)        VMEM  fc2 weight (PyTorch-native layout)
    sw_ref : (98,)           SMEM  7x7x2 spatial conv weight, flat [c, dy, dx]
    o_ref  : (1, C, H, W)    VMEM  gated output (also reused as the x1 buffer)
    pad_ref: (2, H+6, W+6)   VMEM  scratch: zero-padded channel mean/max maps
    """
    f32 = jnp.float32
    x = x_ref[0].astype(f32)                                      # (C, H, W)

    # ------------------------------ channel attention -------------------------
    avg = jnp.mean(jnp.mean(x, axis=2), axis=1, keepdims=True)    # (C, 1)
    mxp = jnp.max(jnp.max(x, axis=2), axis=1, keepdims=True)      # (C, 1)

    w1 = w1_ref[...].astype(f32)                                  # (C, hid)
    w2 = w2_ref[...].astype(f32)                                  # (C, hid)

    def _mlp(p):                                                  # p: (C, 1)
        h = jnp.sum(p * w1, axis=0, keepdims=True)                # (1, hid)
        h = jnp.maximum(h, 0.0)                                   # ReLU
        return jnp.sum(h * w2, axis=1, keepdims=True)             # (C, 1)

    ca = jax.nn.sigmoid(_mlp(avg) + _mlp(mxp))                    # (C, 1)

    # Channel gate written straight to the output block: o_ref doubles as the
    # x1 buffer so no extra full-size VMEM temporary is kept live.
    o_ref[0] = (x * ca[:, :, None]).astype(o_ref.dtype)

    # ------------------------------ spatial attention --------------------------
    x1 = o_ref[0].astype(f32)                                     # (C, H, W)
    cm = jnp.mean(x1, axis=0)                                     # (H, W) lane-dense
    cx = jnp.max(x1, axis=0)                                      # (H, W)

    # Zero-padded maps in a VMEM scratch (no in-kernel concatenate relayouts).
    pad_ref[...] = jnp.zeros(pad_ref.shape, pad_ref.dtype)
    pad_ref[0, 3:3 + H, 3:3 + W] = cm
    pad_ref[1, 3:3 + H, 3:3 + W] = cx

    # 2x7x7 cross-correlation as 98 scalar-weighted FMAs on lane-dense (H, W)
    # tiles: one padded-row load per (c, dy), sliced in-register for the 7 dx
    # taps; four independent accumulators let the VALU slots co-issue.
    accs = [jnp.zeros((H, W), f32) for _ in range(4)]
    t = 0
    for c in range(2):
        for dy in range(7):
            row = pad_ref[c, dy:dy + H, :]                        # (H, W+6)
            for dx in range(7):
                wgt = sw_ref[(c * 7 + dy) * 7 + dx]               # SMEM scalar
                accs[t % 4] = accs[t % 4] + row[:, dx:dx + W] * wgt
                t += 1
    conv = (accs[0] + accs[1]) + (accs[2] + accs[3])              # (H, W)
    sa = jax.nn.sigmoid(conv)                                     # (H, W)

    # Spatial gate: broadcast across the leading channel dim is free.
    o_ref[0] = (x1 * sa[None, :, :]).astype(o_ref.dtype)


# --------------------------------- wrapper -----------------------------------

def cbam_forward(x_nchw, params):
    """CBAM forward pass. x_nchw: (N, C, H, W) -> (N, C, H, W), same dtype.

    Works directly in NCHW (no layout transposes around the pallas_call).
    bf16 input/output is supported; internal math stays in f32.
    """
    N, C, H, W = x_nchw.shape
    hid = params["fc1_w"].shape[0]

    # PyTorch-native weight layouts -> kernel layouts (tiny host-side reshapes).
    w1 = jnp.transpose(params["fc1_w"]).astype(jnp.float32)       # (C, hid)
    w2 = params["fc2_w"].astype(jnp.float32)                      # (C, hid)
    sw = params["sa_w"].reshape(-1).astype(jnp.float32)           # (98,)

    blk_bytes = C * H * W * x_nchw.dtype.itemsize
    vmem_limit = int(min(96 * 2 ** 20, max(32 * 2 ** 20, 8 * blk_bytes)))

    out = pl.pallas_call(
        functools.partial(_cbam_kernel, H=H, W=W),
        out_shape=jax.ShapeDtypeStruct((N, C, H, W), x_nchw.dtype),
        grid=(N,),
        in_specs=[
            pl.BlockSpec((1, C, H, W), lambda n: (n, 0, 0, 0)),
            pl.BlockSpec((C, hid), lambda n: (0, 0)),
            pl.BlockSpec((C, hid), lambda n: (0, 0)),
            pl.BlockSpec(memory_space=pltpu.MemorySpace.SMEM),
        ],
        out_specs=pl.BlockSpec((1, C, H, W), lambda n: (n, 0, 0, 0)),
        scratch_shapes=[pltpu.VMEM((2, H + 6, W + 6), jnp.float32)],
        compiler_params=pltpu.CompilerParams(
            dimension_semantics=("parallel",),
            vmem_limit_bytes=vmem_limit),
    )(x_nchw, w1, w2, sw)
    # TODO(synk): for very large H*W*C (real YOLO maps under v7x's 64 MiB VMEM),
    # tile H with a 3-row halo as a second parallel grid axis and compute the
    # channel-attention pools in a small first pass.
    return out


# -------------------------- deterministic parameters --------------------------

def init_cbam_params(key, channels, ratio=8):
    """Weights in PyTorch-native layouts:
       fc1_w: (hid, C)  == Conv2d(C, hid, 1, bias=False).weight.squeeze()
       fc2_w: (C, hid)  == Conv2d(hid, C, 1, bias=False).weight.squeeze()
       sa_w : (2, 7, 7) == Conv2d(2, 1, 7, bias=False).weight.squeeze(0)
    """
    hid = max(channels // ratio, 1)
    k1, k2, k3 = jax.random.split(key, 3)
    fc1_w = jax.random.normal(k1, (hid, channels), jnp.float32) / math.sqrt(channels)
    fc2_w = jax.random.normal(k2, (channels, hid), jnp.float32) / math.sqrt(hid)
    sa_w = jax.random.normal(k3, (2, 7, 7), jnp.float32) / math.sqrt(2 * 49)
    return {"fc1_w": fc1_w, "fc2_w": fc2_w, "sa_w": sa_w}


# ------------------------------ pure-JAX reference ----------------------------

def cbam_reference(x, params):
    """Reference CBAM in plain JAX (NCHW), mirroring the PyTorch forward."""
    w1, w2 = params["fc1_w"], params["fc2_w"]                     # (hid,C),(C,hid)
    avg = jnp.mean(x, axis=(2, 3))                                # (N, C)
    mx = jnp.max(x, axis=(2, 3))                                  # (N, C)

    def mlp(v):
        h = jnp.maximum(
            jnp.einsum("nc,hc->nh", v, w1, precision=jax.lax.Precision.HIGHEST), 0.0)
        return jnp.einsum("nh,ch->nc", h, w2, precision=jax.lax.Precision.HIGHEST)

    ca = jax.nn.sigmoid(mlp(avg) + mlp(mx))                       # (N, C)
    x1 = x * ca[:, :, None, None]

    cm = jnp.mean(x1, axis=1, keepdims=True)
    cx = jnp.max(x1, axis=1, keepdims=True)
    s = jnp.concatenate([cm, cx], axis=1)                         # (N, 2, H, W)
    w = params["sa_w"].reshape(1, 2, 7, 7)
    conv = jax.lax.conv_general_dilated(
        s, w, window_strides=(1, 1), padding=((3, 3), (3, 3)),
        dimension_numbers=("NCHW", "OIHW", "NCHW"),
        precision=jax.lax.Precision.HIGHEST)
    sa = jax.nn.sigmoid(conv)                                     # (N, 1, H, W)
    return x1 * sa


# ------------------------------------ main ------------------------------------

if __name__ == "__main__":
    N, C, H, W = 2, 32, 16, 16
    key = jax.random.PRNGKey(0)
    kx, kp = jax.random.split(key)
    x = jax.random.normal(kx, (N, C, H, W), jnp.float32)          # NCHW, like PyTorch
    params = init_cbam_params(kp, C, ratio=8)

    fwd = jax.jit(cbam_forward)
    out = fwd(x, params)
    jax.block_until_ready(out)

    assert out.shape == (N, C, H, W), out.shape
    assert bool(jnp.isfinite(out).all())

    ref = cbam_reference(x, params)
    err = float(jnp.max(jnp.abs(out - ref)))
    assert err < 1e-3, f"max abs error vs reference: {err}"
    print("KERNEL_OK")
</pallas_src>

<mosaic_0001>
module attributes {stable_mosaic.version = 11 : i64} {
  func.func @_cbam_kernel(%arg0: i32, %arg1: memref<1x32x16x16xf32, #tpu.memory_space<vmem>>, %arg2: memref<32x4xf32, #tpu.memory_space<vmem>>, %arg3: memref<32x4xf32, #tpu.memory_space<vmem>>, %arg4: memref<98xf32, #tpu.memory_space<smem>>, %arg5: memref<1x32x16x16xf32, #tpu.memory_space<vmem>>, %arg6: memref<2x22x22xf32, #tpu.memory_space<vmem>>) attributes {dimension_semantics = [#tpu.dimension_semantics<parallel>], iteration_bounds = array<i64: 2>, scalar_prefetch = 0 : i64, scratch_operands = 1 : i64, tpu.core_type = #tpu.core_type<tc>, window_params = [{transform_indices = @transform_0, window_bounds = array<i64: 1, 32, 16, 16>}, {pipeline_mode = #tpu.pipeline_mode<synchronous>, transform_indices = @transform_1, window_bounds = array<i64: 32, 4>}, {pipeline_mode = #tpu.pipeline_mode<synchronous>, transform_indices = @transform_2, window_bounds = array<i64: 32, 4>}, {transform_indices = @transform_3, window_bounds = array<i64: 98>}, {transform_indices = @transform_4, window_bounds = array<i64: 1, 32, 16, 16>}]} {
    %c0 = arith.constant 0 : index
    %c0_0 = arith.constant 0 : index
    %c0_1 = arith.constant 0 : index
    %c0_2 = arith.constant 0 : index
    %0 = vector.load %arg1[%c0, %c0_0, %c0_1, %c0_2] : memref<1x32x16x16xf32, #tpu.memory_space<vmem>>, vector<1x32x16x16xf32>
    %1 = vector.shape_cast %0 : vector<1x32x16x16xf32> to vector<32x16x16xf32>
    %cst = arith.constant dense<0.000000e+00> : vector<32x16xf32>
    %2 = vector.multi_reduction <add>, %1, %cst [2] : vector<32x16x16xf32> to vector<32x16xf32>
    %cst_3 = arith.constant 1.600000e+01 : f32
    %3 = vector.broadcast %cst_3 : f32 to vector<32x16xf32>
    %4 = arith.divf %2, %3 : vector<32x16xf32>
    %cst_4 = arith.constant dense<0.000000e+00> : vector<32xf32>
    %5 = vector.multi_reduction <add>, %4, %cst_4 [1] : vector<32x16xf32> to vector<32xf32>
    %6 = vector.shape_cast %5 : vector<32xf32> to vector<32x1xf32>
    %cst_5 = arith.constant 1.600000e+01 : f32
    %7 = vector.broadcast %cst_5 : f32 to vector<32x1xf32>
    %8 = arith.divf %6, %7 : vector<32x1xf32>
    %cst_6 = arith.constant dense<0xFF800000> : vector<32x16xf32>
    %9 = vector.multi_reduction <maximumf>, %1, %cst_6 [2] : vector<32x16x16xf32> to vector<32x16xf32>
    %cst_7 = arith.constant dense<0xFF800000> : vector<32xf32>
    %10 = vector.multi_reduction <maximumf>, %9, %cst_7 [1] : vector<32x16xf32> to vector<32xf32>
    %11 = vector.shape_cast %10 : vector<32xf32> to vector<32x1xf32>
    %c0_8 = arith.constant 0 : index
    %c0_9 = arith.constant 0 : index
    %12 = vector.load %arg2[%c0_8, %c0_9] : memref<32x4xf32, #tpu.memory_space<vmem>>, vector<32x4xf32>
    %c0_10 = arith.constant 0 : index
    %c0_11 = arith.constant 0 : index
    %13 = vector.load %arg3[%c0_10, %c0_11] : memref<32x4xf32, #tpu.memory_space<vmem>>, vector<32x4xf32>
    %14 = vector.broadcast %8 : vector<32x1xf32> to vector<32x4xf32>
    %15 = arith.mulf %14, %12 : vector<32x4xf32>
    %cst_12 = arith.constant dense<0.000000e+00> : vector<4xf32>
    %16 = vector.multi_reduction <add>, %15, %cst_12 [0] : vector<32x4xf32> to vector<4xf32>
    %17 = vector.shape_cast %16 : vector<4xf32> to vector<1x4xf32>
    %cst_13 = arith.constant 0.000000e+00 : f32
    %18 = vector.broadcast %cst_13 : f32 to vector<1x4xf32>
    %19 = arith.maximumf %17, %18 : vector<1x4xf32>
    %20 = vector.broadcast %19 : vector<1x4xf32> to vector<32x4xf32>
    %21 = arith.mulf %20, %13 : vector<32x4xf32>
    %cst_14 = arith.constant dense<0.000000e+00> : vector<32xf32>
    %22 = vector.multi_reduction <add>, %21, %cst_14 [1] : vector<32x4xf32> to vector<32xf32>
    %23 = vector.shape_cast %22 : vector<32xf32> to vector<32x1xf32>
    %24 = vector.broadcast %11 : vector<32x1xf32> to vector<32x4xf32>
    %25 = arith.mulf %24, %12 : vector<32x4xf32>
    %cst_15 = arith.constant dense<0.000000e+00> : vector<4xf32>
    %26 = vector.multi_reduction <add>, %25, %cst_15 [0] : vector<32x4xf32> to vector<4xf32>
    %27 = vector.shape_cast %26 : vector<4xf32> to vector<1x4xf32>
    %cst_16 = arith.constant 0.000000e+00 : f32
    %28 = vector.broadcast %cst_16 : f32 to vector<1x4xf32>
    %29 = arith.maximumf %27, %28 : vector<1x4xf32>
    %30 = vector.broadcast %29 : vector<1x4xf32> to vector<32x4xf32>
    %31 = arith.mulf %30, %13 : vector<32x4xf32>
    %cst_17 = arith.constant dense<0.000000e+00> : vector<32xf32>
    %32 = vector.multi_reduction <add>, %31, %cst_17 [1] : vector<32x4xf32> to vector<32xf32>
    %33 = vector.shape_cast %32 : vector<32xf32> to vector<32x1xf32>
    %34 = arith.addf %23, %33 : vector<32x1xf32>
    %35 = arith.negf %34 : vector<32x1xf32>
    %36 = math.exp %35 : vector<32x1xf32>
    %cst_18 = arith.constant 1.000000e+00 : f32
    %37 = vector.broadcast %cst_18 : f32 to vector<32x1xf32>
    %38 = arith.addf %37, %36 : vector<32x1xf32>
    %39 = arith.divf %37, %38 : vector<32x1xf32>
    %40 = vector.shape_cast %39 : vector<32x1xf32> to vector<32x1x1xf32>
    %41 = vector.broadcast %40 : vector<32x1x1xf32> to vector<32x16x16xf32>
    %42 = arith.mulf %1, %41 : vector<32x16x16xf32>
    %c0_19 = arith.constant 0 : index
    %c0_20 = arith.constant 0 : index
    %c0_21 = arith.constant 0 : index
    %c0_22 = arith.constant 0 : index
    %43 = vector.load %arg5[%c0_19, %c0_20, %c0_21, %c0_22] : memref<1x32x16x16xf32, #tpu.memory_space<vmem>>, vector<1x32x16x16xf32>
    %44 = vector.shape_cast %43 : vector<1x32x16x16xf32> to vector<32x16x16xf32>
    %45 = vector.shape_cast %42 : vector<32x16x16xf32> to vector<1x32x16x16xf32>
    tpu.vector_store %arg5[%c0_19, %c0_20, %c0_21, %c0_22], %45 {strides = array<i32>} : memref<1x32x16x16xf32, #tpu.memory_space<vmem>>, vector<1x32x16x16xf32>,
    %c0_23 = arith.constant 0 : index
    %c0_24 = arith.constant 0 : index
    %c0_25 = arith.constant 0 : index
    %c0_26 = arith.constant 0 : index
    %46 = vector.load %arg5[%c0_23, %c0_24, %c0_25, %c0_26] : memref<1x32x16x16xf32, #tpu.memory_space<vmem>>, vector<1x32x16x16xf32>
    %47 = vector.shape_cast %46 : vector<1x32x16x16xf32> to vector<32x16x16xf32>
    %cst_27 = arith.constant dense<0.000000e+00> : vector<16x16xf32>
    %48 = vector.multi_reduction <add>, %47, %cst_27 [0] : vector<32x16x16xf32> to vector<16x16xf32>
    %cst_28 = arith.constant 3.200000e+01 : f32
    %49 = vector.broadcast %cst_28 : f32 to vector<16x16xf32>
    %50 = arith.divf %48, %49 : vector<16x16xf32>
    %cst_29 = arith.constant dense<0xFF800000> : vector<16x16xf32>
    %51 = vector.multi_reduction <maximumf>, %47, %cst_29 [0] : vector<32x16x16xf32> to vector<16x16xf32>
    %cst_30 = arith.constant 0.000000e+00 : f32
    %52 = vector.broadcast %cst_30 : f32 to vector<2x22x22xf32>
    %c0_31 = arith.constant 0 : index
    %c0_32 = arith.constant 0 : index
    %c0_33 = arith.constant 0 : index
    %53 = vector.load %arg6[%c0_31, %c0_32, %c0_33] : memref<2x22x22xf32, #tpu.memory_space<vmem>>, vector<2x22x22xf32>
    tpu.vector_store %arg6[%c0_31, %c0_32, %c0_33], %52 {strides = array<i32>} : memref<2x22x22xf32, #tpu.memory_space<vmem>>, vector<2x22x22xf32>,
    %c0_34 = arith.constant 0 : index
    %c3 = arith.constant 3 : index
    %c3_35 = arith.constant 3 : index
    %54 = vector.load %arg6[%c0_34, %c3, %c3_35] : memref<2x22x22xf32, #tpu.memory_space<vmem>>, vector<1x16x16xf32>
    %55 = vector.shape_cast %54 : vector<1x16x16xf32> to vector<16x16xf32>
    %56 = vector.shape_cast %50 : vector<16x16xf32> to vector<1x16x16xf32>
    tpu.vector_store %arg6[%c0_34, %c3, %c3_35], %56 {strides = array<i32>} : memref<2x22x22xf32, #tpu.memory_space<vmem>>, vector<1x16x16xf32>,
    %c1 = arith.constant 1 : index
    %c3_36 = arith.constant 3 : index
    %c3_37 = arith.constant 3 : index
    %57 = vector.load %arg6[%c1, %c3_36, %c3_37] : memref<2x22x22xf32, #tpu.memory_space<vmem>>, vector<1x16x16xf32>
    %58 = vector.shape_cast %57 : vector<1x16x16xf32> to vector<16x16xf32>
    %59 = vector.shape_cast %51 : vector<16x16xf32> to vector<1x16x16xf32>
    tpu.vector_store %arg6[%c1, %c3_36, %c3_37], %59 {strides = array<i32>} : memref<2x22x22xf32, #tpu.memory_space<vmem>>, vector<1x16x16xf32>,
    %cst_38 = arith.constant 0.000000e+00 : f32
    %60 = vector.broadcast %cst_38 : f32 to vector<16x16xf32>
    %cst_39 = arith.constant 0.000000e+00 : f32
    %61 = vector.broadcast %cst_39 : f32 to vector<16x16xf32>
    %cst_40 = arith.constant 0.000000e+00 : f32
    %62 = vector.broadcast %cst_40 : f32 to vector<16x16xf32>
    %cst_41 = arith.constant 0.000000e+00 : f32
    %63 = vector.broadcast %cst_41 : f32 to vector<16x16xf32>
    %c0_42 = arith.constant 0 : index
    %c0_43 = arith.constant 0 : index
    %c0_44 = arith.constant 0 : index
    %64 = vector.load %arg6[%c0_42, %c0_43, %c0_44] : memref<2x22x22xf32, #tpu.memory_space<vmem>>, vector<1x16x22xf32>
    %65 = vector.shape_cast %64 : vector<1x16x22xf32> to vector<16x22xf32>
    %c0_45 = arith.constant 0 : index
    %66 = memref.load %arg4[%c0_45] : memref<98xf32, #tpu.memory_space<smem>>
    %67 = vector.extract_strided_slice %65 {offsets = [0, 0], sizes = [16, 16], strides = [1, 1]} : vector<16x22xf32> to vector<16x16xf32>
    %68 = vector.broadcast %66 : f32 to vector<16x16xf32>
    %69 = arith.mulf %67, %68 : vector<16x16xf32>
    %70 = arith.addf %60, %69 : vector<16x16xf32>
    %c1_46 = arith.constant 1 : index
    %71 = memref.load %arg4[%c1_46] : memref<98xf32, #tpu.memory_space<smem>>
    %72 = vector.extract_strided_slice %65 {offsets = [0, 1], sizes = [16, 16], strides = [1, 1]} : vector<16x22xf32> to vector<16x16xf32>
    %73 = vector.broadcast %71 : f32 to vector<16x16xf32>
    %74 = arith.mulf %72, %73 : vector<16x16xf32>
    %75 = arith.addf %61, %74 : vector<16x16xf32>
    %c2 = arith.constant 2 : index
    %76 = memref.load %arg4[%c2] : memref<98xf32, #tpu.memory_space<smem>>
    %77 = vector.extract_strided_slice %65 {offsets = [0, 2], sizes = [16, 16], strides = [1, 1]} : vector<16x22xf32> to vector<16x16xf32>
    %78 = vector.broadcast %76 : f32 to vector<16x16xf32>
    %79 = arith.mulf %77, %78 : vector<16x16xf32>
    %80 = arith.addf %62, %79 : vector<16x16xf32>
    %c3_47 = arith.constant 3 : index
    %81 = memref.load %arg4[%c3_47] : memref<98xf32, #tpu.memory_space<smem>>
    %82 = vector.extract_strided_slice %65 {offsets = [0, 3], sizes = [16, 16], strides = [1, 1]} : vector<16x22xf32> to vector<16x16xf32>
    %83 = vector.broadcast %81 : f32 to vector<16x16xf32>
    %84 = arith.mulf %82, %83 : vector<16x16xf32>
    %85 = arith.addf %63, %84 : vector<16x16xf32>
    %c4 = arith.constant 4 : index
    %86 = memref.load %arg4[%c4] : memref<98xf32, #tpu.memory_space<smem>>
    %87 = vector.extract_strided_slice %65 {offsets = [0, 4], sizes = [16, 16], strides = [1, 1]} : vector<16x22xf32> to vector<16x16xf32>
    %88 = vector.broadcast %86 : f32 to vector<16x16xf32>
    %89 = arith.mulf %87, %88 : vector<16x16xf32>
    %90 = arith.addf %70, %89 : vector<16x16xf32>
    %c5 = arith.constant 5 : index
    %91 = memref.load %arg4[%c5] : memref<98xf32, #tpu.memory_space<smem>>
    %92 = vector.extract_strided_slice %65 {offsets = [0, 5], sizes = [16, 16], strides = [1, 1]} : vector<16x22xf32> to vector<16x16xf32>
    %93 = vector.broadcast %91 : f32 to vector<16x16xf32>
    %94 = arith.mulf %92, %93 : vector<16x16xf32>
    %95 = arith.addf %75, %94 : vector<16x16xf32>
    %c6 = arith.constant 6 : index
    %96 = memref.load %arg4[%c6] : memref<98xf32, #tpu.memory_space<smem>>
    %97 = vector.extract_strided_slice %65 {offsets = [0, 6], sizes = [16, 16], strides = [1, 1]} : vector<16x22xf32> to vector<16x16xf32>
    %98 = vector.broadcast %96 : f32 to vector<16x16xf32>
    %99 = arith.mulf %97, %98 : vector<16x16xf32>
    %100 = arith.addf %80, %99 : vector<16x16xf32>
    %c0_48 = arith.constant 0 : index
    %c1_49 = arith.constant 1 : index
    %c0_50 = arith.constant 0 : index
    %101 = vector.load %arg6[%c0_48, %c1_49, %c0_50] : memref<2x22x22xf32, #tpu.memory_space<vmem>>, vector<1x16x22xf32>
    %102 = vector.shape_cast %101 : vector<1x16x22xf32> to vector<16x22xf32>
    %c7 = arith.constant 7 : index
    %103 = memref.load %arg4[%c7] : memref<98xf32, #tpu.memory_space<smem>>
    %104 = vector.extract_strided_slice %102 {offsets = [0, 0], sizes = [16, 16], strides = [1, 1]} : vector<16x22xf32> to vector<16x16xf32>
    %105 = vector.broadcast %103 : f32 to vector<16x16xf32>
    %106 = arith.mulf %104, %105 : vector<16x16xf32>
    %107 = arith.addf %85, %106 : vector<16x16xf32>
    %c8 = arith.constant 8 : index
    %108 = memref.load %arg4[%c8] : memref<98xf32, #tpu.memory_space<smem>>
    %109 = vector.extract_strided_slice %102 {offsets = [0, 1], sizes = [16, 16], strides = [1, 1]} : vector<16x22xf32> to vector<16x16xf32>
    %110 = vector.broadcast %108 : f32 to vector<16x16xf32>
    %111 = arith.mulf %109, %110 : vector<16x16xf32>
    %112 = arith.addf %90, %111 : vector<16x16xf32>
    %c9 = arith.constant 9 : index
    %113 = memref.load %arg4[%c9] : memref<98xf32, #tpu.memory_space<smem>>
    %114 = vector.extract_strided_slice %102 {offsets = [0, 2], sizes = [16, 16], strides = [1, 1]} : vector<16x22xf32> to vector<16x16xf32>
    %115 = vector.broadcast %113 : f32 to vector<16x16xf32>
    %116 = arith.mulf %114, %115 : vector<16x16xf32>
    %117 = arith.addf %95, %116 : vector<16x16xf32>
    %c10 = arith.constant 10 : index
    %118 = memref.load %arg4[%c10] : memref<98xf32, #tpu.memory_space<smem>>
    %119 = vector.extract_strided_slice %102 {offsets = [0, 3], sizes = [16, 16], strides = [1, 1]} : vector<16x22xf32> to vector<16x16xf32>
    %120 = vector.broadcast %118 : f32 to vector<16x16xf32>
    %121 = arith.mulf %119, %120 : vector<16x16xf32>
    %122 = arith.addf %100, %121 : vector<16x16xf32>
    %c11 = arith.constant 11 : index
    %123 = memref.load %arg4[%c11] : memref<98xf32, #tpu.memory_space<smem>>
    %124 = vector.extract_strided_slice %102 {offsets = [0, 4], sizes = [16, 16], strides = [1, 1]} : vector<16x22xf32> to vector<16x16xf32>
    %125 = vector.broadcast %123 : f32 to vector<16x16xf32>
    %126 = arith.mulf %124, %125 : vector<16x16xf32>
    %127 = arith.addf %107, %126 : vector<16x16xf32>
    %c12 = arith.constant 12 : index
    %128 = memref.load %arg4[%c12] : memref<98xf32, #tpu.memory_space<smem>>
    %129 = vector.extract_strided_slice %102 {offsets = [0, 5], sizes = [16, 16], strides = [1, 1]} : vector<16x22xf32> to vector<16x16xf32>
    %130 = vector.broadcast %128 : f32 to vector<16x16xf32>
    %131 = arith.mulf %129, %130 : vector<16x16xf32>
    %132 = arith.addf %112, %131 : vector<16x16xf32>
    %c13 = arith.constant 13 : index
    %133 = memref.load %arg4[%c13] : memref<98xf32, #tpu.memory_space<smem>>
    %134 = vector.extract_strided_slice %102 {offsets = [0, 6], sizes = [16, 16], strides = [1, 1]} : vector<16x22xf32> to vector<16x16xf32>
    %135 = vector.broadcast %133 : f32 to vector<16x16xf32>
    %136 = arith.mulf %134, %135 : vector<16x16xf32>
    %137 = arith.addf %117, %136 : vector<16x16xf32>
    %c0_51 = arith.constant 0 : index
    %c2_52 = arith.constant 2 : index
    %c0_53 = arith.constant 0 : index
    %138 = vector.load %arg6[%c0_51, %c2_52, %c0_53] : memref<2x22x22xf32, #tpu.memory_space<vmem>>, vector<1x16x22xf32>
    %139 = vector.shape_cast %138 : vector<1x16x22xf32> to vector<16x22xf32>
    %c14 = arith.constant 14 : index
    %140 = memref.load %arg4[%c14] : memref<98xf32, #tpu.memory_space<smem>>
    %141 = vector.extract_strided_slice %139 {offsets = [0, 0], sizes = [16, 16], strides = [1, 1]} : vector<16x22xf32> to vector<16x16xf32>
    %142 = vector.broadcast %140 : f32 to vector<16x16xf32>
    %143 = arith.mulf %141, %142 : vector<16x16xf32>
    %144 = arith.addf %122, %143 : vector<16x16xf32>
    %c15 = arith.constant 15 : index
    %145 = memref.load %arg4[%c15] : memref<98xf32, #tpu.memory_space<smem>>
    %146 = vector.extract_strided_slice %139 {offsets = [0, 1], sizes = [16, 16], strides = [1, 1]} : vector<16x22xf32> to vector<16x16xf32>
    %147 = vector.broadcast %145 : f32 to vector<16x16xf32>
    %148 = arith.mulf %146, %147 : vector<16x16xf32>
    %149 = arith.addf %127, %148 : vector<16x16xf32>
    %c16 = arith.constant 16 : index
    %150 = memref.load %arg4[%c16] : memref<98xf32, #tpu.memory_space<smem>>
    %151 = vector.extract_strided_slice %139 {offsets = [0, 2], sizes = [16, 16], strides = [1, 1]} : vector<16x22xf32> to vector<16x16xf32>
    %152 = vector.broadcast %150 : f32 to vector<16x16xf32>
    %153 = arith.mulf %151, %152 : vector<16x16xf32>
    %154 = arith.addf %132, %153 : vector<16x16xf32>
    %c17 = arith.constant 17 : index
    %155 = memref.load %arg4[%c17] : memref<98xf32, #tpu.memory_space<smem>>
    %156 = vector.extract_strided_slice %139 {offsets = [0, 3], sizes = [16, 16], strides = [1, 1]} : vector<16x22xf32> to vector<16x16xf32>
    %157 = vector.broadcast %155 : f32 to vector<16x16xf32>
    %158 = arith.mulf %156, %157 : vector<16x16xf32>
    %159 = arith.addf %137, %158 : vector<16x16xf32>
    %c18 = arith.constant 18 : index
    %160 = memref.load %arg4[%c18] : memref<98xf32, #tpu.memory_space<smem>>
    %161 = vector.extract_strided_slice %139 {offsets = [0, 4], sizes = [16, 16], strides = [1, 1]} : vector<16x22xf32> to vector<16x16xf32>
    %162 = vector.broadcast %160 : f32 to vector<16x16xf32>
    %163 = arith.mulf %161, %162 : vector<16x16xf32>
    %164 = arith.addf %144, %163 : vector<16x16xf32>
    %c19 = arith.constant 19 : index
    %165 = memref.load %arg4[%c19] : memref<98xf32, #tpu.memory_space<smem>>
    %166 = vector.extract_strided_slice %139 {offsets = [0, 5], sizes = [16, 16], strides = [1, 1]} : vector<16x22xf32> to vector<16x16xf32>
    %167 = vector.broadcast %165 : f32 to vector<16x16xf32>
    %168 = arith.mulf %166, %167 : vector<16x16xf32>
    %169 = arith.addf %149, %168 : vector<16x16xf32>
    %c20 = arith.constant 20 : index
    %170 = memref.load %arg4[%c20] : memref<98xf32, #tpu.memory_space<smem>>
    %171 = vector.extract_strided_slice %139 {offsets = [0, 6], sizes = [16, 16], strides = [1, 1]} : vector<16x22xf32> to vector<16x16xf32>
    %172 = vector.broadcast %170 : f32 to vector<16x16xf32>
    %173 = arith.mulf %171, %172 : vector<16x16xf32>
    %174 = arith.addf %154, %173 : vector<16x16xf32>
    %c0_54 = arith.constant 0 : index
    %c3_55 = arith.constant 3 : index
    %c0_56 = arith.constant 0 : index
    %175 = vector.load %arg6[%c0_54, %c3_55, %c0_56] : memref<2x22x22xf32, #tpu.memory_space<vmem>>, vector<1x16x22xf32>
    %176 = vector.shape_cast %175 : vector<1x16x22xf32> to vector<16x22xf32>
    %c21 = arith.constant 21 : index
    %177 = memref.load %arg4[%c21] : memref<98xf32, #tpu.memory_space<smem>>
    %178 = vector.extract_strided_slice %176 {offsets = [0, 0], sizes = [16, 16], strides = [1, 1]} : vector<16x22xf32> to vector<16x16xf32>
    %179 = vector.broadcast %177 : f32 to vector<16x16xf32>
    %180 = arith.mulf %178, %179 : vector<16x16xf32>
    %181 = arith.addf %159, %180 : vector<16x16xf32>
    %c22 = arith.constant 22 : index
    %182 = memref.load %arg4[%c22] : memref<98xf32, #tpu.memory_space<smem>>
    %183 = vector.extract_strided_slice %176 {offsets = [0, 1], sizes = [16, 16], strides = [1, 1]} : vector<16x22xf32> to vector<16x16xf32>
    %184 = vector.broadcast %182 : f32 to vector<16x16xf32>
    %185 = arith.mulf %183, %184 : vector<16x16xf32>
    %186 = arith.addf %164, %185 : vector<16x16xf32>
    %c23 = arith.constant 23 : index
    %187 = memref.load %arg4[%c23] : memref<98xf32, #tpu.memory_space<smem>>
    %188 = vector.extract_strided_slice %176 {offsets = [0, 2], sizes = [16, 16], strides = [1, 1]} : vector<16x22xf32> to vector<16x16xf32>
    %189 = vector.broadcast %187 : f32 to vector<16x16xf32>
    %190 = arith.mulf %188, %189 : vector<16x16xf32>
    %191 = arith.addf %169, %190 : vector<16x16xf32>
    %c24 = arith.constant 24 : index
    %192 = memref.load %arg4[%c24] : memref<98xf32, #tpu.memory_space<smem>>
    %193 = vector.extract_strided_slice %176 {offsets = [0, 3], sizes = [16, 16], strides = [1, 1]} : vector<16x22xf32> to vector<16x16xf32>
    %194 = vector.broadcast %192 : f32 to vector<16x16xf32>
    %195 = arith.mulf %193, %194 : vector<16x16xf32>
    %196 = arith.addf %174, %195 : vector<16x16xf32>
    %c25 = arith.constant 25 : index
    %197 = memref.load %arg4[%c25] : memref<98xf32, #tpu.memory_space<smem>>
    %198 = vector.extract_strided_slice %176 {offsets = [0, 4], sizes = [16, 16], strides = [1, 1]} : vector<16x22xf32> to vector<16x16xf32>
    %199 = vector.broadcast %197 : f32 to vector<16x16xf32>
    %200 = arith.mulf %198, %199 : vector<16x16xf32>
    %201 = arith.addf %181, %200 : vector<16x16xf32>
    %c26 = arith.constant 26 : index
    %202 = memref.load %arg4[%c26] : memref<98xf32, #tpu.memory_space<smem>>
    %203 = vector.extract_strided_slice %176 {offsets = [0, 5], sizes = [16, 16], strides = [1, 1]} : vector<16x22xf32> to vector<16x16xf32>
    %204 = vector.broadcast %202 : f32 to vector<16x16xf32>
    %205 = arith.mulf %203, %204 : vector<16x16xf32>
    %206 = arith.addf %186, %205 : vector<16x16xf32>
    %c27 = arith.constant 27 : index
    %207 = memref.load %arg4[%c27] : memref<98xf32, #tpu.memory_space<smem>>
    %208 = vector.extract_strided_slice %176 {offsets = [0, 6], sizes = [16, 16], strides = [1, 1]} : vector<16x22xf32> to vector<16x16xf32>
    %209 = vector.broadcast %207 : f32 to vector<16x16xf32>
    %210 = arith.mulf %208, %209 : vector<16x16xf32>
    %211 = arith.addf %191, %210 : vector<16x16xf32>
    %c0_57 = arith.constant 0 : index
    %c4_58 = arith.constant 4 : index
    %c0_59 = arith.constant 0 : index
    %212 = vector.load %arg6[%c0_57, %c4_58, %c0_59] : memref<2x22x22xf32, #tpu.memory_space<vmem>>, vector<1x16x22xf32>
    %213 = vector.shape_cast %212 : vector<1x16x22xf32> to vector<16x22xf32>
    %c28 = arith.constant 28 : index
    %214 = memref.load %arg4[%c28] : memref<98xf32, #tpu.memory_space<smem>>
    %215 = vector.extract_strided_slice %213 {offsets = [0, 0], sizes = [16, 16], strides = [1, 1]} : vector<16x22xf32> to vector<16x16xf32>
    %216 = vector.broadcast %214 : f32 to vector<16x16xf32>
    %217 = arith.mulf %215, %216 : vector<16x16xf32>
    %218 = arith.addf %196, %217 : vector<16x16xf32>
    %c29 = arith.constant 29 : index
    %219 = memref.load %arg4[%c29] : memref<98xf32, #tpu.memory_space<smem>>
    %220 = vector.extract_strided_slice %213 {offsets = [0, 1], sizes = [16, 16], strides = [1, 1]} : vector<16x22xf32> to vector<16x16xf32>
    %221 = vector.broadcast %219 : f32 to vector<16x16xf32>
    %222 = arith.mulf %220, %221 : vector<16x16xf32>
    %223 = arith.addf %201, %222 : vector<16x16xf32>
    %c30 = arith.constant 30 : index
    %224 = memref.load %arg4[%c30] : memref<98xf32, #tpu.memory_space<smem>>
    %225 = vector.extract_strided_slice %213 {offsets = [0, 2], sizes = [16, 16], strides = [1, 1]} : vector<16x22xf32> to vector<16x16xf32>
    %226 = vector.broadcast %224 : f32 to vector<16x16xf32>
    %227 = arith.mulf %225, %226 : vector<16x16xf32>
    %228 = arith.addf %206, %227 : vector<16x16xf32>
    %c31 = arith.constant 31 : index
    %229 = memref.load %arg4[%c31] : memref<98xf32, #tpu.memory_space<smem>>
    %230 = vector.extract_strided_slice %213 {offsets = [0, 3], sizes = [16, 16], strides = [1, 1]} : vector<16x22xf32> to vector<16x16xf32>
    %231 = vector.broadcast %229 : f32 to vector<16x16xf32>
    %232 = arith.mulf %230, %231 : vector<16x16xf32>
    %233 = arith.addf %211, %232 : vector<16x16xf32>
    %c32 = arith.constant 32 : index
    %234 = memref.load %arg4[%c32] : memref<98xf32, #tpu.memory_space<smem>>
    %235 = vector.extract_strided_slice %213 {offsets = [0, 4], sizes = [16, 16], strides = [1, 1]} : vector<16x22xf32> to vector<16x16xf32>
    %236 = vector.broadcast %234 : f32 to vector<16x16xf32>
    %237 = arith.mulf %235, %236 : vector<16x16xf32>
    %238 = arith.addf %218, %237 : vector<16x16xf32>
    %c33 = arith.constant 33 : index
    %239 = memref.load %arg4[%c33] : memref<98xf32, #tpu.memory_space<smem>>
    %240 = vector.extract_strided_slice %213 {offsets = [0, 5], sizes = [16, 16], strides = [1, 1]} : vector<16x22xf32> to vector<16x16xf32>
    %241 = vector.broadcast %239 : f32 to vector<16x16xf32>
    %242 = arith.mulf %240, %241 : vector<16x16xf32>
    %243 = arith.addf %223, %242 : vector<16x16xf32>
    %c34 = arith.constant 34 : index
    %244 = memref.load %arg4[%c34] : memref<98xf32, #tpu.memory_space<smem>>
    %245 = vector.extract_strided_slice %213 {offsets = [0, 6], sizes = [16, 16], strides = [1, 1]} : vector<16x22xf32> to vector<16x16xf32>
    %246 = vector.broadcast %244 : f32 to vector<16x16xf32>
    %247 = arith.mulf %245, %246 : vector<16x16xf32>
    %248 = arith.addf %228, %247 : vector<16x16xf32>
    %c0_60 = arith.constant 0 : index
    %c5_61 = arith.constant 5 : index
    %c0_62 = arith.constant 0 : index
    %249 = vector.load %arg6[%c0_60, %c5_61, %c0_62] : memref<2x22x22xf32, #tpu.memory_space<vmem>>, vector<1x16x22xf32>
    %250 = vector.shape_cast %249 : vector<1x16x22xf32> to vector<16x22xf32>
    %c35 = arith.constant 35 : index
    %251 = memref.load %arg4[%c35] : memref<98xf32, #tpu.memory_space<smem>>
    %252 = vector.extract_strided_slice %250 {offsets = [0, 0], sizes = [16, 16], strides = [1, 1]} : vector<16x22xf32> to vector<16x16xf32>
    %253 = vector.broadcast %251 : f32 to vector<16x16xf32>
    %254 = arith.mulf %252, %253 : vector<16x16xf32>
    %255 = arith.addf %233, %254 : vector<16x16xf32>
    %c36 = arith.constant 36 : index
    %256 = memref.load %arg4[%c36] : memref<98xf32, #tpu.memory_space<smem>>
    %257 = vector.extract_strided_slice %250 {offsets = [0, 1], sizes = [16, 16], strides = [1, 1]} : vector<16x22xf32> to vector<16x16xf32>
    %258 = vector.broadcast %256 : f32 to vector<16x16xf32>
    %259 = arith.mulf %257, %258 : vector<16x16xf32>
    %260 = arith.addf %238, %259 : vector<16x16xf32>
    %c37 = arith.constant 37 : index
    %261 = memref.load %arg4[%c37] : memref<98xf32, #tpu.memory_space<smem>>
    %262 = vector.extract_strided_slice %250 {offsets = [0, 2], sizes = [16, 16], strides = [1, 1]} : vector<16x22xf32> to vector<16x16xf32>
    %263 = vector.broadcast %261 : f32 to vector<16x16xf32>
    %264 = arith.mulf %262, %263 : vector<16x16xf32>
    %265 = arith.addf %243, %264 : vector<16x16xf32>
    %c38 = arith.constant 38 : index
    %266 = memref.load %arg4[%c38] : memref<98xf32, #tpu.memory_space<smem>>
    %267 = vector.extract_strided_slice %250 {offsets = [0, 3], sizes = [16, 16], strides = [1, 1]} : vector<16x22xf32> to vector<16x16xf32>
    %268 = vector.broadcast %266 : f32 to vector<16x16xf32>
    %269 = arith.mulf %267, %268 : vector<16x16xf32>
    %270 = arith.addf %248, %269 : vector<16x16xf32>
    %c39 = arith.constant 39 : index
    %271 = memref.load %arg4[%c39] : memref<98xf32, #tpu.memory_space<smem>>
    %272 = vector.extract_strided_slice %250 {offsets = [0, 4], sizes = [16, 16], strides = [1, 1]} : vector<16x22xf32> to vector<16x16xf32>
    %273 = vector.broadcast %271 : f32 to vector<16x16xf32>
    %274 = arith.mulf %272, %273 : vector<16x16xf32>
    %275 = arith.addf %255, %274 : vector<16x16xf32>
    %c40 = arith.constant 40 : index
    %276 = memref.load %arg4[%c40] : memref<98xf32, #tpu.memory_space<smem>>
    %277 = vector.extract_strided_slice %250 {offsets = [0, 5], sizes = [16, 16], strides = [1, 1]} : vector<16x22xf32> to vector<16x16xf32>
    %278 = vector.broadcast %276 : f32 to vector<16x16xf32>
    %279 = arith.mulf %277, %278 : vector<16x16xf32>
    %280 = arith.addf %260, %279 : vector<16x16xf32>
    %c41 = arith.constant 41 : index
    %281 = memref.load %arg4[%c41] : memref<98xf32, #tpu.memory_space<smem>>
    %282 = vector.extract_strided_slice %250 {offsets = [0, 6], sizes = [16, 16], strides = [1, 1]} : vector<16x22xf32> to vector<16x16xf32>
    %283 = vector.broadcast %281 : f32 to vector<16x16xf32>
    %284 = arith.mulf %282, %283 : vector<16x16xf32>
    %285 = arith.addf %265, %284 : vector<16x16xf32>
    %c0_63 = arith.constant 0 : index
    %c6_64 = arith.constant 6 : index
    %c0_65 = arith.constant 0 : index
    %286 = vector.load %arg6[%c0_63, %c6_64, %c0_65] : memref<2x22x22xf32, #tpu.memory_space<vmem>>, vector<1x16x22xf32>
    %287 = vector.shape_cast %286 : vector<1x16x22xf32> to vector<16x22xf32>
    %c42 = arith.constant 42 : index
    %288 = memref.load %arg4[%c42] : memref<98xf32, #tpu.memory_space<smem>>
    %289 = vector.extract_strided_slice %287 {offsets = [0, 0], sizes = [16, 16], strides = [1, 1]} : vector<16x22xf32> to vector<16x16xf32>
    %290 = vector.broadcast %288 : f32 to vector<16x16xf32>
    %291 = arith.mulf %289, %290 : vector<16x16xf32>
    %292 = arith.addf %270, %291 : vector<16x16xf32>
    %c43 = arith.constant 43 : index
    %293 = memref.load %arg4[%c43] : memref<98xf32, #tpu.memory_space<smem>>
    %294 = vector.extract_strided_slice %287 {offsets = [0, 1], sizes = [16, 16], strides = [1, 1]} : vector<16x22xf32> to vector<16x16xf32>
    %295 = vector.broadcast %293 : f32 to vector<16x16xf32>
    %296 = arith.mulf %294, %295 : vector<16x16xf32>
    %297 = arith.addf %275, %296 : vector<16x16xf32>
    %c44 = arith.constant 44 : index
    %298 = memref.load %arg4[%c44] : memref<98xf32, #tpu.memory_space<smem>>
    %299 = vector.extract_strided_slice %287 {offsets = [0, 2], sizes = [16, 16], strides = [1, 1]} : vector<16x22xf32> to vector<16x16xf32>
    %300 = vector.broadcast %298 : f32 to vector<16x16xf32>
    %301 = arith.mulf %299, %300 : vector<16x16xf32>
    %302 = arith.addf %280, %301 : vector<16x16xf32>
    %c45 = arith.constant 45 : index
    %303 = memref.load %arg4[%c45] : memref<98xf32, #tpu.memory_space<smem>>
    %304 = vector.extract_strided_slice %287 {offsets = [0, 3], sizes = [16, 16], strides = [1, 1]} : vector<16x22xf32> to vector<16x16xf32>
    %305 = vector.broadcast %303 : f32 to vector<16x16xf32>
    %306 = arith.mulf %304, %305 : vector<16x16xf32>
    %307 = arith.addf %285, %306 : vector<16x16xf32>
    %c46 = arith.constant 46 : index
    %308 = memref.load %arg4[%c46] : memref<98xf32, #tpu.memory_space<smem>>
    %309 = vector.extract_strided_slice %287 {offsets = [0, 4], sizes = [16, 16], strides = [1, 1]} : vector<16x22xf32> to vector<16x16xf32>
    %310 = vector.broadcast %308 : f32 to vector<16x16xf32>
    %311 = arith.mulf %309, %310 : vector<16x16xf32>
    %312 = arith.addf %292, %311 : vector<16x16xf32>
    %c47 = arith.constant 47 : index
    %313 = memref.load %arg4[%c47] : memref<98xf32, #tpu.memory_space<smem>>
    %314 = vector.extract_strided_slice %287 {offsets = [0, 5], sizes = [16, 16], strides = [1, 1]} : vector<16x22xf32> to vector<16x16xf32>
    %315 = vector.broadcast %313 : f32 to vector<16x16xf32>
    %316 = arith.mulf %314, %315 : vector<16x16xf32>
    %317 = arith.addf %297, %316 : vector<16x16xf32>
    %c48 = arith.constant 48 : index
    %318 = memref.load %arg4[%c48] : memref<98xf32, #tpu.memory_space<smem>>
    %319 = vector.extract_strided_slice %287 {offsets = [0, 6], sizes = [16, 16], strides = [1, 1]} : vector<16x22xf32> to vector<16x16xf32>
    %320 = vector.broadcast %318 : f32 to vector<16x16xf32>
    %321 = arith.mulf %319, %320 : vector<16x16xf32>
    %322 = arith.addf %302, %321 : vector<16x16xf32>
    %c1_66 = arith.constant 1 : index
    %c0_67 = arith.constant 0 : index
    %c0_68 = arith.constant 0 : index
    %323 = vector.load %arg6[%c1_66, %c0_67, %c0_68] : memref<2x22x22xf32, #tpu.memory_space<vmem>>, vector<1x16x22xf32>
    %324 = vector.shape_cast %323 : vector<1x16x22xf32> to vector<16x22xf32>
    %c49 = arith.constant 49 : index
    %325 = memref.load %arg4[%c49] : memref<98xf32, #tpu.memory_space<smem>>
    %326 = vector.extract_strided_slice %324 {offsets = [0, 0], sizes = [16, 16], strides = [1, 1]} : vector<16x22xf32> to vector<16x16xf32>
    %327 = vector.broadcast %325 : f32 to vector<16x16xf32>
    %328 = arith.mulf %326, %327 : vector<16x16xf32>
    %329 = arith.addf %307, %328 : vector<16x16xf32>
    %c50 = arith.constant 50 : index
    %330 = memref.load %arg4[%c50] : memref<98xf32, #tpu.memory_space<smem>>
    %331 = vector.extract_strided_slice %324 {offsets = [0, 1], sizes = [16, 16], strides = [1, 1]} : vector<16x22xf32> to vector<16x16xf32>
    %332 = vector.broadcast %330 : f32 to vector<16x16xf32>
    %333 = arith.mulf %331, %332 : vector<16x16xf32>
    %334 = arith.addf %312, %333 : vector<16x16xf32>
    %c51 = arith.constant 51 : index
    %335 = memref.load %arg4[%c51] : memref<98xf32, #tpu.memory_space<smem>>
    %336 = vector.extract_strided_slice %324 {offsets = [0, 2], sizes = [16, 16], strides = [1, 1]} : vector<16x22xf32> to vector<16x16xf32>
    %337 = vector.broadcast %335 : f32 to vector<16x16xf32>
    %338 = arith.mulf %336, %337 : vector<16x16xf32>
    %339 = arith.addf %317, %338 : vector<16x16xf32>
    %c52 = arith.constant 52 : index
    %340 = memref.load %arg4[%c52] : memref<98xf32, #tpu.memory_space<smem>>
    %341 = vector.extract_strided_slice %324 {offsets = [0, 3], sizes = [16, 16], strides = [1, 1]} : vector<16x22xf32> to vector<16x16xf32>
    %342 = vector.broadcast %340 : f32 to vector<16x16xf32>
    %343 = arith.mulf %341, %342 : vector<16x16xf32>
    %344 = arith.addf %322, %343 : vector<16x16xf32>
    %c53 = arith.constant 53 : index
    %345 = memref.load %arg4[%c53] : memref<98xf32, #tpu.memory_space<smem>>
    %346 = vector.extract_strided_slice %324 {offsets = [0, 4], sizes = [16, 16], strides = [1, 1]} : vector<16x22xf32> to vector<16x16xf32>
    %347 = vector.broadcast %345 : f32 to vector<16x16xf32>
    %348 = arith.mulf %346, %347 : vector<16x16xf32>
    %349 = arith.addf %329, %348 : vector<16x16xf32>
    %c54 = arith.constant 54 : index
    %350 = memref.load %arg4[%c54] : memref<98xf32, #tpu.memory_space<smem>>
    %351 = vector.extract_strided_slice %324 {offsets = [0, 5], sizes = [16, 16], strides = [1, 1]} : vector<16x22xf32> to vector<16x16xf32>
    %352 = vector.broadcast %350 : f32 to vector<16x16xf32>
    %353 = arith.mulf %351, %352 : vector<16x16xf32>
    %354 = arith.addf %334, %353 : vector<16x16xf32>
    %c55 = arith.constant 55 : index
    %355 = memref.load %arg4[%c55] : memref<98xf32, #tpu.memory_space<smem>>
    %356 = vector.extract_strided_slice %324 {offsets = [0, 6], sizes = [16, 16], strides = [1, 1]} : vector<16x22xf32> to vector<16x16xf32>
    %357 = vector.broadcast %355 : f32 to vector<16x16xf32>
    %358 = arith.mulf %356, %357 : vector<16x16xf32>
    %359 = arith.addf %339, %358 : vector<16x16xf32>
    %c1_69 = arith.constant 1 : index
    %c1_70 = arith.constant 1 : index
    %c0_71 = arith.constant 0 : index
    %360 = vector.load %arg6[%c1_69, %c1_70, %c0_71] : memref<2x22x22xf32, #tpu.memory_space<vmem>>, vector<1x16x22xf32>
    %361 = vector.shape_cast %360 : vector<1x16x22xf32> to vector<16x22xf32>
    %c56 = arith.constant 56 : index
    %362 = memref.load %arg4[%c56] : memref<98xf32, #tpu.memory_space<smem>>
    %363 = vector.extract_strided_slice %361 {offsets = [0, 0], sizes = [16, 16], strides = [1, 1]} : vector<16x22xf32> to vector<16x16xf32>
    %364 = vector.broadcast %362 : f32 to vector<16x16xf32>
    %365 = arith.mulf %363, %364 : vector<16x16xf32>
    %366 = arith.addf %344, %365 : vector<16x16xf32>
    %c57 = arith.constant 57 : index
    %367 = memref.load %arg4[%c57] : memref<98xf32, #tpu.memory_space<smem>>
    %368 = vector.extract_strided_slice %361 {offsets = [0, 1], sizes = [16, 16], strides = [1, 1]} : vector<16x22xf32> to vector<16x16xf32>
    %369 = vector.broadcast %367 : f32 to vector<16x16xf32>
    %370 = arith.mulf %368, %369 : vector<16x16xf32>
    %371 = arith.addf %349, %370 : vector<16x16xf32>
    %c58 = arith.constant 58 : index
    %372 = memref.load %arg4[%c58] : memref<98xf32, #tpu.memory_space<smem>>
    %373 = vector.extract_strided_slice %361 {offsets = [0, 2], sizes = [16, 16], strides = [1, 1]} : vector<16x22xf32> to vector<16x16xf32>
    %374 = vector.broadcast %372 : f32 to vector<16x16xf32>
    %375 = arith.mulf %373, %374 : vector<16x16xf32>
    %376 = arith.addf %354, %375 : vector<16x16xf32>
    %c59 = arith.constant 59 : index
    %377 = memref.load %arg4[%c59] : memref<98xf32, #tpu.memory_space<smem>>
    %378 = vector.extract_strided_slice %361 {offsets = [0, 3], sizes = [16, 16], strides = [1, 1]} : vector<16x22xf32> to vector<16x16xf32>
    %379 = vector.broadcast %377 : f32 to vector<16x16xf32>
    %380 = arith.mulf %378, %379 : vector<16x16xf32>
    %381 = arith.addf %359, %380 : vector<16x16xf32>
    %c60 = arith.constant 60 : index
    %382 = memref.load %arg4[%c60] : memref<98xf32, #tpu.memory_space<smem>>
    %383 = vector.extract_strided_slice %361 {offsets = [0, 4], sizes = [16, 16], strides = [1, 1]} : vector<16x22xf32> to vector<16x16xf32>
    %384 = vector.broadcast %382 : f32 to vector<16x16xf32>
    %385 = arith.mulf %383, %384 : vector<16x16xf32>
    %386 = arith.addf %366, %385 : vector<16x16xf32>
    %c61 = arith.constant 61 : index
    %387 = memref.load %arg4[%c61] : memref<98xf32, #tpu.memory_space<smem>>
    %388 = vector.extract_strided_slice %361 {offsets = [0, 5], sizes = [16, 16], strides = [1, 1]} : vector<16x22xf32> to vector<16x16xf32>
    %389 = vector.broadcast %387 : f32 to vector<16x16xf32>
    %390 = arith.mulf %388, %389 : vector<16x16xf32>
    %391 = arith.addf %371, %390 : vector<16x16xf32>
    %c62 = arith.constant 62 : index
    %392 = memref.load %arg4[%c62] : memref<98xf32, #tpu.memory_space<smem>>
    %393 = vector.extract_strided_slice %361 {offsets = [0, 6], sizes = [16, 16], strides = [1, 1]} : vector<16x22xf32> to vector<16x16xf32>
    %394 = vector.broadcast %392 : f32 to vector<16x16xf32>
    %395 = arith.mulf %393, %394 : vector<16x16xf32>
    %396 = arith.addf %376, %395 : vector<16x16xf32>
    %c1_72 = arith.constant 1 : index
    %c2_73 = arith.constant 2 : index
    %c0_74 = arith.constant 0 : index
    %397 = vector.load %arg6[%c1_72, %c2_73, %c0_74] : memref<2x22x22xf32, #tpu.memory_space<vmem>>, vector<1x16x22xf32>
    %398 = vector.shape_cast %397 : vector<1x16x22xf32> to vector<16x22xf32>
    %c63 = arith.constant 63 : index
    %399 = memref.load %arg4[%c63] : memref<98xf32, #tpu.memory_space<smem>>
    %400 = vector.extract_strided_slice %398 {offsets = [0, 0], sizes = [16, 16], strides = [1, 1]} : vector<16x22xf32> to vector<16x16xf32>
    %401 = vector.broadcast %399 : f32 to vector<16x16xf32>
    %402 = arith.mulf %400, %401 : vector<16x16xf32>
    %403 = arith.addf %381, %402 : vector<16x16xf32>
    %c64 = arith.constant 64 : index
    %404 = memref.load %arg4[%c64] : memref<98xf32, #tpu.memory_space<smem>>
    %405 = vector.extract_strided_slice %398 {offsets = [0, 1], sizes = [16, 16], strides = [1, 1]} : vector<16x22xf32> to vector<16x16xf32>
    %406 = vector.broadcast %404 : f32 to vector<16x16xf32>
    %407 = arith.mulf %405, %406 : vector<16x16xf32>
    %408 = arith.addf %386, %407 : vector<16x16xf32>
    %c65 = arith.constant 65 : index
    %409 = memref.load %arg4[%c65] : memref<98xf32, #tpu.memory_space<smem>>
    %410 = vector.extract_strided_slice %398 {offsets = [0, 2], sizes = [16, 16], strides = [1, 1]} : vector<16x22xf32> to vector<16x16xf32>
    %411 = vector.broadcast %409 : f32 to vector<16x16xf32>
    %412 = arith.mulf %410, %411 : vector<16x16xf32>
    %413 = arith.addf %391, %412 : vector<16x16xf32>
    %c66 = arith.constant 66 : index
    %414 = memref.load %arg4[%c66] : memref<98xf32, #tpu.memory_space<smem>>
    %415 = vector.extract_strided_slice %398 {offsets = [0, 3], sizes = [16, 16], strides = [1, 1]} : vector<16x22xf32> to vector<16x16xf32>
    %416 = vector.broadcast %414 : f32 to vector<16x16xf32>
    %417 = arith.mulf %415, %416 : vector<16x16xf32>
    %418 = arith.addf %396, %417 : vector<16x16xf32>
    %c67 = arith.constant 67 : index
    %419 = memref.load %arg4[%c67] : memref<98xf32, #tpu.memory_space<smem>>
    %420 = vector.extract_strided_slice %398 {offsets = [0, 4], sizes = [16, 16], strides = [1, 1]} : vector<16x22xf32> to vector<16x16xf32>
    %421 = vector.broadcast %419 : f32 to vector<16x16xf32>
    %422 = arith.mulf %420, %421 : vector<16x16xf32>
    %423 = arith.addf %403, %422 : vector<16x16xf32>
    %c68 = arith.constant 68 : index
    %424 = memref.load %arg4[%c68] : memref<98xf32, #tpu.memory_space<smem>>
    %425 = vector.extract_strided_slice %398 {offsets = [0, 5], sizes = [16, 16], strides = [1, 1]} : vector<16x22xf32> to vector<16x16xf32>
    %426 = vector.broadcast %424 : f32 to vector<16x16xf32>
    %427 = arith.mulf %425, %426 : vector<16x16xf32>
    %428 = arith.addf %408, %427 : vector<16x16xf32>
    %c69 = arith.constant 69 : index
    %429 = memref.load %arg4[%c69] : memref<98xf32, #tpu.memory_space<smem>>
    %430 = vector.extract_strided_slice %398 {offsets = [0, 6], sizes = [16, 16], strides = [1, 1]} : vector<16x22xf32> to vector<16x16xf32>
    %431 = vector.broadcast %429 : f32 to vector<16x16xf32>
    %432 = arith.mulf %430, %431 : vector<16x16xf32>
    %433 = arith.addf %413, %432 : vector<16x16xf32>
    %c1_75 = arith.constant 1 : index
    %c3_76 = arith.constant 3 : index
    %c0_77 = arith.constant 0 : index
    %434 = vector.load %arg6[%c1_75, %c3_76, %c0_77] : memref<2x22x22xf32, #tpu.memory_space<vmem>>, vector<1x16x22xf32>
    %435 = vector.shape_cast %434 : vector<1x16x22xf32> to vector<16x22xf32>
    %c70 = arith.constant 70 : index
    %436 = memref.load %arg4[%c70] : memref<98xf32, #tpu.memory_space<smem>>
    %437 = vector.extract_strided_slice %435 {offsets = [0, 0], sizes = [16, 16], strides = [1, 1]} : vector<16x22xf32> to vector<16x16xf32>
    %438 = vector.broadcast %436 : f32 to vector<16x16xf32>
    %439 = arith.mulf %437, %438 : vector<16x16xf32>
    %440 = arith.addf %418, %439 : vector<16x16xf32>
    %c71 = arith.constant 71 : index
    %441 = memref.load %arg4[%c71] : memref<98xf32, #tpu.memory_space<smem>>
    %442 = vector.extract_strided_slice %435 {offsets = [0, 1], sizes = [16, 16], strides = [1, 1]} : vector<16x22xf32> to vector<16x16xf32>
    %443 = vector.broadcast %441 : f32 to vector<16x16xf32>
    %444 = arith.mulf %442, %443 : vector<16x16xf32>
    %445 = arith.addf %423, %444 : vector<16x16xf32>
    %c72 = arith.constant 72 : index
    %446 = memref.load %arg4[%c72] : memref<98xf32, #tpu.memory_space<smem>>
    %447 = vector.extract_strided_slice %435 {offsets = [0, 2], sizes = [16, 16], strides = [1, 1]} : vector<16x22xf32> to vector<16x16xf32>
    %448 = vector.broadcast %446 : f32 to vector<16x16xf32>
    %449 = arith.mulf %447, %448 : vector<16x16xf32>
    %450 = arith.addf %428, %449 : vector<16x16xf32>
    %c73 = arith.constant 73 : index
    %451 = memref.load %arg4[%c73] : memref<98xf32, #tpu.memory_space<smem>>
    %452 = vector.extract_strided_slice %435 {offsets = [0, 3], sizes = [16, 16], strides = [1, 1]} : vector<16x22xf32> to vector<16x16xf32>
    %453 = vector.broadcast %451 : f32 to vector<16x16xf32>
    %454 = arith.mulf %452, %453 : vector<16x16xf32>
    %455 = arith.addf %433, %454 : vector<16x16xf32>
    %c74 = arith.constant 74 : index
    %456 = memref.load %arg4[%c74] : memref<98xf32, #tpu.memory_space<smem>>
    %457 = vector.extract_strided_slice %435 {offsets = [0, 4], sizes = [16, 16], strides = [1, 1]} : vector<16x22xf32> to vector<16x16xf32>
    %458 = vector.broadcast %456 : f32 to vector<16x16xf32>
    %459 = arith.mulf %457, %458 : vector<16x16xf32>
    %460 = arith.addf %440, %459 : vector<16x16xf32>
    %c75 = arith.constant 75 : index
    %461 = memref.load %arg4[%c75] : memref<98xf32, #tpu.memory_space<smem>>
    %462 = vector.extract_strided_slice %435 {offsets = [0, 5], sizes = [16, 16], strides = [1, 1]} : vector<16x22xf32> to vector<16x16xf32>
    %463 = vector.broadcast %461 : f32 to vector<16x16xf32>
    %464 = arith.mulf %462, %463 : vector<16x16xf32>
    %465 = arith.addf %445, %464 : vector<16x16xf32>
    %c76 = arith.constant 76 : index
    %466 = memref.load %arg4[%c76] : memref<98xf32, #tpu.memory_space<smem>>
    %467 = vector.extract_strided_slice %435 {offsets = [0, 6], sizes = [16, 16], strides = [1, 1]} : vector<16x22xf32> to vector<16x16xf32>
    %468 = vector.broadcast %466 : f32 to vector<16x16xf32>
    %469 = arith.mulf %467, %468 : vector<16x16xf32>
    %470 = arith.addf %450, %469 : vector<16x16xf32>
    %c1_78 = arith.constant 1 : index
    %c4_79 = arith.constant 4 : index
    %c0_80 = arith.constant 0 : index
    %471 = vector.load %arg6[%c1_78, %c4_79, %c0_80] : memref<2x22x22xf32, #tpu.memory_space<vmem>>, vector<1x16x22xf32>
    %472 = vector.shape_cast %471 : vector<1x16x22xf32> to vector<16x22xf32>
    %c77 = arith.constant 77 : index
    %473 = memref.load %arg4[%c77] : memref<98xf32, #tpu.memory_space<smem>>
    %474 = vector.extract_strided_slice %472 {offsets = [0, 0], sizes = [16, 16], strides = [1, 1]} : vector<16x22xf32> to vector<16x16xf32>
    %475 = vector.broadcast %473 : f32 to vector<16x16xf32>
    %476 = arith.mulf %474, %475 : vector<16x16xf32>
    %477 = arith.addf %455, %476 : vector<16x16xf32>
    %c78 = arith.constant 78 : index
    %478 = memref.load %arg4[%c78] : memref<98xf32, #tpu.memory_space<smem>>
    %479 = vector.extract_strided_slice %472 {offsets = [0, 1], sizes = [16, 16], strides = [1, 1]} : vector<16x22xf32> to vector<16x16xf32>
    %480 = vector.broadcast %478 : f32 to vector<16x16xf32>
    %481 = arith.mulf %479, %480 : vector<16x16xf32>
    %482 = arith.addf %460, %481 : vector<16x16xf32>
    %c79 = arith.constant 79 : index
    %483 = memref.load %arg4[%c79] : memref<98xf32, #tpu.memory_space<smem>>
    %484 = vector.extract_strided_slice %472 {offsets = [0, 2], sizes = [16, 16], strides = [1, 1]} : vector<16x22xf32> to vector<16x16xf32>
    %485 = vector.broadcast %483 : f32 to vector<16x16xf32>
    %486 = arith.mulf %484, %485 : vector<16x16xf32>
    %487 = arith.addf %465, %486 : vector<16x16xf32>
    %c80 = arith.constant 80 : index
    %488 = memref.load %arg4[%c80] : memref<98xf32, #tpu.memory_space<smem>>
    %489 = vector.extract_strided_slice %472 {offsets = [0, 3], sizes = [16, 16], strides = [1, 1]} : vector<16x22xf32> to vector<16x16xf32>
    %490 = vector.broadcast %488 : f32 to vector<16x16xf32>
    %491 = arith.mulf %489, %490 : vector<16x16xf32>
    %492 = arith.addf %470, %491 : vector<16x16xf32>
    %c81 = arith.constant 81 : index
    %493 = memref.load %arg4[%c81] : memref<98xf32, #tpu.memory_space<smem>>
    %494 = vector.extract_strided_slice %472 {offsets = [0, 4], sizes = [16, 16], strides = [1, 1]} : vector<16x22xf32> to vector<16x16xf32>
    %495 = vector.broadcast %493 : f32 to vector<16x16xf32>
    %496 = arith.mulf %494, %495 : vector<16x16xf32>
    %497 = arith.addf %477, %496 : vector<16x16xf32>
    %c82 = arith.constant 82 : index
    %498 = memref.load %arg4[%c82] : memref<98xf32, #tpu.memory_space<smem>>
    %499 = vector.extract_strided_slice %472 {offsets = [0, 5], sizes = [16, 16], strides = [1, 1]} : vector<16x22xf32> to vector<16x16xf32>
    %500 = vector.broadcast %498 : f32 to vector<16x16xf32>
    %501 = arith.mulf %499, %500 : vector<16x16xf32>
    %502 = arith.addf %482, %501 : vector<16x16xf32>
    %c83 = arith.constant 83 : index
    %503 = memref.load %arg4[%c83] : memref<98xf32, #tpu.memory_space<smem>>
    %504 = vector.extract_strided_slice %472 {offsets = [0, 6], sizes = [16, 16], strides = [1, 1]} : vector<16x22xf32> to vector<16x16xf32>
    %505 = vector.broadcast %503 : f32 to vector<16x16xf32>
    %506 = arith.mulf %504, %505 : vector<16x16xf32>
    %507 = arith.addf %487, %506 : vector<16x16xf32>
    %c1_81 = arith.constant 1 : index
    %c5_82 = arith.constant 5 : index
    %c0_83 = arith.constant 0 : index
    %508 = vector.load %arg6[%c1_81, %c5_82, %c0_83] : memref<2x22x22xf32, #tpu.memory_space<vmem>>, vector<1x16x22xf32>
    %509 = vector.shape_cast %508 : vector<1x16x22xf32> to vector<16x22xf32>
    %c84 = arith.constant 84 : index
    %510 = memref.load %arg4[%c84] : memref<98xf32, #tpu.memory_space<smem>>
    %511 = vector.extract_strided_slice %509 {offsets = [0, 0], sizes = [16, 16], strides = [1, 1]} : vector<16x22xf32> to vector<16x16xf32>
    %512 = vector.broadcast %510 : f32 to vector<16x16xf32>
    %513 = arith.mulf %511, %512 : vector<16x16xf32>
    %514 = arith.addf %492, %513 : vector<16x16xf32>
    %c85 = arith.constant 85 : index
    %515 = memref.load %arg4[%c85] : memref<98xf32, #tpu.memory_space<smem>>
    %516 = vector.extract_strided_slice %509 {offsets = [0, 1], sizes = [16, 16], strides = [1, 1]} : vector<16x22xf32> to vector<16x16xf32>
    %517 = vector.broadcast %515 : f32 to vector<16x16xf32>
    %518 = arith.mulf %516, %517 : vector<16x16xf32>
    %519 = arith.addf %497, %518 : vector<16x16xf32>
    %c86 = arith.constant 86 : index
    %520 = memref.load %arg4[%c86] : memref<98xf32, #tpu.memory_space<smem>>
    %521 = vector.extract_strided_slice %509 {offsets = [0, 2], sizes = [16, 16], strides = [1, 1]} : vector<16x22xf32> to vector<16x16xf32>
    %522 = vector.broadcast %520 : f32 to vector<16x16xf32>
    %523 = arith.mulf %521, %522 : vector<16x16xf32>
    %524 = arith.addf %502, %523 : vector<16x16xf32>
    %c87 = arith.constant 87 : index
    %525 = memref.load %arg4[%c87] : memref<98xf32, #tpu.memory_space<smem>>
    %526 = vector.extract_strided_slice %509 {offsets = [0, 3], sizes = [16, 16], strides = [1, 1]} : vector<16x22xf32> to vector<16x16xf32>
    %527 = vector.broadcast %525 : f32 to vector<16x16xf32>
    %528 = arith.mulf %526, %527 : vector<16x16xf32>
    %529 = arith.addf %507, %528 : vector<16x16xf32>
    %c88 = arith.constant 88 : index
    %530 = memref.load %arg4[%c88] : memref<98xf32, #tpu.memory_space<smem>>
    %531 = vector.extract_strided_slice %509 {offsets = [0, 4], sizes = [16, 16], strides = [1, 1]} : vector<16x22xf32> to vector<16x16xf32>
    %532 = vector.broadcast %530 : f32 to vector<16x16xf32>
    %533 = arith.mulf %531, %532 : vector<16x16xf32>
    %534 = arith.addf %514, %533 : vector<16x16xf32>
    %c89 = arith.constant 89 : index
    %535 = memref.load %arg4[%c89] : memref<98xf32, #tpu.memory_space<smem>>
    %536 = vector.extract_strided_slice %509 {offsets = [0, 5], sizes = [16, 16], strides = [1, 1]} : vector<16x22xf32> to vector<16x16xf32>
    %537 = vector.broadcast %535 : f32 to vector<16x16xf32>
    %538 = arith.mulf %536, %537 : vector<16x16xf32>
    %539 = arith.addf %519, %538 : vector<16x16xf32>
    %c90 = arith.constant 90 : index
    %540 = memref.load %arg4[%c90] : memref<98xf32, #tpu.memory_space<smem>>
    %541 = vector.extract_strided_slice %509 {offsets = [0, 6], sizes = [16, 16], strides = [1, 1]} : vector<16x22xf32> to vector<16x16xf32>
    %542 = vector.broadcast %540 : f32 to vector<16x16xf32>
    %543 = arith.mulf %541, %542 : vector<16x16xf32>
    %544 = arith.addf %524, %543 : vector<16x16xf32>
    %c1_84 = arith.constant 1 : index
    %c6_85 = arith.constant 6 : index
    %c0_86 = arith.constant 0 : index
    %545 = vector.load %arg6[%c1_84, %c6_85, %c0_86] : memref<2x22x22xf32, #tpu.memory_space<vmem>>, vector<1x16x22xf32>
    %546 = vector.shape_cast %545 : vector<1x16x22xf32> to vector<16x22xf32>
    %c91 = arith.constant 91 : index
    %547 = memref.load %arg4[%c91] : memref<98xf32, #tpu.memory_space<smem>>
    %548 = vector.extract_strided_slice %546 {offsets = [0, 0], sizes = [16, 16], strides = [1, 1]} : vector<16x22xf32> to vector<16x16xf32>
    %549 = vector.broadcast %547 : f32 to vector<16x16xf32>
    %550 = arith.mulf %548, %549 : vector<16x16xf32>
    %551 = arith.addf %529, %550 : vector<16x16xf32>
    %c92 = arith.constant 92 : index
    %552 = memref.load %arg4[%c92] : memref<98xf32, #tpu.memory_space<smem>>
    %553 = vector.extract_strided_slice %546 {offsets = [0, 1], sizes = [16, 16], strides = [1, 1]} : vector<16x22xf32> to vector<16x16xf32>
    %554 = vector.broadcast %552 : f32 to vector<16x16xf32>
    %555 = arith.mulf %553, %554 : vector<16x16xf32>
    %556 = arith.addf %534, %555 : vector<16x16xf32>
    %c93 = arith.constant 93 : index
    %557 = memref.load %arg4[%c93] : memref<98xf32, #tpu.memory_space<smem>>
    %558 = vector.extract_strided_slice %546 {offsets = [0, 2], sizes = [16, 16], strides = [1, 1]} : vector<16x22xf32> to vector<16x16xf32>
    %559 = vector.broadcast %557 : f32 to vector<16x16xf32>
    %560 = arith.mulf %558, %559 : vector<16x16xf32>
    %561 = arith.addf %539, %560 : vector<16x16xf32>
    %c94 = arith.constant 94 : index
    %562 = memref.load %arg4[%c94] : memref<98xf32, #tpu.memory_space<smem>>
    %563 = vector.extract_strided_slice %546 {offsets = [0, 3], sizes = [16, 16], strides = [1, 1]} : vector<16x22xf32> to vector<16x16xf32>
    %564 = vector.broadcast %562 : f32 to vector<16x16xf32>
    %565 = arith.mulf %563, %564 : vector<16x16xf32>
    %566 = arith.addf %544, %565 : vector<16x16xf32>
    %c95 = arith.constant 95 : index
    %567 = memref.load %arg4[%c95] : memref<98xf32, #tpu.memory_space<smem>>
    %568 = vector.extract_strided_slice %546 {offsets = [0, 4], sizes = [16, 16], strides = [1, 1]} : vector<16x22xf32> to vector<16x16xf32>
    %569 = vector.broadcast %567 : f32 to vector<16x16xf32>
    %570 = arith.mulf %568, %569 : vector<16x16xf32>
    %571 = arith.addf %551, %570 : vector<16x16xf32>
    %c96 = arith.constant 96 : index
    %572 = memref.load %arg4[%c96] : memref<98xf32, #tpu.memory_space<smem>>
    %573 = vector.extract_strided_slice %546 {offsets = [0, 5], sizes = [16, 16], strides = [1, 1]} : vector<16x22xf32> to vector<16x16xf32>
    %574 = vector.broadcast %572 : f32 to vector<16x16xf32>
    %575 = arith.mulf %573, %574 : vector<16x16xf32>
    %576 = arith.addf %556, %575 : vector<16x16xf32>
    %c97 = arith.constant 97 : index
    %577 = memref.load %arg4[%c97] : memref<98xf32, #tpu.memory_space<smem>>
    %578 = vector.extract_strided_slice %546 {offsets = [0, 6], sizes = [16, 16], strides = [1, 1]} : vector<16x22xf32> to vector<16x16xf32>
    %579 = vector.broadcast %577 : f32 to vector<16x16xf32>
    %580 = arith.mulf %578, %579 : vector<16x16xf32>
    %581 = arith.addf %561, %580 : vector<16x16xf32>
    %582 = arith.addf %576, %581 : vector<16x16xf32>
    %583 = arith.addf %566, %571 : vector<16x16xf32>
    %584 = arith.addf %582, %583 : vector<16x16xf32>
    %585 = arith.negf %584 : vector<16x16xf32>
    %586 = math.exp %585 : vector<16x16xf32>
    %cst_87 = arith.constant 1.000000e+00 : f32
    %587 = vector.broadcast %cst_87 : f32 to vector<16x16xf32>
    %588 = arith.addf %587, %586 : vector<16x16xf32>
    %589 = arith.divf %587, %588 : vector<16x16xf32>
    %590 = vector.shape_cast %589 : vector<16x16xf32> to vector<1x16x16xf32>
    %591 = vector.broadcast %590 : vector<1x16x16xf32> to vector<32x16x16xf32>
    %592 = arith.mulf %47, %591 : vector<32x16x16xf32>
    %c0_88 = arith.constant 0 : index
    %c0_89 = arith.constant 0 : index
    %c0_90 = arith.constant 0 : index
    %c0_91 = arith.constant 0 : index
    %593 = vector.load %arg5[%c0_88, %c0_89, %c0_90, %c0_91] : memref<1x32x16x16xf32, #tpu.memory_space<vmem>>, vector<1x32x16x16xf32>
    %594 = vector.shape_cast %593 : vector<1x32x16x16xf32> to vector<32x16x16xf32>
    %595 = vector.shape_cast %592 : vector<32x16x16xf32> to vector<1x32x16x16xf32>
    tpu.vector_store %arg5[%c0_88, %c0_89, %c0_90, %c0_91], %595 {strides = array<i32>} : memref<1x32x16x16xf32, #tpu.memory_space<vmem>>, vector<1x32x16x16xf32>,
    return
  }
  func.func @transform_0(%arg0: i32) -> (i32, i32, i32, i32) {
    %c0_i32 = arith.constant 0 : i32
    %c0_i32_0 = arith.constant 0 : i32
    %c0_i32_1 = arith.constant 0 : i32
    %c0_i32_2 = arith.constant 0 : i32
    return %arg0, %c0_i32, %c0_i32_0, %c0_i32_1 : i32, i32, i32, i32
  }
  func.func @transform_1(%arg0: i32) -> (i32, i32) {
    %c0_i32 = arith.constant 0 : i32
    %c0_i32_0 = arith.constant 0 : i32
    %c0_i32_1 = arith.constant 0 : i32
    return %c0_i32, %c0_i32_0 : i32, i32
  }
  func.func @transform_2(%arg0: i32) -> (i32, i32) {
    %c0_i32 = arith.constant 0 : i32
    %c0_i32_0 = arith.constant 0 : i32
    %c0_i32_1 = arith.constant 0 : i32
    return %c0_i32, %c0_i32_0 : i32, i32
  }
  func.func @transform_3(%arg0: i32) -> i32 {
    %c0_i32 = arith.constant 0 : i32
    %c0_i32_0 = arith.constant 0 : i32
    return %c0_i32 : i32
  }
  func.func @transform_4(%arg0: i32) -> (i32, i32, i32, i32) {
    %c0_i32 = arith.constant 0 : i32
    %c0_i32_0 = arith.constant 0 : i32
    %c0_i32_1 = arith.constant 0 : i32
    %c0_i32_2 = arith.constant 0 : i32
    return %arg0, %c0_i32, %c0_i32_0, %c0_i32_1 : i32, i32, i32, i32
  }
}

</mosaic_0001>

<bundles_post_ra>
// kernel: cbam_forward.1
= control target key start
LH: loop header
LB: loop body
LE: loop exit
PB: predicated region body
PF: predicated region fallthrough
CT: control target
= control target key end

     0   :  { %9 = vsyncpa [#allocation4], 0  ;;  %s4162_s15 = smov 0   ;;  %s7110_s0 = inlined_call_operand.vmem [shape: f32[2,32,16,16], index: 0, kind: input, shape index: {}]   ;;  %s7111_s1 = inlined_call_operand.vmem [shape: f32[32,4], index: 1, kind: input, shape index: {}]   ;;  %s7112_s2 = inlined_call_operand.vmem [shape: f32[32,4], index: 2, kind: input, shape index: {}]   ;;  %s7113_s3 = inlined_call_operand.vmem [shape: f32[98], index: 3, kind: input, shape index: {}]   ;;  %s7114_s4 = inlined_call_operand.vmem [shape: f32[2,32,16,16], index: 4, kind: output, shape index: {}]  }
   0x1 LB: > { %s3788_s16 = sadd.s32 4294967295, %s4124_s15   ;;  %p3790_p0 = scmp.ge.s32.totalorder %s4124_s15, 1  ;;  %s4124_s15 = sphi %s4162_s15, %s15_s15  }
   0x2   : > { %p135_p1 = scmp.lt.s32.totalorder %s4124_s15, 3  ;;  %s154_s19 = sshll.u32 %s7113_s3, 4  ;;  %s155_s19 = int_to_ptr.vmem [resolvable:$true] %s154_s19 }
   0x3   : > { %p3914_p3 = scmp.eq.s32.totalorder %s3788_s16, 0  ;;  %s4099_s21 = scalar_lea.vmem %s155_s19, 16 }
   0x4   : > { %p4173_p2 = pnand %p3790_p0, %p135_p1  ;;  %p4100_p6 = scmp.ne.s32.totalorder %s155_s19, %s4099_s21 }
   0x5   : > { %p4107_p10 = scmp.lt.s32.totalorder %s155_s19, %s155_s19  ;;  %p4108_p11 = scmp.lt.s32.totalorder %s4099_s21, %s4099_s21 }
   0x6   : > { %p3910_p4 = pneg %p4173_p2 }
   0x7   : > { %p4109_p12 = por %p4108_p11, %p4107_p10 }
   0x8   : > { %p3911_p5 = pnand %p3914_p3, %p3910_p4 }
   0xa   : > { %p4101_p7 = pneg %p3911_p5 }
   0xc   : > { %p4102_p8 = pnand %p4101_p7, %p4100_p6 }
   0xe   : > { %p4103_p9 = pneg %p4102_p8 }
  0x10   : > { %p4110_p13 = pnand %p4109_p12, %p4103_p9 }
  0x12   : > { %4113 = shalt.err (!%p4110_p13)
}
  0x13   : > { %s4126_s22 = smov [#allocation3]   ;;  %175 = sbr.rel (%p4173_p2) target bundleno = 1602 (0x642), region = 36 }
  0x14   : > { %3913 = dma.vmem_to_smem (!%p3911_p5), %s155_s19, 16, %s4126_s22, [#allocation4]  }
  0x1a   : > { %4119 = dma.done.wait (%p3914_p3), [#allocation4], 16  }
  0x1b   : > { %4121 = vsyncadd (%p3914_p3), [#allocation4], 4294967280 }
  0x1c   : > { %181 = sfence }
  0x1d   : > { %p202_p0 = scmp.lt.s32.totalorder %s3788_s16, 1  ;;  %vm276_vm0 = vcmask 130048   ;;  %vm609_vm1 = vcmask 130112   ;;  %vm890_vm2 = vcmask 1041409   ;;  %vm892_vm3 = vcmask 1042434   ;;  %s5826_s22 = sld [smem:[#allocation3 + $0x33]] }
  0x1e   : > { %vm894_vm4 = vcmask 1043459   ;;  %vm896_vm5 = vcmask 1044484   ;;  %vm898_vm6 = vcmask 1045509   ;;  %vm900_vm7 = vcmask 1046534   ;;  %s5832_s24 = sld [smem:[#allocation3 + $0x3f]]  ;;  %s5838_s25 = sld [smem:[#allocation3 + $0x43]] }
  0x1f   : > { %s7199_s16 = smov (!%p202_p0, %s3788_s16), 1  ;;  %vm902_vm8 = vcmask 1047559   ;;  %vm1545_vm9 = vcmask 31744   ;;  %vm2249_vm10 = vcmask 179200   ;;  %vm2252_vm11 = vcmask 177152   ;;  %s5845_s27 = sld [smem:[#allocation3 + $0x47]] }
  0x20   : > { %s3904_s23 = sshll.u32 %s7199_s16, 9  ;;  %s4128_s16 = smov 3   ;;  %vm2265_vm12 = vcmask 154648  }
  0x21   : > { %s4192_s26 = scalar_lea.vmem %s7110_s0, %s3904_s23  ;;  %s5184_s21 = scalar_lea.vmem %s7114_s4, %s3904_s23 }
  0x22   : > { %v4195_v0 = vld [vmem:[%s4192_s26 + $0x10] sm:$0xff]  ;;  %v4198_v1 = vld [vmem:[%s4192_s26] sm:$0xff]  ;;  %v4201_v2 = vld [vmem:[%s4192_s26 + $0x18] sm:$0xff]  ;;  %s5829_s23 = sld [smem:[#allocation3 + $0x37]]  ;;  %s4130_s28 = smov 125  }
  0x23   : > { %v283_v3 = vsel %vm276_vm0, %v4195_v0, 0.0  ;;  %v277_v4 = vsel %vm276_vm0, %v4198_v1, 0.0  ;;  %v4208_v5 = vld [vmem:[%s4192_s26 + $0x8] sm:$0xff]  ;;  %v286_v6 = vsel %vm276_vm0, %v4201_v2, 0.0  ;;  %v4218_v9 = vld [vmem:[%s4192_s26 + $0x80] sm:$0xff]  ;;  %v4225_v12 = vld [vmem:[%s4192_s26 + $0x98] sm:$0xff] }
  0x24   : > { %284 = vadd.xlane.f32.xlu1 %v283_v3  ;;  %278 = vadd.xlane.f32.xlu0 %v277_v4  ;;  %v280_v7 = vsel %vm276_vm0, %v4208_v5, 0.0  ;;  %v4215_v8 = vld [vmem:[%s4192_s26 + $0x88] sm:$0xff]  ;;  %v325_v11 = vsel %vm276_vm0, %v4218_v9, 0.0  ;;  %v4228_v13 = vld [vmem:[%s4192_s26 + $0x90] sm:$0xff]  ;;  %v334_v14 = vsel %vm276_vm0, %v4225_v12, 0.0  ;;  %v4238_v17 = vld [vmem:[%s4192_s26 + $0x20] sm:$0xff] }
  0x25   : > { %v328_v10 = vsel %vm276_vm0, %v4215_v8, 0.0  ;;  %v331_v15 = vsel %vm276_vm0, %v4228_v13, 0.0  ;;  %v4235_v16 = vld [vmem:[%s4192_s26 + $0x28] sm:$0xff]  ;;  %v289_v19 = vsel %vm276_vm0, %v4238_v17, 0.0  ;;  %v4248_v21 = vld [vmem:[%s4192_s26 + $0xa0] sm:$0xff]  ;;  %v4255_v24 = vld [vmem:[%s4192_s26 + $0x38] sm:$0xff] }
  0x26   : > { %v292_v18 = vsel %vm276_vm0, %v4235_v16, 0.0  ;;  %v4245_v20 = vld [vmem:[%s4192_s26 + $0xa8] sm:$0xff]  ;;  %v337_v23 = vsel %vm276_vm0, %v4248_v21, 0.0  ;;  %v4258_v25 = vld [vmem:[%s4192_s26 + $0x30] sm:$0xff]  ;;  %v298_v26 = vsel %vm276_vm0, %v4255_v24, 0.0  ;;  %v4265_v28 = vld [vmem:[%s4192_s26 + $0xb8] sm:$0xff] }
  0x27   : > { %v340_v22 = vsel %vm276_vm0, %v4245_v20, 0.0  ;;  %v295_v27 = vsel %vm276_vm0, %v4258_v25, 0.0  ;;  %v4268_v29 = vld [vmem:[%s4192_s26 + $0xb0] sm:$0xff]  ;;  %v346_v30 = vsel %vm276_vm0, %v4265_v28, 0.0  ;;  %v4275_v32 = vld [vmem:[%s4192_s26 + $0x108] sm:$0xff]  ;;  %v4278_v33 = vld [vmem:[%s4192_s26 + $0x100] sm:$0xff] }
  0x28   : > { %287 = vadd.xlane.f32.xlu1 %v286_v6  ;;  %281 = vadd.xlane.f32.xlu0 %v280_v7  ;;  %v343_v31 = vsel %vm276_vm0, %v4268_v29, 0.0  ;;  %v376_v34 = vsel %vm276_vm0, %v4275_v32, 0.0  ;;  %v373_v35 = vsel %vm276_vm0, %v4278_v33, 0.0  ;;  %v4285_v36 = vld [vmem:[%s4192_s26 + $0x118] sm:$0xff]  ;;  %v4288_v37 = vld [vmem:[%s4192_s26 + $0x110] sm:$0xff]  ;;  %v4295_v40 = vld [vmem:[%s4192_s26 + $0x48] sm:$0xff] }
  0x29   : > { %v382_v38 = vsel %vm276_vm0, %v4285_v36, 0.0  ;;  %v379_v39 = vsel %vm276_vm0, %v4288_v37, 0.0  ;;  %v4298_v41 = vld [vmem:[%s4192_s26 + $0x40] sm:$0xff]  ;;  %v304_v42 = vsel %vm276_vm0, %v4295_v40, 0.0  ;;  %v4305_v44 = vld [vmem:[%s4192_s26 + $0xc8] sm:$0xff]  ;;  %v4325_v52 = vld [vmem:[%s4192_s26 + $0x58] sm:$0xff] }
  0x2a   : > { %v301_v43 = vsel %vm276_vm0, %v4298_v41, 0.0  ;;  %v4308_v45 = vld [vmem:[%s4192_s26 + $0xc0] sm:$0xff]  ;;  %v352_v46 = vsel %vm276_vm0, %v4305_v44, 0.0  ;;  %v4315_v48 = vld [vmem:[%s4192_s26 + $0x128] sm:$0xff]  ;;  %v4328_v53 = vld [vmem:[%s4192_s26 + $0x50] sm:$0xff]  ;;  %v310_v54 = vsel %vm276_vm0, %v4325_v52, 0.0 }
  0x2b   : > { %v349_v47 = vsel %vm276_vm0, %v4308_v45, 0.0  ;;  %v4318_v49 = vld [vmem:[%s4192_s26 + $0x120] sm:$0xff]  ;;  %v388_v50 = vsel %vm276_vm0, %v4315_v48, 0.0  ;;  %v307_v55 = vsel %vm276_vm0, %v4328_v53, 0.0  ;;  %v4335_v56 = vld [vmem:[%s4192_s26 + $0xd8] sm:$0xff]  ;;  %v4338_v57 = vld [vmem:[%s4192_s26 + $0xd0] sm:$0xff] }
  0x2c   : > { %329 = vadd.xlane.f32.xlu1 %v328_v10  ;;  %326 = vadd.xlane.f32.xlu0 %v325_v11  ;;  %v385_v51 = vsel %vm276_vm0, %v4318_v49, 0.0  ;;  %v358_v58 = vsel %vm276_vm0, %v4335_v56, 0.0  ;;  %v355_v59 = vsel %vm276_vm0, %v4338_v57, 0.0  ;;  %v4345_v60 = vld [vmem:[%s4192_s26 + $0x138] sm:$0xff]  ;;  %v4348_v61 = vld [vmem:[%s4192_s26 + $0x130] sm:$0xff]  ;;  %v4355_v3 = vld [vmem:[%s4192_s26 + $0x188] sm:$0xff] }
  0x2d   : > { %v394_v62 = vsel %vm276_vm0, %v4345_v60, 0.0  ;;  %v391_v63 = vsel %vm276_vm0, %v4348_v61, 0.0  ;;  %v4358_v4 = vld [vmem:[%s4192_s26 + $0x180] sm:$0xff]  ;;  %v424_v6 = vsel %vm276_vm0, %v4355_v3, 0.0  ;;  %v4365_v10 = vld [vmem:[%s4192_s26 + $0x198] sm:$0xff]  ;;  %v4368_v11 = vld [vmem:[%s4192_s26 + $0x190] sm:$0xff] }
  0x2e   : > { %v421_v7 = vsel %vm276_vm0, %v4358_v4, 0.0  ;;  %s5850_s29 = sld [smem:[#allocation3 + $0x4b]]  ;;  %s4131_s30 = smov 127  }
  0x2f   : > { %s4132_s5 = smov 2   ;;  %s4133_s6 = smov 126  }
  0x30   : > { %335 = vadd.xlane.f32.xlu1 %v334_v14  ;;  %332 = vadd.xlane.f32.xlu0 %v331_v15  ;;  %v430_v14 = vsel %vm276_vm0, %v4365_v10, 0.0  ;;  %v427_v15 = vsel %vm276_vm0, %v4368_v11, 0.0  ;;  %s5863_s7 = sld [smem:[#allocation3 + $0x4f]]  ;;  %s5866_s8 = sld [smem:[#allocation3 + $0x53]] }
  0x31   : > { %s5869_s9 = sld [smem:[#allocation3 + $0x5b]]  ;;  %s5877_s10 = sld [smem:[#allocation3 + $0x5f]] }
  0x32   : > { %s5887_s11 = sld [smem:[#allocation3 + $0x31]]  ;;  %s5893_s12 = sld [smem:[#allocation3 + $0x32]] }
  0x33   : > { %s5902_s13 = sld [smem:[#allocation3 + $0x35]]  ;;  %s5908_s14 = sld [smem:[#allocation3 + $0x36]] }
  0x34   : > { %293 = vadd.xlane.f32.xlu1 %v292_v18  ;;  %290 = vadd.xlane.f32.xlu0 %v289_v19  ;;  %v948_v18 = vsel %vm276_vm0, %v4208_v5, -inf  ;;  %v945_v19 = vsel %vm276_vm0, %v4198_v1, -inf  ;;  %v993_v5 = vsel %vm276_vm0, %v4218_v9, -inf  ;;  %v1002_v1 = vsel %vm276_vm0, %v4225_v12, -inf  ;;  %v4404_v12 = vld [vmem:[%s4192_s26 + $0xe0] sm:$0xff]  ;;  %s5916_s17 = sld [smem:[#allocation3 + $0x3d]] }
  0x35   : > { %s5922_s18 = sld [smem:[#allocation3 + $0x3e]]  ;;  %s5930_s19 = sld [smem:[#allocation3 + $0x41]] }
  0x36   : > { %s4134_s20 = smov 124  }
  0x38   : > { %341 = vadd.xlane.f32.xlu1 %v340_v22  ;;  %338 = vadd.xlane.f32.xlu0 %v337_v23  ;;  %v954_v22 = vsel %vm276_vm0, %v4201_v2, -inf  ;;  %v951_v23 = vsel %vm276_vm0, %v4195_v0, -inf  ;;  %v999_v2 = vsel %vm276_vm0, %v4228_v13, -inf  ;;  %v4391_v0 = vld [vmem:[%s4192_s26 + $0x68] sm:$0xff] }
  0x3c   : > { %299 = vadd.xlane.f32.xlu1 %v298_v26  ;;  %296 = vadd.xlane.f32.xlu0 %v295_v27  ;;  %v996_v26 = vsel %vm276_vm0, %v4215_v8, -inf  ;;  %v4394_v27 = vld [vmem:[%s4192_s26 + $0x60] sm:$0xff]  ;;  %v316_v8 = vsel %vm276_vm0, %v4391_v0, 0.0 }
  0x3d   : > { %v313_v9 = vsel %vm276_vm0, %v4394_v27, 0.0 }
  0x40   : > { %347 = vadd.xlane.f32.xlu1 %v346_v30  ;;  %344 = vadd.xlane.f32.xlu0 %v343_v31  ;;  %v4401_v30 = vld [vmem:[%s4192_s26 + $0xe8] sm:$0xff]  ;;  %v361_v31 = vsel %vm276_vm0, %v4404_v12, 0.0 }
  0x41   : > { %v364_v13 = vsel %vm276_vm0, %v4401_v30, 0.0 }
  0x44   : > { %377 = vadd.xlane.f32.xlu1 %v376_v34  ;;  %374 = vadd.xlane.f32.xlu0 %v373_v35  ;;  %v4411_v34 = vld [vmem:[%s4192_s26 + $0x148] sm:$0xff]  ;;  %v4414_v35 = vld [vmem:[%s4192_s26 + $0x140] sm:$0xff] }
  0x48   : > { %383 = vadd.xlane.f32.xlu1 %v382_v38  ;;  %380 = vadd.xlane.f32.xlu0 %v379_v39  ;;  %v400_v38 = vsel %vm276_vm0, %v4411_v34, 0.0  ;;  %v397_v39 = vsel %vm276_vm0, %v4414_v35, 0.0 }
  0x4c   : > { %305 = vadd.xlane.f32.xlu1 %v304_v42  ;;  %302 = vadd.xlane.f32.xlu0 %v301_v43  ;;  %v4421_v42 = vld [vmem:[%s4192_s26 + $0x1a8] sm:$0xff]  ;;  %v4424_v43 = vld [vmem:[%s4192_s26 + $0x1a0] sm:$0xff] }
  0x50   : > { %353 = vadd.xlane.f32.xlu1 %v352_v46  ;;  %350 = vadd.xlane.f32.xlu0 %v349_v47  ;;  %v436_v46 = vsel %vm276_vm0, %v4421_v42, 0.0  ;;  %v433_v47 = vsel %vm276_vm0, %v4424_v43, 0.0 }
  0x54   : > { %389 = vadd.xlane.f32.xlu1 %v388_v50  ;;  %386 = vadd.xlane.f32.xlu0 %v385_v51  ;;  %v960_v50 = vsel %vm276_vm0, %v4235_v16, -inf  ;;  %v957_v51 = vsel %vm276_vm0, %v4238_v17, -inf }
  0x58   : > { %311 = vadd.xlane.f32.xlu1 %v310_v54  ;;  %308 = vadd.xlane.f32.xlu0 %v307_v55  ;;  %v1008_v54 = vsel %vm276_vm0, %v4245_v20, -inf  ;;  %v1005_v55 = vsel %vm276_vm0, %v4248_v21, -inf  ;;  %v4452_v20 = vld [vmem:[%s4192_s26 + $0xf0] sm:$0xff] }
  0x5c   : > { %359 = vadd.xlane.f32.xlu1 %v358_v58  ;;  %356 = vadd.xlane.f32.xlu0 %v355_v59  ;;  %v4439_v58 = vld [vmem:[%s4192_s26 + $0x78] sm:$0xff]  ;;  %v4442_v59 = vld [vmem:[%s4192_s26 + $0x70] sm:$0xff] }
  0x5d   : > { %v322_v16 = vsel %vm276_vm0, %v4439_v58, 0.0  ;;  %v319_v17 = vsel %vm276_vm0, %v4442_v59, 0.0 }
  0x60   : > { %395 = vadd.xlane.f32.xlu1 %v394_v62  ;;  %392 = vadd.xlane.f32.xlu0 %v391_v63  ;;  %v4449_v62 = vld [vmem:[%s4192_s26 + $0xf8] sm:$0xff]  ;;  %v367_v63 = vsel %vm276_vm0, %v4452_v20, 0.0 }
  0x61   : > { %v370_v21 = vsel %vm276_vm0, %v4449_v62, 0.0 }
  0x64   : > { %425 = vadd.xlane.f32.xlu1 %v424_v6  ;;  %422 = vadd.xlane.f32.xlu0 %v421_v7  ;;  %v4459_v6 = vld [vmem:[%s4192_s26 + $0x158] sm:$0xff]  ;;  %v4462_v7 = vld [vmem:[%s4192_s26 + $0x150] sm:$0xff] }
  0x68   : > { %431 = vadd.xlane.f32.xlu1 %v430_v14  ;;  %428 = vadd.xlane.f32.xlu0 %v427_v15  ;;  %v406_v14 = vsel %vm276_vm0, %v4459_v6, 0.0  ;;  %v403_v15 = vsel %vm276_vm0, %v4462_v7, 0.0 }
  0x6c   : > { %949 = vmax.xlane.f32.xlu1 %v948_v18  ;;  %946 = vmax.xlane.f32.xlu0 %v945_v19  ;;  %v4469_v18 = vld [vmem:[%s4192_s26 + $0x1b8] sm:$0xff]  ;;  %v4472_v19 = vld [vmem:[%s4192_s26 + $0x1b0] sm:$0xff] }
  0x70   : > { %955 = vmax.xlane.f32.xlu1 %v954_v22  ;;  %952 = vmax.xlane.f32.xlu0 %v951_v23  ;;  %v442_v22 = vsel %vm276_vm0, %v4469_v18, 0.0  ;;  %v439_v23 = vsel %vm276_vm0, %v4472_v19, 0.0 }
  0x74   : > { %997 = vmax.xlane.f32.xlu1 %v996_v26  ;;  %994 = vmax.xlane.f32.xlu0 %v993_v5  ;;  %v966_v26 = vsel %vm276_vm0, %v4255_v24, -inf  ;;  %v963_v5 = vsel %vm276_vm0, %v4258_v25, -inf  ;;  %v1041_v24 = vsel %vm276_vm0, %v4278_v33, -inf  ;;  %v1050_v25 = vsel %vm276_vm0, %v4285_v36, -inf }
  0x78   : > { %1003 = vmax.xlane.f32.xlu1 %v1002_v1  ;;  %1000 = vmax.xlane.f32.xlu0 %v999_v2  ;;  %v1014_v1 = vsel %vm276_vm0, %v4265_v28, -inf  ;;  %v1011_v2 = vsel %vm276_vm0, %v4268_v29, -inf  ;;  %v1047_v28 = vsel %vm276_vm0, %v4288_v37, -inf  ;;  %v4510_v37 = vld [vmem:[%s4192_s26 + $0x1c0] sm:$0xff] }
  0x7c   : > { %317 = vadd.xlane.f32.xlu1 %v316_v8  ;;  %314 = vadd.xlane.f32.xlu0 %v313_v9  ;;  %v1044_v8 = vsel %vm276_vm0, %v4275_v32, -inf  ;;  %v598_v9 = vlaneseq }
  0x7e   : > { %v599_v29 = vand.u32 127, %v598_v9  ;;  %v4500_v32 = vshrl.u32 %v598_v9, 7 }
  0x80   : > { %365 = vadd.xlane.f32.xlu1 %v364_v13  ;;  %362 = vadd.xlane.f32.xlu0 %v361_v31  ;;  %v4495_v13 = vld [vmem:[%s4192_s26 + $0x168] sm:$0xff]  ;;  %v4498_v31 = vld [vmem:[%s4192_s26 + $0x160] sm:$0xff]  ;;  %7136 = vst [vmem:[#allocation6_spill] sm:$0xff] %v4500_v32  ;;  %v604_v33 = vadd.s32 4294967288, %v599_v29 }
  0x81   : > { %v409_v36 = vsel %vm276_vm0, %v4498_v31, 0.0 }
  0x84   : > { %401 = vadd.xlane.f32.xlu1 %v400_v38  ;;  %398 = vadd.xlane.f32.xlu0 %v397_v39 }
  0x88   : > { %437 = vadd.xlane.f32.xlu1 %v436_v46  ;;  %434 = vadd.xlane.f32.xlu0 %v433_v47  ;;  %v412_v46 = vsel %vm276_vm0, %v4495_v13, 0.0  ;;  %v4507_v47 = vld [vmem:[%s4192_s26 + $0x1c8] sm:$0xff] }
  0x8c   : > { %961 = vmax.xlane.f32.xlu1 %v960_v50  ;;  %958 = vmax.xlane.f32.xlu0 %v957_v51  ;;  %v4513_v50 = vsub.s32 %v599_v29, %v4500_v32 }
  0x90   : > { %1009 = vmax.xlane.f32.xlu1 %v1008_v54  ;;  %1006 = vmax.xlane.f32.xlu0 %v1005_v55  ;;  %v4516_v55 = vsub.s32 %v604_v33, %v4500_v32 }
  0x94   : > { %323 = vadd.xlane.f32.xlu1 %v322_v16  ;;  %320 = vadd.xlane.f32.xlu0 %v319_v17 }
  0x98   : > { %371 = vadd.xlane.f32.xlu1 %v370_v21  ;;  %368 = vadd.xlane.f32.xlu0 %v367_v63  ;;  %v448_v21 = vsel %vm276_vm0, %v4507_v47, 0.0  ;;  %v445_v63 = vsel %vm276_vm0, %v4510_v37, 0.0 }
  0x9c   : > { %407 = vadd.xlane.f32.xlu1 %v406_v14  ;;  %404 = vadd.xlane.f32.xlu0 %v403_v15 }
  0xa0   : > { %443 = vadd.xlane.f32.xlu1 %v442_v22  ;;  %440 = vadd.xlane.f32.xlu0 %v439_v23 }
  0xa4   : > { %967 = vmax.xlane.f32.xlu1 %v966_v26  ;;  %964 = vmax.xlane.f32.xlu0 %v963_v5 }
  0xa8   : > { %1015 = vmax.xlane.f32.xlu1 %v1014_v1  ;;  %1012 = vmax.xlane.f32.xlu0 %v1011_v2 }
  0xac   : > { %1045 = vmax.xlane.f32.xlu1 %v1044_v8  ;;  %1042 = vmax.xlane.f32.xlu0 %v1041_v24  ;;  %v972_v8 = vsel %vm276_vm0, %v4295_v40, -inf  ;;  %v969_v24 = vsel %vm276_vm0, %v4298_v41, -inf  ;;  %v1020_v40 = vsel %vm276_vm0, %v4305_v44, -inf  ;;  %v1017_v41 = vsel %vm276_vm0, %v4308_v45, -inf }
  0xad   : > { %v1056_v44 = vsel %vm276_vm0, %v4315_v48, -inf }
  0xb0   : > { %1051 = vmax.xlane.f32.xlu1 %v1050_v25  ;;  %1048 = vmax.xlane.f32.xlu0 %v1047_v28 }
  0xb1   : > { %v285_v38 = vpop.xlane.xlu1 %284  ;;  %v279_v39 = vpop.xlane.xlu0 %278 }
  0xb2   : > { %v472_v51 = vmul.f32 0.0625, %v285_v38  ;;  %v470_v54 = vmul.f32 0.0625, %v279_v39 }
  0xb4   : > { %413 = vadd.xlane.f32.xlu1 %v412_v46  ;;  %410 = vadd.xlane.f32.xlu0 %v409_v36  ;;  %v614_v22 = vrot.slane %v472_v51, %v4513_v50  ;;  %v603_v23 = vrot.slane %v470_v54, %v4513_v50 }
  0xb5   : > { %v288_v16 = vpop.xlane.xlu1 %287  ;;  %v282_v17 = vpop.xlane.xlu0 %281 }
  0xb6   : > { %v473_v14 = vmul.f32 0.0625, %v288_v16  ;;  %v471_v15 = vmul.f32 0.0625, %v282_v17 }
  0xb8   : > { %v618_v26 = vrot.slane %v473_v14, %v4516_v55  ;;  %v608_v5 = vrot.slane %v471_v15, %v4516_v55  ;;  %449 = vadd.xlane.f32.xlu1 %v448_v21  ;;  %446 = vadd.xlane.f32.xlu0 %v445_v63  ;;  %v1053_v15 = vsel %vm276_vm0, %v4318_v49, -inf }
  0xb9   : > { %v330_v1 = vpop.xlane.xlu1 %329  ;;  %v327_v2 = vpop.xlane.xlu0 %326 }
  0xba   : > { %v619_v9 = vsel %vm609_vm1, %v618_v26, %v614_v22  ;;  %v610_v25 = vsel %vm609_vm1, %v608_v5, %v603_v23  ;;  %v487_v28 = vmul.f32 0.0625, %v330_v1  ;;  %v486_v29 = vmul.f32 0.0625, %v327_v2  ;;  %v4548_v26 = vld [vmem:[%s4192_s26 + $0x178] sm:$0xff]  ;;  %v4551_v5 = vld [vmem:[%s4192_s26 + $0x170] sm:$0xff] }
  0xbb   : > { %v891_v33 = vsel %vm890_vm2, %v619_v9, %v610_v25  ;;  %v415_v9 = vsel %vm276_vm0, %v4551_v5, 0.0 }
  0xbc   : > { %v681_v38 = vrot.slane %v487_v28, %v4516_v55  ;;  %v677_v39 = vrot.slane %v486_v29, %v4513_v50  ;;  %973 = vmax.xlane.f32.xlu1 %v972_v8  ;;  %970 = vmax.xlane.f32.xlu0 %v969_v24  ;;  %v418_v24 = vsel %vm276_vm0, %v4548_v26, 0.0 }
  0xbd   : > { %v336_v46 = vpop.xlane.xlu1 %335  ;;  %v333_v36 = vpop.xlane.xlu0 %332 }
  0xbe   : > { %v682_v51 = vsel %vm609_vm1, %v681_v38, %v677_v39  ;;  %v489_v54 = vmul.f32 0.0625, %v336_v46  ;;  %v488_v16 = vmul.f32 0.0625, %v333_v36  ;;  %v4562_v38 = vld [vmem:[%s4192_s26 + $0x1d8] sm:$0xff]  ;;  %v4565_v39 = vld [vmem:[%s4192_s26 + $0x1d0] sm:$0xff] }
  0xc0   : > { %v690_v17 = vrot.slane %v489_v54, %v4516_v55  ;;  %v686_v21 = vrot.slane %v488_v16, %v4513_v50  ;;  %1021 = vmax.xlane.f32.xlu1 %v1020_v40  ;;  %1018 = vmax.xlane.f32.xlu0 %v1017_v41  ;;  %v454_v54 = vsel %vm276_vm0, %v4562_v38, 0.0  ;;  %v451_v16 = vsel %vm276_vm0, %v4565_v39, 0.0 }
  0xc1   : > { %v294_v63 = vpop.xlane.xlu1 %293  ;;  %v291_v14 = vpop.xlane.xlu0 %290 }
  0xc2   : > { %v691_v45 = vsel %vm609_vm1, %v690_v17, %v686_v21  ;;  %v475_v22 = vmul.f32 0.0625, %v294_v63  ;;  %v474_v23 = vmul.f32 0.0625, %v291_v14 }
  0xc3   : > { %v904_v1 = vsel %vm890_vm2, %v691_v45, %v682_v51 }
  0xc4   : > { %v627_v2 = vrot.slane %v475_v22, %v4516_v55  ;;  %v623_v48 = vrot.slane %v474_v23, %v4513_v50  ;;  %1057 = vmax.xlane.f32.xlu1 %v1056_v44  ;;  %1054 = vmax.xlane.f32.xlu0 %v1053_v15  ;;  %v978_v22 = vsel %vm276_vm0, %v4325_v52, -inf  ;;  %v975_v23 = vsel %vm276_vm0, %v4328_v53, -inf }
  0xc5   : > { %v342_v49 = vpop.xlane.xlu1 %341  ;;  %v339_v8 = vpop.xlane.xlu0 %338  ;;  %v1026_v52 = vsel %vm276_vm0, %v4335_v56, -inf  ;;  %v1023_v53 = vsel %vm276_vm0, %v4338_v57, -inf  ;;  %v1062_v56 = vsel %vm276_vm0, %v4345_v60, -inf  ;;  %v1059_v57 = vsel %vm276_vm0, %v4348_v61, -inf }
  0xc6   : > { %v628_v25 = vsel %vm609_vm1, %v627_v2, %v623_v48  ;;  %v491_v28 = vmul.f32 0.0625, %v342_v49  ;;  %v490_v29 = vmul.f32 0.0625, %v339_v8  ;;  %v1089_v60 = vsel %vm276_vm0, %v4358_v4, -inf }
  0xc7   : > { %v893_v46 = vsel %vm892_vm3, %v628_v25, %v891_v33  ;;  %v1098_v4 = vsel %vm276_vm0, %v4365_v10, -inf }
  0xc8   : > { %v699_v36 = vrot.slane %v491_v28, %v4516_v55  ;;  %v695_v40 = vrot.slane %v490_v29, %v4513_v50  ;;  %419 = vadd.xlane.f32.xlu1 %v418_v24  ;;  %416 = vadd.xlane.f32.xlu0 %v415_v9 }
  0xc9   : > { %v300_v41 = vpop.xlane.xlu1 %299  ;;  %v297_v51 = vpop.xlane.xlu0 %296 }
  0xca   : > { %v700_v17 = vsel %vm609_vm1, %v699_v36, %v695_v40  ;;  %v477_v21 = vmul.f32 0.0625, %v300_v41  ;;  %v476_v63 = vmul.f32 0.0625, %v297_v51 }
  0xcb   : > { %v905_v33 = vsel %vm892_vm3, %v700_v17, %v904_v1 }
  0xcc   : > { %v636_v14 = vrot.slane %v477_v21, %v4516_v55  ;;  %v632_v44 = vrot.slane %v476_v63, %v4513_v50  ;;  %455 = vadd.xlane.f32.xlu1 %v454_v54  ;;  %452 = vadd.xlane.f32.xlu0 %v451_v16 }
  0xcd   : > { %v348_v15 = vpop.xlane.xlu1 %347  ;;  %v345_v45 = vpop.xlane.xlu0 %344 }
  0xce   : > { %v637_v2 = vsel %vm609_vm1, %v636_v14, %v632_v44  ;;  %v493_v48 = vmul.f32 0.0625, %v348_v15  ;;  %v492_v49 = vmul.f32 0.0625, %v345_v45  ;;  %v1092_v15 = vsel %vm276_vm0, %v4355_v3, -inf }
  0xcf   : > { %v895_v1 = vsel %vm894_vm4, %v637_v2, %v893_v46 }
  0xd0   : > { %v708_v8 = vrot.slane %v493_v48, %v4516_v55  ;;  %v704_v24 = vrot.slane %v492_v49, %v4513_v50  ;;  %979 = vmax.xlane.f32.xlu1 %v978_v22  ;;  %976 = vmax.xlane.f32.xlu0 %v975_v23 }
  0xd1   : > { %v378_v9 = vpop.xlane.xlu1 %377  ;;  %v375_v25 = vpop.xlane.xlu0 %374 }
  0xd2   : > { %v709_v28 = vsel %vm609_vm1, %v708_v8, %v704_v24  ;;  %v503_v29 = vmul.f32 0.0625, %v378_v9  ;;  %v502_v36 = vmul.f32 0.0625, %v375_v25  ;;  %v1095_v8 = vsel %vm276_vm0, %v4368_v11, -inf }
  0xd3   : > { %v906_v46 = vsel %vm894_vm4, %v709_v28, %v905_v33 }
  0xd4   : > { %v753_v40 = vrot.slane %v503_v29, %v4516_v55  ;;  %v749_v41 = vrot.slane %v502_v36, %v4513_v50  ;;  %1027 = vmax.xlane.f32.xlu1 %v1026_v52  ;;  %1024 = vmax.xlane.f32.xlu0 %v1023_v53  ;;  %v4615_v52 = vld [vmem:[%s4192_s26 + $0x1e8] sm:$0xff]  ;;  %v4618_v53 = vld [vmem:[%s4192_s26 + $0x1e0] sm:$0xff] }
  0xd5   : > { %v384_v51 = vpop.xlane.xlu1 %383  ;;  %v381_v54 = vpop.xlane.xlu0 %380  ;;  %v460_v11 = vsel %vm276_vm0, %v4615_v52, 0.0 }
  0xd6   : > { %v754_v16 = vsel %vm609_vm1, %v753_v40, %v749_v41  ;;  %v505_v17 = vmul.f32 0.0625, %v384_v51  ;;  %v504_v21 = vmul.f32 0.0625, %v381_v54  ;;  %v457_v41 = vsel %vm276_vm0, %v4618_v53, 0.0 }
  0xd8   : > { %v762_v63 = vrot.slane %v505_v17, %v4516_v55  ;;  %v758_v33 = vrot.slane %v504_v21, %v4513_v50  ;;  %1063 = vmax.xlane.f32.xlu1 %v1062_v56  ;;  %1060 = vmax.xlane.f32.xlu0 %v1059_v57 }
  0xd9   : > { %v306_v14 = vpop.xlane.xlu1 %305  ;;  %v303_v44 = vpop.xlane.xlu0 %302 }
  0xda   : > { %v763_v61 = vsel %vm609_vm1, %v762_v63, %v758_v33  ;;  %v479_v45 = vmul.f32 0.0625, %v306_v14  ;;  %v478_v22 = vmul.f32 0.0625, %v303_v44  ;;  %v984_v63 = vsel %vm276_vm0, %v4391_v0, -inf }
  0xdb   : > { %v911_v23 = vsel %vm890_vm2, %v763_v61, %v754_v16  ;;  %v981_v33 = vsel %vm276_vm0, %v4394_v27, -inf  ;;  %v1029_v61 = vsel %vm276_vm0, %v4404_v12, -inf }
  0xdc   : > { %v645_v2 = vrot.slane %v479_v45, %v4516_v55  ;;  %v641_v48 = vrot.slane %v478_v22, %v4513_v50  ;;  %1093 = vmax.xlane.f32.xlu1 %v1092_v15  ;;  %1090 = vmax.xlane.f32.xlu0 %v1089_v60  ;;  %v1032_v60 = vsel %vm276_vm0, %v4401_v30, -inf  ;;  %v1068_v45 = vsel %vm276_vm0, %v4411_v34, -inf }
  0xdd   : > { %v354_v49 = vpop.xlane.xlu1 %353  ;;  %v351_v3 = vpop.xlane.xlu0 %350  ;;  %v1065_v22 = vsel %vm276_vm0, %v4414_v35, -inf  ;;  %v1101_v34 = vsel %vm276_vm0, %v4424_v43, -inf }
  0xde   : > { %v646_v24 = vsel %vm609_vm1, %v645_v2, %v641_v48  ;;  %v495_v9 = vmul.f32 0.0625, %v354_v49  ;;  %v494_v25 = vmul.f32 0.0625, %v351_v3  ;;  %v1104_v3 = vsel %vm276_vm0, %v4421_v42, -inf }
  0xdf   : > { %v4621_v28 = vsel %vm896_vm5, %v646_v24, %v895_v1 }
  0xe0   : > { %v717_v29 = vrot.slane %v495_v9, %v4516_v55  ;;  %v713_v36 = vrot.slane %v494_v25, %v4513_v50  ;;  %1099 = vmax.xlane.f32.xlu1 %v1098_v4  ;;  %1096 = vmax.xlane.f32.xlu0 %v1095_v8  ;;  %v4669_v4 = vld [vmem:[%s4192_s26 + $0x1f8] sm:$0xff]  ;;  %v4672_v8 = vld [vmem:[%s4192_s26 + $0x1f0] sm:$0xff] }
  0xe1   : > { %v390_v10 = vpop.xlane.xlu1 %389  ;;  %v387_v40 = vpop.xlane.xlu0 %386  ;;  %v466_v42 = vsel %vm276_vm0, %v4669_v4, 0.0  ;;  %v463_v43 = vsel %vm276_vm0, %v4672_v8, 0.0 }
  0xe2   : > { %v718_v51 = vsel %vm609_vm1, %v717_v29, %v713_v36  ;;  %v507_v54 = vmul.f32 0.0625, %v390_v10  ;;  %v506_v56 = vmul.f32 0.0625, %v387_v40  ;;  %v990_v10 = vsel %vm276_vm0, %v4439_v58, -inf }
  0xe3   : > { %v4631_v1 = vsel %vm896_vm5, %v718_v51, %v906_v46  ;;  %v987_v40 = vsel %vm276_vm0, %v4442_v59, -inf  ;;  %v1038_v51 = vsel %vm276_vm0, %v4449_v62, -inf  ;;  %v1074_v59 = vsel %vm276_vm0, %v4459_v6, -inf }
  0xe4   : > { %v771_v57 = vrot.slane %v507_v54, %v4516_v55  ;;  %v767_v16 = vrot.slane %v506_v56, %v4513_v50  ;;  %461 = vadd.xlane.f32.xlu1 %v460_v11  ;;  %458 = vadd.xlane.f32.xlu0 %v457_v41  ;;  %v1035_v54 = vsel %vm276_vm0, %v4452_v20, -inf  ;;  %v1110_v20 = vsel %vm276_vm0, %v4469_v18, -inf }
  0xe5   : > { %v4635_v17 = vpop.xlane.xlu1 %311  ;;  %v4637_v21 = vpop.xlane.xlu0 %308  ;;  %v1080_v6 = vsel %vm276_vm0, %v4495_v13, -inf  ;;  %v1116_v18 = vsel %vm276_vm0, %v4507_v47, -inf  ;;  %v1086_v13 = vsel %vm276_vm0, %v4548_v26, -inf }
  0xe6   : > { %v772_v14 = vsel %vm609_vm1, %v771_v57, %v767_v16  ;;  %v1071_v57 = vsel %vm276_vm0, %v4462_v7, -inf  ;;  %v1077_v7 = vsel %vm276_vm0, %v4498_v31, -inf  ;;  %v1083_v31 = vsel %vm276_vm0, %v4551_v5, -inf }
  0xe7   : > { %v912_v46 = vsel %vm892_vm3, %v772_v14, %v911_v23  ;;  %v1128_v5 = vsel %vm276_vm0, %v4615_v52, -inf  ;;  %v1134_v52 = vsel %vm276_vm0, %v4669_v4, -inf }
  0xe8   : > { %985 = vmax.xlane.f32.xlu1 %v984_v63  ;;  %982 = vmax.xlane.f32.xlu0 %v981_v33  ;;  %v1107_v63 = vsel %vm276_vm0, %v4472_v19, -inf  ;;  %v1113_v19 = vsel %vm276_vm0, %v4510_v37, -inf  ;;  %v1122_v37 = vsel %vm276_vm0, %v4562_v38, -inf }
  0xe9   : > { %v4645_v44 = vpop.xlane.xlu1 %359  ;;  %v4647_v15 = vpop.xlane.xlu0 %356 }
  0xec   : > { %1033 = vmax.xlane.f32.xlu1 %v1032_v60  ;;  %1030 = vmax.xlane.f32.xlu0 %v1029_v61 }
  0xed   : > { %v396_v0 = vpop.xlane.xlu1 %395  ;;  %v393_v27 = vpop.xlane.xlu0 %392 }
  0xee   : > { %v509_v23 = vmul.f32 0.0625, %v396_v0  ;;  %v508_v2 = vmul.f32 0.0625, %v393_v27 }
  0xf0   : > { %v780_v48 = vrot.slane %v509_v23, %v4516_v55  ;;  %v776_v30 = vrot.slane %v508_v2, %v4513_v50  ;;  %1069 = vmax.xlane.f32.xlu1 %v1068_v45  ;;  %1066 = vmax.xlane.f32.xlu0 %v1065_v22  ;;  %v1119_v45 = vsel %vm276_vm0, %v4565_v39, -inf  ;;  %v1125_v23 = vsel %vm276_vm0, %v4618_v53, -inf }
  0xf1   : > { %v4659_v12 = vpop.xlane.xlu1 %425  ;;  %v4661_v49 = vpop.xlane.xlu0 %422  ;;  %v481_v2 = vmul.f32 0.0625, %v4635_v17  ;;  %v497_v39 = vmul.f32 0.0625, %v4645_v44  ;;  %v1131_v53 = vsel %vm276_vm0, %v4672_v8, -inf }
  0xf2   : > { %v781_v35 = vsel %vm609_vm1, %v780_v48, %v776_v30  ;;  %v480_v48 = vmul.f32 0.0625, %v4637_v21 }
  0xf3   : > { %v4675_v24 = vsel %vm894_vm4, %v781_v35, %v912_v46  ;;  %v654_v17 = vrot.slane %v481_v2, %v4516_v55 }
  0xf4   : > { %1105 = vmax.xlane.f32.xlu1 %v1104_v3  ;;  %1102 = vmax.xlane.f32.xlu0 %v1101_v34  ;;  %v496_v3 = vmul.f32 0.0625, %v4647_v15  ;;  %v650_v21 = vrot.slane %v480_v48, %v4513_v50 }
  0xf5   : > { %v4677_v9 = vpop.xlane.xlu1 %431  ;;  %v4679_v25 = vpop.xlane.xlu0 %428 }
  0xf6   : > { %v655_v8 = vsel %vm609_vm1, %v654_v17, %v650_v21 }
  0xf8   : > { %467 = vadd.xlane.f32.xlu1 %v466_v42  ;;  %464 = vadd.xlane.f32.xlu0 %v463_v43 }
  0xf9   : > { %v4685_v29 = vpop.xlane.xlu1 %949  ;;  %v4687_v36 = vpop.xlane.xlu0 %946 }
  0xfc   : > { %991 = vmax.xlane.f32.xlu1 %v990_v10  ;;  %988 = vmax.xlane.f32.xlu0 %v987_v40  ;;  %v726_v10 = vrot.slane %v497_v39, %v4516_v55  ;;  %v722_v40 = vrot.slane %v496_v3, %v4513_v50 }
  0xfd   : > { %v4693_v11 = vpop.xlane.xlu1 %955  ;;  %v4695_v41 = vpop.xlane.xlu0 %952 }
 0x100   : > { %1039 = vmax.xlane.f32.xlu1 %v1038_v51  ;;  %1036 = vmax.xlane.f32.xlu0 %v1035_v54 }
 0x101   : > { %v4701_v56 = vpop.xlane.xlu1 %997  ;;  %v4703_v58 = vpop.xlane.xlu0 %994 }
 0x104   : > { %1075 = vmax.xlane.f32.xlu1 %v1074_v59  ;;  %1072 = vmax.xlane.f32.xlu0 %v1071_v57 }
 0x105   : > { %v4709_v16 = vpop.xlane.xlu1 %1003  ;;  %v4711_v62 = vpop.xlane.xlu0 %1000 }
 0x108   : > { %1111 = vmax.xlane.f32.xlu1 %v1110_v20  ;;  %1108 = vmax.xlane.f32.xlu0 %v1107_v63 }
 0x109   : > { %v318_v33 = vpop.xlane.xlu1 %317  ;;  %v315_v14 = vpop.xlane.xlu0 %314 }
 0x10a   : > { %v483_v38 = vmul.f32 0.0625, %v318_v33  ;;  %v482_v30 = vmul.f32 0.0625, %v315_v14 }
 0x10c   : > { %1081 = vmax.xlane.f32.xlu1 %v1080_v6  ;;  %1078 = vmax.xlane.f32.xlu0 %v1077_v7  ;;  %v663_v42 = vrot.slane %v483_v38, %v4516_v55  ;;  %v659_v44 = vrot.slane %v482_v30, %v4513_v50  ;;  %v727_v6 = vsel %vm609_vm1, %v726_v10, %v722_v40 }
 0x10d   : > { %v366_v46 = vpop.xlane.xlu1 %365  ;;  %v363_v60 = vpop.xlane.xlu0 %362 }
 0x10e   : > { %v499_v43 = vmul.f32 0.0625, %v366_v46  ;;  %v498_v15 = vmul.f32 0.0625, %v363_v60  ;;  %v664_v63 = vsel %vm609_vm1, %v663_v42, %v659_v44  ;;  %v899_v60 = vsel %vm898_vm6, %v655_v8, %v4621_v28 }
 0x10f   : > { %v908_v28 = vsel %vm898_vm6, %v727_v6, %v4631_v1 }
 0x110   : > { %1117 = vmax.xlane.f32.xlu1 %v1116_v18  ;;  %1114 = vmax.xlane.f32.xlu0 %v1113_v19  ;;  %v735_v57 = vrot.slane %v499_v43, %v4516_v55  ;;  %v731_v20 = vrot.slane %v498_v15, %v4513_v50 }
 0x111   : > { %v4725_v61 = vpop.xlane.xlu1 %401  ;;  %v4727_v0 = vpop.xlane.xlu0 %398 }
 0x114   : > { %1087 = vmax.xlane.f32.xlu1 %v1086_v13  ;;  %1084 = vmax.xlane.f32.xlu0 %v1083_v31  ;;  %v901_v31 = vsel %vm900_vm7, %v664_v63, %v899_v60  ;;  %v510_v63 = vmul.f32 0.0625, %v4727_v0 }
 0x115   : > { %v4733_v27 = vpop.xlane.xlu1 %437  ;;  %v4735_v47 = vpop.xlane.xlu0 %434 }
 0x118   : > { %1123 = vmax.xlane.f32.xlu1 %v1122_v37  ;;  %1120 = vmax.xlane.f32.xlu0 %v1119_v45  ;;  %v736_v45 = vsel %vm609_vm1, %v735_v57, %v731_v20  ;;  %v511_v20 = vmul.f32 0.0625, %v4725_v61 }
 0x119   : > { %v4741_v22 = vpop.xlane.xlu1 %961  ;;  %v4743_v26 = vpop.xlane.xlu0 %958  ;;  %v909_v39 = vsel %vm900_vm7, %v736_v45, %v908_v28 }
 0x11c   : > { %1129 = vmax.xlane.f32.xlu1 %v1128_v5  ;;  %1126 = vmax.xlane.f32.xlu0 %v1125_v23 }
 0x11d   : > { %v4753_v34 = vpop.xlane.xlu1 %1009  ;;  %v4755_v35 = vpop.xlane.xlu0 %1006 }
 0x120   : > { %1135 = vmax.xlane.f32.xlu1 %v1134_v52  ;;  %1132 = vmax.xlane.f32.xlu0 %v1131_v53 }
 0x121   : > { %v324_v4 = vpop.xlane.xlu1 %323  ;;  %v321_v51 = vpop.xlane.xlu0 %320 }
 0x122   : > { %v485_v54 = vmul.f32 0.0625, %v324_v4  ;;  %v484_v59 = vmul.f32 0.0625, %v321_v51 }
 0x124   : > { %v672_v33 = vrot.slane %v485_v54, %v4516_v55  ;;  %v668_v14 = vrot.slane %v484_v59, %v4513_v50 }
 0x125   : > { %v372_v7 = vpop.xlane.xlu1 %371  ;;  %v369_v46 = vpop.xlane.xlu0 %368 }
 0x126   : > { %v501_v18 = vmul.f32 0.0625, %v372_v7  ;;  %v500_v19 = vmul.f32 0.0625, %v369_v46  ;;  %v673_v13 = vsel %vm609_vm1, %v672_v33, %v668_v14 }
 0x127   : > { %v903_v37 = vsel %vm902_vm8, %v673_v13, %v901_v31 }
 0x128   : > { %v744_v5 = vrot.slane %v501_v18, %v4516_v55  ;;  %v740_v23 = vrot.slane %v500_v19, %v4513_v50  ;;  %v929_v2 = vsel %vm276_vm0, %v903_v37, 0.0  ;;  %v789_v18 = vrot.slane %v511_v20, %v4516_v55 }
 0x129   : > { %v408_v48 = vpop.xlane.xlu1 %407  ;;  %930 = vadd.xlane.f32.xlu0 %v929_v2  ;;  %v405_v38 = vpop.xlane.xlu0 %404  ;;  %v785_v19 = vrot.slane %v510_v63, %v4513_v50 }
 0x12a   : > { %v745_v30 = vsel %vm609_vm1, %v744_v5, %v740_v23  ;;  %v513_v6 = vmul.f32 0.0625, %v408_v48  ;;  %v512_v7 = vmul.f32 0.0625, %v405_v38 }
 0x12b   : > { %v910_v3 = vsel %vm902_vm8, %v745_v30, %v909_v39  ;;  %v790_v5 = vsel %vm609_vm1, %v789_v18, %v785_v19 }
 0x12c   : > { %v932_v52 = vsel %vm276_vm0, %v910_v3, 0.0  ;;  %v798_v61 = vrot.slane %v513_v6, %v4516_v55  ;;  %v794_v0 = vrot.slane %v512_v7, %v4513_v50 }
 0x12d   : > { %v4789_v53 = vpop.xlane.xlu1 %443  ;;  %933 = vadd.xlane.f32.xlu1 %v932_v52  ;;  %v4791_v17 = vpop.xlane.xlu0 %440  ;;  %v914_v52 = vsel %vm896_vm5, %v790_v5, %v4675_v24 }
 0x12e   : > { %v799_v48 = vsel %vm609_vm1, %v798_v61, %v794_v0 }
 0x12f   : > { %v915_v20 = vsel %vm898_vm6, %v799_v48, %v914_v52  ;;  %v520_v48 = vmul.f32 0.0625, %v4679_v25 }
 0x131   : > { %v4793_v21 = vpop.xlane.xlu1 %967  ;;  %v4795_v42 = vpop.xlane.xlu0 %964  ;;  %v830_v52 = vrot.slane %v520_v48, %v4513_v50  ;;  %v1276_v48 = vrot.slane %v4703_v58, %v4513_v50  ;;  %v1226_v58 = vrot.slane %v4741_v22, %v4516_v55 }
 0x135   : > { %v4797_v44 = vpop.xlane.xlu1 %1015  ;;  %v4799_v1 = vpop.xlane.xlu0 %1012 }
 0x139   : > { %v4801_v43 = vpop.xlane.xlu1 %1045  ;;  %v4803_v15 = vpop.xlane.xlu0 %1042 }
 0x13d   : > { %v4805_v10 = vpop.xlane.xlu1 %1051  ;;  %v4807_v40 = vpop.xlane.xlu0 %1048 }
 0x141   : > { %v414_v4 = vpop.xlane.xlu1 %413  ;;  %v411_v51 = vpop.xlane.xlu0 %410 }
 0x142   : > { %v515_v46 = vmul.f32 0.0625, %v414_v4  ;;  %v514_v60 = vmul.f32 0.0625, %v411_v51 }
 0x144   : > { %v807_v37 = vrot.slane %v515_v46, %v4516_v55  ;;  %v803_v45 = vrot.slane %v514_v60, %v4513_v50 }
 0x145   : > { %v4809_v8 = vpop.xlane.xlu1 %449  ;;  %v4811_v54 = vpop.xlane.xlu0 %446 }
 0x146   : > { %v808_v30 = vsel %vm609_vm1, %v807_v37, %v803_v45 }
 0x147   : > { %v916_v6 = vsel %vm900_vm7, %v808_v30, %v915_v20  ;;  %v523_v20 = vmul.f32 0.0625, %v4733_v27  ;;  %v1217_v27 = vrot.slane %v4693_v11, %v4516_v55 }
 0x149   : > { %v4813_v59 = vpop.xlane.xlu1 %973  ;;  %v4815_v57 = vpop.xlane.xlu0 %970 }
 0x14d   : > { %v4819_v33 = vpop.xlane.xlu1 %1021  ;;  %v4821_v14 = vpop.xlane.xlu0 %1018 }
 0x151   : > { %v4825_v13 = vpop.xlane.xlu1 %1057  ;;  %v4827_v31 = vpop.xlane.xlu0 %1054 }
 0x155   : > { %v420_v23 = vpop.xlane.xlu1 %419  ;;  %v417_v2 = vpop.xlane.xlu0 %416 }
 0x156   : > { %v517_v38 = vmul.f32 0.0625, %v420_v23  ;;  %v516_v28 = vmul.f32 0.0625, %v417_v2  ;;  %v521_v2 = vmul.f32 0.0625, %v4677_v9 }
 0x158   : > { %v816_v39 = vrot.slane %v517_v38, %v4516_v55  ;;  %v812_v3 = vrot.slane %v516_v28, %v4513_v50  ;;  %v519_v38 = vmul.f32 0.0625, %v4659_v12  ;;  %v518_v28 = vmul.f32 0.0625, %v4661_v49 }
 0x159   : > { %v4840_v4 = vpop.xlane.xlu1 %455  ;;  %v4842_v51 = vpop.xlane.xlu0 %452 }
 0x15a   : > { %v817_v63 = vsel %vm609_vm1, %v816_v39, %v812_v3  ;;  %v834_v3 = vrot.slane %v521_v2, %v4516_v55  ;;  %v825_v9 = vrot.slane %v519_v38, %v4516_v55  ;;  %v821_v25 = vrot.slane %v518_v28, %v4513_v50 }
 0x15b   : > { %v917_v7 = vsel %vm902_vm8, %v817_v63, %v916_v6  ;;  %v522_v63 = vmul.f32 0.0625, %v4735_v47  ;;  %v1213_v47 = vrot.slane %v4695_v41, %v4513_v50  ;;  %v1280_v2 = vrot.slane %v4701_v56, %v4516_v55 }
 0x15c   : > { %v935_v46 = vsel %vm276_vm0, %v917_v7, 0.0  ;;  %v835_v49 = vsel %vm609_vm1, %v834_v3, %v830_v52  ;;  %v1208_v7 = vrot.slane %v4685_v29, %v4516_v55  ;;  %v1289_v38 = vrot.slane %v4709_v16, %v4516_v55 }
 0x15d   : > { %v4849_v60 = vpop.xlane.xlu1 %979  ;;  %936 = vadd.xlane.f32.xlu0 %v935_v46  ;;  %v4851_v18 = vpop.xlane.xlu0 %976  ;;  %v1204_v46 = vrot.slane %v4687_v36, %v4513_v50  ;;  %v1285_v29 = vrot.slane %v4711_v62, %v4513_v50  ;;  %v843_v36 = vrot.slane %v523_v20, %v4516_v55  ;;  %v839_v28 = vrot.slane %v522_v63, %v4513_v50 }
 0x15e   : > { %v826_v11 = vsel %vm609_vm1, %v825_v9, %v821_v25  ;;  %v525_v41 = vmul.f32 0.0625, %v4789_v53  ;;  %v524_v3 = vmul.f32 0.0625, %v4791_v17  ;;  %v1222_v16 = vrot.slane %v4743_v26, %v4513_v50 }
 0x15f   : > { %v1298_v62 = vrot.slane %v4753_v34, %v4516_v55  ;;  %v1294_v20 = vrot.slane %v4755_v35, %v4513_v50  ;;  %v918_v53 = vsel %vm890_vm2, %v835_v49, %v826_v11  ;;  %v1209_v17 = vsel %vm609_vm1, %v1208_v7, %v1204_v46 }
 0x160   : > { %v1218_v63 = vsel %vm609_vm1, %v1217_v27, %v1213_v47  ;;  %v1281_v9 = vsel %vm609_vm1, %v1280_v2, %v1276_v48  ;;  %v1290_v25 = vsel %vm609_vm1, %v1289_v38, %v1285_v29  ;;  %v844_v22 = vsel %vm609_vm1, %v843_v36, %v839_v28 }
 0x161   : > { %v4853_v24 = vpop.xlane.xlu1 %1027  ;;  %v4855_v19 = vpop.xlane.xlu0 %1024  ;;  %v852_v26 = vrot.slane %v525_v41, %v4516_v55  ;;  %v848_v32 = vrot.slane %v524_v3, %v4513_v50  ;;  %v1235_v34 = vrot.slane %v4793_v21, %v4516_v55  ;;  %v1231_v35 = vrot.slane %v4795_v42, %v4513_v50 }
 0x162   : > { %v1227_v46 = vsel %vm609_vm1, %v1226_v58, %v1222_v16  ;;  %v1299_v27 = vsel %vm609_vm1, %v1298_v62, %v1294_v20  ;;  %v527_v47 = vmul.f32 0.0625, %v4809_v8  ;;  %v526_v2 = vmul.f32 0.0625, %v4811_v54 }
 0x163   : > { %v1489_v48 = vsel %vm890_vm2, %v1218_v63, %v1209_v17  ;;  %v1496_v38 = vsel %vm890_vm2, %v1290_v25, %v1281_v9  ;;  %v919_v21 = vsel %vm892_vm3, %v844_v22, %v918_v53  ;;  %v1307_v42 = vrot.slane %v4797_v44, %v4516_v55 }
 0x164   : > { %v1303_v29 = vrot.slane %v4799_v1, %v4513_v50  ;;  %v1244_v36 = vrot.slane %v4813_v59, %v4516_v55  ;;  %v1240_v8 = vrot.slane %v4815_v57, %v4513_v50  ;;  %v1490_v54 = vsel %vm892_vm3, %v1227_v46, %v1489_v48 }
 0x165   : > { %v4857_v61 = vpop.xlane.xlu1 %1063  ;;  %v4859_v0 = vpop.xlane.xlu0 %1060  ;;  %v1497_v28 = vsel %vm892_vm3, %v1299_v27, %v1496_v38  ;;  %v853_v11 = vsel %vm609_vm1, %v852_v26, %v848_v32  ;;  %v1236_v41 = vsel %vm609_vm1, %v1235_v34, %v1231_v35  ;;  %v861_v1 = vrot.slane %v527_v47, %v4516_v55 }
 0x166   : > { %v857_v58 = vrot.slane %v526_v2, %v4513_v50  ;;  %v529_v59 = vmul.f32 0.0625, %v4840_v4  ;;  %v528_v57 = vmul.f32 0.0625, %v4842_v51  ;;  %v1253_v16 = vrot.slane %v4849_v60, %v4516_v55 }
 0x167   : > { %v1249_v32 = vrot.slane %v4851_v18, %v4513_v50  ;;  %v920_v53 = vsel %vm894_vm4, %v853_v11, %v919_v21  ;;  %v1491_v17 = vsel %vm894_vm4, %v1236_v41, %v1490_v54  ;;  %v1308_v63 = vsel %vm609_vm1, %v1307_v42, %v1303_v29 }
 0x168   : > { %v1245_v4 = vsel %vm609_vm1, %v1244_v36, %v1240_v8  ;;  %v1316_v51 = vrot.slane %v4819_v33, %v4516_v55  ;;  %v1312_v60 = vrot.slane %v4821_v14, %v4513_v50  ;;  %v870_v25 = vrot.slane %v529_v59, %v4516_v55 }
 0x169   : > { %v4861_v37 = vpop.xlane.xlu1 %1093  ;;  %v4863_v45 = vpop.xlane.xlu0 %1090  ;;  %v866_v22 = vrot.slane %v528_v57, %v4513_v50  ;;  %v862_v35 = vsel %vm609_vm1, %v861_v1, %v857_v58  ;;  %v1254_v33 = vsel %vm609_vm1, %v1253_v16, %v1249_v32  ;;  %v1492_v2 = vsel %vm896_vm5, %v1245_v4, %v1491_v17 }
 0x16a   : > { %v1498_v54 = vsel %vm894_vm4, %v1308_v63, %v1497_v28  ;;  %v1493_v11 = vsel %vm898_vm6, %v1254_v33, %v1492_v2  ;;  %v1361_v33 = vrot.slane %v4805_v10, %v4516_v55  ;;  %v1348_v2 = vrot.slane %v4803_v15, %v4513_v50 }
 0x16b   : > { %v1379_v10 = vrot.slane %v4857_v61, %v4516_v55 }
 0x16d   : > { %v4865_v5 = vpop.xlane.xlu1 %1099  ;;  %v4867_v23 = vpop.xlane.xlu0 %1096 }
 0x171   : > { %v4873_v30 = vpop.xlane.xlu1 %461  ;;  %v4875_v39 = vpop.xlane.xlu0 %458 }
 0x172   : > { %v531_v62 = vmul.f32 0.0625, %v4873_v30  ;;  %v530_v20 = vmul.f32 0.0625, %v4875_v39 }
 0x174   : > { %v879_v14 = vrot.slane %v531_v62, %v4516_v55  ;;  %v875_v46 = vrot.slane %v530_v20, %v4513_v50 }
 0x175   : > { %v4883_v6 = vpop.xlane.xlu1 %985  ;;  %v4885_v12 = vpop.xlane.xlu0 %982 }
 0x176   : > { %v1262_v18 = vrot.slane %v4883_v6, %v4516_v55  ;;  %v1258_v30 = vrot.slane %v4885_v12, %v4513_v50  ;;  %v1325_v6 = vrot.slane %v4853_v24, %v4516_v55  ;;  %v1321_v12 = vrot.slane %v4855_v19, %v4513_v50 }
 0x177   : > { %v1317_v24 = vsel %vm609_vm1, %v1316_v51, %v1312_v60  ;;  %v871_v19 = vsel %vm609_vm1, %v870_v25, %v866_v22  ;;  %v880_v41 = vsel %vm609_vm1, %v879_v14, %v875_v46  ;;  %v1357_v14 = vrot.slane %v4807_v40, %v4513_v50 }
 0x178   : > { %v1263_v48 = vsel %vm609_vm1, %v1262_v18, %v1258_v30  ;;  %v1499_v57 = vsel %vm896_vm5, %v1317_v24, %v1498_v54  ;;  %v1370_v46 = vrot.slane %v4825_v13, %v4516_v55  ;;  %v1375_v40 = vrot.slane %v4859_v0, %v4513_v50 }
 0x179   : > { %v4909_v56 = vpop.xlane.xlu1 %1033  ;;  %v4911_v52 = vpop.xlane.xlu0 %1030  ;;  %v1494_v58 = vsel %vm900_vm7, %v1263_v48, %v1493_v11  ;;  %v1362_v48 = vsel %vm609_vm1, %v1361_v33, %v1357_v14 }
 0x17a   : > { %v1334_v38 = vrot.slane %v4909_v56, %v4516_v55  ;;  %v1330_v21 = vrot.slane %v4911_v52, %v4513_v50  ;;  %v921_v56 = vsel %vm896_vm5, %v862_v35, %v920_v53  ;;  %v1326_v52 = vsel %vm609_vm1, %v1325_v6, %v1321_v12 }
 0x17b   : > { %v922_v20 = vsel %vm898_vm6, %v871_v19, %v921_v56  ;;  %v1500_v60 = vsel %vm898_vm6, %v1326_v52, %v1499_v57  ;;  %v1366_v6 = vrot.slane %v4827_v31, %v4513_v50  ;;  %v1429_v57 = vrot.slane %v4867_v23, %v4513_v50 }
 0x17c   : > { %v1335_v16 = vsel %vm609_vm1, %v1334_v38, %v1330_v21  ;;  %v923_v4 = vsel %vm900_vm7, %v880_v41, %v922_v20  ;;  %v1420_v23 = vrot.slane %v4863_v45, %v4513_v50 }
 0x17d   : > { %v4933_v49 = vpop.xlane.xlu1 %1069  ;;  %v4935_v7 = vpop.xlane.xlu0 %1066  ;;  %v1501_v30 = vsel %vm900_vm7, %v1335_v16, %v1500_v60  ;;  %v1371_v15 = vsel %vm609_vm1, %v1370_v46, %v1366_v6 }
 0x17e   : > { %v1388_v13 = vrot.slane %v4933_v49, %v4516_v55  ;;  %v1384_v31 = vrot.slane %v4935_v7, %v4513_v50  ;;  %v1380_v49 = vsel %vm609_vm1, %v1379_v10, %v1375_v40 }
 0x180   : > { %v1389_v24 = vsel %vm609_vm1, %v1388_v13, %v1384_v31 }
 0x181   : > { %v4956_v3 = vpop.xlane.xlu1 %1105  ;;  %v4958_v44 = vpop.xlane.xlu0 %1102 }
 0x182   : > { %v1438_v20 = vrot.slane %v4958_v44, %v4513_v50 }
 0x185   : > { %v468_v39 = vpop.xlane.xlu1 %467  ;;  %v465_v9 = vpop.xlane.xlu0 %464 }
 0x186   : > { %v533_v26 = vmul.f32 0.0625, %v468_v39  ;;  %v532_v34 = vmul.f32 0.0625, %v465_v9 }
 0x188   : > { %v888_v27 = vrot.slane %v533_v26, %v4516_v55  ;;  %v884_v47 = vrot.slane %v532_v34, %v4513_v50 }
 0x189   : > { %v992_v42 = vpop.xlane.xlu1 %991  ;;  %v989_v29 = vpop.xlane.xlu0 %988 }
 0x18a   : > { %v1271_v36 = vrot.slane %v992_v42, %v4516_v55  ;;  %v1267_v8 = vrot.slane %v989_v29, %v4513_v50  ;;  %v889_v59 = vsel %vm609_vm1, %v888_v27, %v884_v47  ;;  %v1352_v47 = vrot.slane %v4801_v43, %v4516_v55 }
 0x18b   : > { %v924_v51 = vsel %vm902_vm8, %v889_v59, %v923_v4  ;;  %v1433_v59 = vrot.slane %v4865_v5, %v4516_v55 }
 0x18c   : > { %v1272_v1 = vsel %vm609_vm1, %v1271_v36, %v1267_v8  ;;  %v938_v22 = vsel %vm276_vm0, %v924_v51, 0.0  ;;  %v1353_v29 = vsel %vm609_vm1, %v1352_v47, %v1348_v2 }
 0x18d   : > { %v1040_v32 = vpop.xlane.xlu1 %1039  ;;  %v1037_v28 = vpop.xlane.xlu0 %1036  ;;  %v1495_v62 = vsel %vm902_vm8, %v1272_v1, %v1494_v58  ;;  %v1503_v7 = vsel %vm890_vm2, %v1362_v48, %v1353_v29  ;;  %v1434_v44 = vsel %vm609_vm1, %v1433_v59, %v1429_v57  ;;  %v1535_v29 = vld [vmem:[%s7111_s1 + $0x10] sm:$0xff] }
 0x18e   : > { %v1343_v53 = vrot.slane %v1040_v32, %v4516_v55  ;;  %v1339_v17 = vrot.slane %v1037_v28, %v4513_v50  ;;  %v1521_v63 = vsel %vm276_vm0, %v1495_v62, -inf  ;;  %v1504_v19 = vsel %vm892_vm3, %v1371_v15, %v1503_v7 }
 0x18f   : > { %1522 = vmax.xlane.f32.xlu1 %v1521_v63  ;;  %v1505_v8 = vsel %vm894_vm4, %v1380_v49, %v1504_v19  ;;  %v1424_v28 = vrot.slane %v4861_v37, %v4516_v55  ;;  %v1442_v62 = vrot.slane %v4956_v3, %v4516_v55 }
 0x190   : > { %v1344_v18 = vsel %vm609_vm1, %v1343_v53, %v1339_v17  ;;  %v1506_v56 = vsel %vm896_vm5, %v1389_v24, %v1505_v8  ;;  %v1536_v8 = vld [vmem:[%s7111_s1 + $0x18] sm:$0xff] }
 0x191   : > { %v1076_v39 = vpop.xlane.xlu1 %1075  ;;  %v1073_v9 = vpop.xlane.xlu0 %1072  ;;  %v1502_v25 = vsel %vm902_vm8, %v1344_v18, %v1501_v30  ;;  %v1443_v30 = vsel %vm609_vm1, %v1442_v62, %v1438_v20 }
 0x192   : > { %v1524_v26 = vsel %vm276_vm0, %v1502_v25, -inf  ;;  %v1397_v38 = vrot.slane %v1076_v39, %v4516_v55  ;;  %v1393_v43 = vrot.slane %v1073_v9, %v4513_v50  ;;  %v1425_v9 = vsel %vm609_vm1, %v1424_v28, %v1420_v23 }
 0x193   : > { %939 = vadd.xlane.f32.xlu1 %v938_v22  ;;  %1525 = vmax.xlane.f32.xlu0 %v1524_v26 }
 0x194   : > { %v1398_v36 = vsel %vm609_vm1, %v1397_v38, %v1393_v43 }
 0x195   : > { %v1112_v34 = vpop.xlane.xlu1 %1111  ;;  %v1109_v35 = vpop.xlane.xlu0 %1108  ;;  %v1507_v58 = vsel %vm898_vm6, %v1398_v36, %v1506_v56 }
 0x196   : > { %v1451_v63 = vrot.slane %v1112_v34, %v4516_v55  ;;  %v1447_v4 = vrot.slane %v1109_v35, %v4513_v50  ;;  %v1510_v34 = vsel %vm890_vm2, %v1434_v44, %v1425_v9 }
 0x197   : > { %v1511_v33 = vsel %vm892_vm3, %v1443_v30, %v1510_v34 }
 0x198   : > { %v1452_v25 = vsel %vm609_vm1, %v1451_v63, %v1447_v4  ;;  %v1538_v63 = vld [vmem:[%s7112_s2 + $0x8] sm:$0xff] }
 0x199   : > { %v1082_v12 = vpop.xlane.xlu1 %1081  ;;  %v1079_v27 = vpop.xlane.xlu0 %1078  ;;  %v1512_v46 = vsel %vm894_vm4, %v1452_v25, %v1511_v33  ;;  %v1540_v25 = vld [vmem:[%s7112_s2 + $0x18] sm:$0xff] }
 0x19a   : > { %v1406_v21 = vrot.slane %v1082_v12, %v4516_v55  ;;  %v1402_v61 = vrot.slane %v1079_v27, %v4513_v50 }
 0x19c   : > { %v1407_v54 = vsel %vm609_vm1, %v1406_v21, %v1402_v61 }
 0x19d   : > { %v1118_v42 = vpop.xlane.xlu1 %1117  ;;  %v1115_v0 = vpop.xlane.xlu0 %1114  ;;  %v1508_v32 = vsel %vm900_vm7, %v1407_v54, %v1507_v58 }
 0x19e   : > { %v1460_v37 = vrot.slane %v1118_v42, %v4516_v55  ;;  %v1456_v3 = vrot.slane %v1115_v0, %v4513_v50  ;;  %v1533_v0 = vld [vmem:[%s7111_s1] sm:$0xff] }
 0x1a0   : > { %v1461_v35 = vsel %vm609_vm1, %v1460_v37, %v1456_v3 }
 0x1a1   : > { %v1088_v11 = vpop.xlane.xlu1 %1087  ;;  %v1085_v41 = vpop.xlane.xlu0 %1084  ;;  %v1513_v47 = vsel %vm896_vm5, %v1461_v35, %v1512_v46 }
 0x1a2   : > { %v1415_v52 = vrot.slane %v1088_v11, %v4516_v55  ;;  %v1411_v1 = vrot.slane %v1085_v41, %v4513_v50 }
 0x1a4   : > { %v1416_v16 = vsel %vm609_vm1, %v1415_v52, %v1411_v1 }
 0x1a5   : > { %v1124_v53 = vpop.xlane.xlu1 %1123  ;;  %v1121_v17 = vpop.xlane.xlu0 %1120  ;;  %v1509_v5 = vsel %vm902_vm8, %v1416_v16, %v1508_v32 }
 0x1a6   : > { %v1527_v51 = vsel %vm276_vm0, %v1509_v5, -inf  ;;  %v1469_v60 = vrot.slane %v1124_v53, %v4516_v55  ;;  %v1465_v18 = vrot.slane %v1121_v17, %v4513_v50  ;;  %v1537_v17 = vld [vmem:[%s7112_s2] sm:$0xff] }
 0x1a7   : > { %1528 = vmax.xlane.f32.xlu0 %v1527_v51 }
 0x1a8   : > { %v1470_v14 = vsel %vm609_vm1, %v1469_v60, %v1465_v18  ;;  %v1539_v60 = vld [vmem:[%s7112_s2 + $0x10] sm:$0xff] }
 0x1a9   : > { %v1130_v45 = vpop.xlane.xlu1 %1129  ;;  %v1127_v39 = vpop.xlane.xlu0 %1126  ;;  %v1514_v40 = vsel %vm898_vm6, %v1470_v14, %v1513_v47 }
 0x1aa   : > { %v1478_v22 = vrot.slane %v1130_v45, %v4516_v55  ;;  %v1474_v26 = vrot.slane %v1127_v39, %v4513_v50 }
 0x1ac   : > { %v1479_v6 = vsel %vm609_vm1, %v1478_v22, %v1474_v26 }
 0x1ad   : > { %v1136_v12 = vpop.xlane.xlu1 %1135  ;;  %v1133_v27 = vpop.xlane.xlu0 %1132  ;;  %v1515_v31 = vsel %vm900_vm7, %v1479_v6, %v1514_v40 }
 0x1ae   : > { %v1487_v2 = vrot.slane %v1136_v12, %v4516_v55  ;;  %v1483_v10 = vrot.slane %v1133_v27, %v4513_v50  ;;  %v1534_v55 = vld [vmem:[%s7111_s1 + $0x8] sm:$0xff] }
 0x1b0   : > { %v1488_v13 = vsel %vm609_vm1, %v1487_v2, %v1483_v10 }
 0x1b1   : > { %v1516_v48 = vsel %vm902_vm8, %v1488_v13, %v1515_v31 }
 0x1b2   : > { %v1530_v38 = vsel %vm276_vm0, %v1516_v48, -inf }
 0x1b3   : > { %1531 = vmax.xlane.f32.xlu1 %v1530_v38 }
 0x1b6   : > { %v931_v43 = vpop.xlane.xlu0 %930 }
 0x1b7   : > { %v941_v50 = vmul.f32 0.0625, %v931_v43 }
 0x1b9   : > { %v1541_v24 = vmul.f32 %v1533_v0, %v941_v50 }
 0x1ba   : > { %v934_v15 = vpop.xlane.xlu1 %933 }
 0x1bb   : > { %v942_v61 = vmul.f32 0.0625, %v934_v15  ;;  %v1546_v11 = vsel %vm1545_vm9, %v1541_v24, 0.0 }
 0x1bd   : > { %v1542_v49 = vmul.f32 %v1534_v55, %v942_v61 }
 0x1bf   : > { %v1547_v36 = vsel %vm1545_vm9, %v1542_v49, 0.0 }
 0x1c0   : > { %v1548_v52 = vadd.f32 %v1547_v36, %v1546_v11 }
 0x1ea   : > { %v937_v21 = vpop.xlane.xlu0 %936 }
 0x1eb   : > { %v943_v42 = vmul.f32 0.0625, %v937_v21 }
 0x1ed   : > { %v1543_v19 = vmul.f32 %v1535_v29, %v943_v42 }
 0x1ef   : > { %v1549_v56 = vsel %vm1545_vm9, %v1543_v19, 0.0 }
 0x1f0   : > { %v1550_v58 = vadd.f32 %v1549_v56, %v1548_v52 }
 0x21c   : > { %v1523_v7 = vpop.xlane.xlu1 %1522 }
 0x21d   : > { %v1576_v18 = vmul.f32 %v1533_v0, %v1523_v7 }
 0x21f   : > { %v1580_v22 = vsel %vm1545_vm9, %v1576_v18, 0.0 }
 0x220   : > { %v940_v54 = vpop.xlane.xlu1 %939  ;;  %v1526_v5 = vpop.xlane.xlu0 %1525 }
 0x221   : > { %v944_v41 = vmul.f32 0.0625, %v940_v54  ;;  %v1577_v44 = vmul.f32 %v1534_v55, %v1526_v5  ;;  %v7137_v5 = vld [vmem:[#allocation6_spill] sm:$0xff] }
 0x222   : > { %v5173_v18 = vsub.s32 7, %v7137_v5 }
 0x223   : > { %v1544_v1 = vmul.f32 %v1536_v8, %v944_v41  ;;  %v1581_v9 = vsel %vm1545_vm9, %v1577_v44, 0.0  ;;  %v5170_v44 = vsub.s32 6, %v7137_v5 }
 0x224   : > { %v1582_v34 = vadd.f32 %v1581_v9, %v1580_v22 }
 0x225   : > { %v1551_v59 = vsel %vm1545_vm9, %v1544_v1, 0.0 }
 0x226   : > { %v1552_v57 = vadd.f32 %v1551_v59, %v1550_v58 }
 0x228   : > { %v1553_v16 = vrot.slane %v1552_v57, 4 }
 0x22a   : > { %v1554_v32 = vadd.f32 %v1553_v16, %v1552_v57  ;;  %v4127_v57 = vmov 0.0  }
 0x22b   : > { %2254 = vst.msk [vmem:[#allocation2 + $0x18] sm:$0xff] %vm2249_vm10, %v4127_v57  ;;  %2255 = vst.msk [vmem:[#allocation2 + $0x20] sm:$0xff] %vm2249_vm10, %v4127_v57 }
 0x22c   : > { %v1555_v28 = vrot.slane %v1554_v32, 2  ;;  %2250 = vst.msk [vmem:[#allocation2] sm:$0xff] %vm2249_vm10, %v4127_v57  ;;  %2251 = vst.msk [vmem:[#allocation2 + $0x8] sm:$0xff] %vm2249_vm10, %v4127_v57 }
 0x22d   : > { %2256 = vst.msk [vmem:[#allocation2 + $0x28] sm:$0x3f] %vm2252_vm11, %v4127_v57  ;;  %2253 = vst.msk [vmem:[#allocation2 + $0x10] sm:$0x3f] %vm2252_vm11, %v4127_v57 }
 0x22e   : > { %v1556_v62 = vadd.f32 %v1555_v28, %v1554_v32 }
 0x230   : > { %v1557_v20 = vrot.slane %v1556_v62, 1 }
 0x232   : > { %v1558_v53 = vadd.f32 %v1557_v20, %v1556_v62 }
 0x234   : > { %v1559_v23 = vmax.f32 %v1558_v53, 0.0  ;;  %v1529_v51 = vpop.xlane.xlu0 %1528 }
 0x235   : > { %v1578_v30 = vmul.f32 %v1535_v29, %v1529_v51  ;;  %v5161_v51 = vsub.s32 3, %v7137_v5 }
 0x236   : > { %v1560_v4 = vmul.f32 %v1559_v23, %v1537_v17  ;;  %v1561_v3 = vmul.f32 %v1559_v23, %v1538_v63  ;;  %v1562_v39 = vmul.f32 %v1559_v23, %v1539_v60  ;;  %v1563_v14 = vmul.f32 %v1559_v23, %v1540_v25 }
 0x237   : > { %v1583_v26 = vsel %vm1545_vm9, %v1578_v30, 0.0  ;;  %v5152_v23 = vsub.s32 0, %v7137_v5 }
 0x238   : > { %v1564_v37 = vsel %vm1545_vm9, %v1560_v4, 0.0  ;;  %v1567_v45 = vsel %vm1545_vm9, %v1561_v3, 0.0  ;;  %v1570_v33 = vsel %vm1545_vm9, %v1562_v39, 0.0  ;;  %v1584_v6 = vadd.f32 %v1583_v26, %v1582_v34 }
 0x239   : > { %1565 = vadd.xlane.f32.xlu0 %v1564_v37  ;;  %v1573_v47 = vsel %vm1545_vm9, %v1563_v14, 0.0  ;;  %v5158_v4 = vsub.s32 2, %v7137_v5  ;;  %v5164_v37 = vsub.s32 4, %v7137_v5  ;;  %v5167_v3 = vsub.s32 5, %v7137_v5  ;;  %v3959_v14 = vld [vmem:[%s4192_s26] sm:$0xff] }
 0x23d   : > { %1568 = vadd.xlane.f32.xlu0 %v1567_v45 }
 0x240   : > { %v1532_v35 = vpop.xlane.xlu1 %1531 }
 0x241   : > { %v1579_v46 = vmul.f32 %v1536_v8, %v1532_v35  ;;  %1571 = vadd.xlane.f32.xlu0 %v1570_v33 }
 0x243   : > { %v1585_v12 = vsel %vm1545_vm9, %v1579_v46, 0.0 }
 0x244   : > { %v1586_v27 = vadd.f32 %v1585_v12, %v1584_v6  ;;  %v3960_v6 = vld [vmem:[%s4192_s26 + $0x8] sm:$0xff] }
 0x245   : > { %1574 = vadd.xlane.f32.xlu0 %v1573_v47 }
 0x246   : > { %v1587_v2 = vrot.slane %v1586_v27, 4 }
 0x248   : > { %v1588_v10 = vadd.f32 %v1587_v2, %v1586_v27  ;;  %v3961_v27 = vld [vmem:[%s4192_s26 + $0x10] sm:$0xff] }
 0x24a   : > { %v1589_v40 = vrot.slane %v1588_v10, 2 }
 0x24c   : > { %v1590_v13 = vadd.f32 %v1589_v40, %v1588_v10  ;;  %v3962_v10 = vld [vmem:[%s4192_s26 + $0x18] sm:$0xff] }
 0x24e   : > { %v1591_v31 = vrot.slane %v1590_v13, 1 }
 0x250   : > { %v1592_v48 = vadd.f32 %v1591_v31, %v1590_v13  ;;  %v3963_v13 = vld [vmem:[%s4192_s26 + $0x20] sm:$0xff] }
 0x252   : > { %v1593_v38 = vmax.f32 %v1592_v48, 0.0  ;;  %v3964_v48 = vld [vmem:[%s4192_s26 + $0x28] sm:$0xff] }
 0x254   : > { %v1594_v43 = vmul.f32 %v1593_v38, %v1537_v17  ;;  %v1595_v21 = vmul.f32 %v1593_v38, %v1538_v63  ;;  %v1596_v55 = vmul.f32 %v1593_v38, %v1539_v60  ;;  %v1597_v42 = vmul.f32 %v1593_v38, %v1540_v25 }
 0x255   : > { %v5155_v63 = vsub.s32 1, %v7137_v5 }
 0x256   : > { %v1598_v15 = vsel %vm1545_vm9, %v1594_v43, 0.0  ;;  %v1601_v61 = vsel %vm1545_vm9, %v1595_v21, 0.0  ;;  %v1604_v50 = vsel %vm1545_vm9, %v1596_v55, 0.0  ;;  %v1607_v0 = vsel %vm1545_vm9, %v1597_v42, 0.0  ;;  %v3965_v43 = vld [vmem:[%s4192_s26 + $0x30] sm:$0xff] }
 0x257   : > { %1599 = vadd.xlane.f32.xlu1 %v1598_v15 }
 0x25b   : > { %1602 = vadd.xlane.f32.xlu1 %v1601_v61 }
 0x25f   : > { %1605 = vadd.xlane.f32.xlu1 %v1604_v50 }
 0x263   : > { %1608 = vadd.xlane.f32.xlu1 %v1607_v0 }
 0x2c6   : > { %v1566_v29 = vpop.xlane.xlu0 %1565 }
 0x2ca   : > { %v1569_v49 = vpop.xlane.xlu0 %1568 }
 0x2ce   : > { %v1572_v54 = vpop.xlane.xlu0 %1571 }
 0x2d2   : > { %v1575_v1 = vpop.xlane.xlu0 %1574 }
 0x2e4   : > { %v1600_v7 = vpop.xlane.xlu1 %1599 }
 0x2e5   : > { %v1610_v24 = vadd.f32 %v1600_v7, %v1566_v29  ;;  %v3966_v7 = vld [vmem:[%s4192_s26 + $0x38] sm:$0xff] }
 0x2e7   : > { %v3799_v19 = vmul.f32 -1.442695, %v1610_v24 }
 0x2e8   : > { %v1603_v36 = vpop.xlane.xlu1 %1602 }
 0x2e9   : > { %3935 = vpow2.f32 %v3799_v19  ;;  %v1611_v8 = vadd.f32 %v1603_v36, %v1569_v49  ;;  %v3967_v19 = vld [vmem:[%s4192_s26 + $0x40] sm:$0xff] }
 0x2eb   : > { %v3800_v11 = vmul.f32 -1.442695, %v1611_v8  ;;  %v3968_v8 = vld [vmem:[%s4192_s26 + $0x48] sm:$0xff] }
 0x2ec   : > { %v1606_v41 = vpop.xlane.xlu1 %1605 }
 0x2ed   : > { %3937 = vpow2.f32 %v3800_v11  ;;  %v1612_v56 = vadd.f32 %v1606_v41, %v1572_v54  ;;  %v3969_v11 = vld [vmem:[%s4192_s26 + $0x50] sm:$0xff] }
 0x2ef   : > { %v3801_v52 = vmul.f32 -1.442695, %v1612_v56 }
 0x2f0   : > { %v1609_v58 = vpop.xlane.xlu1 %1608 }
 0x2f1   : > { %3939 = vpow2.f32 %v3801_v52  ;;  %v1613_v59 = vadd.f32 %v1609_v58, %v1575_v1  ;;  %v3970_v52 = vld [vmem:[%s4192_s26 + $0x58] sm:$0xff]  ;;  %v3971_v58 = vld [vmem:[%s4192_s26 + $0x60] sm:$0xff] }
 0x2f3   : > { %v3936_v16 = vpop.eup %3935  ;;  %v3802_v32 = vmul.f32 -1.442695, %v1613_v59 }
 0x2f4   : > { %v1626_v28 = vadd.f32 1.0, %v3936_v16  ;;  %v3972_v16 = vld [vmem:[%s4192_s26 + $0x68] sm:$0xff] }
 0x2f5   : > { %3941 = vpow2.f32 %v3802_v32 }
 0x2f6   : > { %3943 = vrcp.f32 %v1626_v28  ;;  %v3973_v28 = vld [vmem:[%s4192_s26 + $0x70] sm:$0xff] }
 0x2f7   : > { %v3938_v62 = vpop.eup %3937 }
 0x2f8   : > { %v1627_v20 = vadd.f32 1.0, %v3938_v62 }
 0x2fa   : > { %3945 = vrcp.f32 %v1627_v20 }
 0x2fb   : > { %v3940_v53 = vpop.eup %3939 }
 0x2fc   : > { %v1628_v17 = vadd.f32 1.0, %v3940_v53 }
 0x2fe   : > { %3947 = vrcp.f32 %v1628_v17 }
 0x2ff   : > { %v3942_v60 = vpop.eup %3941 }
 0x300   : > { %v3944_v30 = vpop.eup %3943  ;;  %v1629_v45 = vadd.f32 1.0, %v3942_v60 }
 0x301   : > { %v1645_v39 = vrot.slane %v3944_v30, %v5152_v23  ;;  %v1649_v9 = vrot.slane %v3944_v30, %v5155_v63  ;;  %v1653_v25 = vrot.slane %v3944_v30, %v5158_v4  ;;  %v1657_v22 = vrot.slane %v3944_v30, %v5161_v51 }
 0x302   : > { %3949 = vrcp.f32 %v1629_v45  ;;  %v1661_v26 = vrot.slane %v3944_v30, %v5164_v37  ;;  %v1665_v34 = vrot.slane %v3944_v30, %v5167_v3  ;;  %v1669_v35 = vrot.slane %v3944_v30, %v5170_v44 }
 0x303   : > { %v5190_v33 = vrot.slane %v3944_v30, %v5173_v18  ;;  %v1802_v46 = vmul.f32 %v3959_v14, %v1645_v39  ;;  %v1803_v12 = vmul.f32 %v3960_v6, %v1645_v39  ;;  %v1804_v47 = vmul.f32 %v3961_v27, %v1649_v9  ;;  %v3977_v14 = vld [vmem:[%s4192_s26 + $0xa0] sm:$0xff] }
 0x304   : > { %v3946_v2 = vpop.eup %3945  ;;  %v1805_v40 = vmul.f32 %v3962_v10, %v1649_v9  ;;  %v1806_v31 = vmul.f32 %v3963_v13, %v1653_v25  ;;  %v1807_v38 = vmul.f32 %v3964_v48, %v1653_v25  ;;  %v1808_v15 = vmul.f32 %v3965_v43, %v1657_v22  ;;  %v3974_v9 = vld [vmem:[%s4192_s26 + $0x78] sm:$0xff] }
 0x305   : > { %v5200_v21 = vrot.slane %v3946_v2, %v5152_v23  ;;  %v5203_v61 = vrot.slane %v3946_v2, %v5155_v63  ;;  %v5206_v55 = vrot.slane %v3946_v2, %v5158_v4  ;;  %v5209_v50 = vrot.slane %v3946_v2, %v5161_v51  ;;  %1866 = vst.msk [vmem:[%s5184_s21] sm:$0xff] %vm276_vm0, %v1802_v46 }
 0x306   : > { %1868 = vst.msk [vmem:[%s5184_s21 + $0x10] sm:$0xff] %vm276_vm0, %v1804_v47  ;;  %1867 = vst.msk [vmem:[%s5184_s21 + $0x8] sm:$0xff] %vm276_vm0, %v1803_v12  ;;  %v5218_v42 = vrot.slane %v3946_v2, %v5164_v37  ;;  %v5221_v0 = vrot.slane %v3946_v2, %v5167_v3  ;;  %v5224_v29 = vrot.slane %v3946_v2, %v5170_v44  ;;  %v3978_v12 = vld [vmem:[%s4192_s26 + $0xb0] sm:$0xff]  ;;  %v3979_v47 = vld [vmem:[%s4192_s26 + $0xc0] sm:$0xff] }
 0x307   : > { %v5227_v49 = vrot.slane %v3946_v2, %v5173_v18  ;;  %1870 = vst.msk [vmem:[%s5184_s21 + $0x20] sm:$0xff] %vm276_vm0, %v1806_v31  ;;  %1872 = vst.msk [vmem:[%s5184_s21 + $0x30] sm:$0xff] %vm276_vm0, %v1808_v15  ;;  %v1809_v24 = vmul.f32 %v3966_v7, %v1657_v22  ;;  %v1810_v36 = vmul.f32 %v3967_v19, %v1661_v26  ;;  %v3975_v22 = vld [vmem:[%s4192_s26 + $0x80] sm:$0xff]  ;;  %v3980_v2 = vld [vmem:[%s4192_s26 + $0xd0] sm:$0xff] }
 0x308   : > { %1869 = vst.msk [vmem:[%s5184_s21 + $0x18] sm:$0xff] %vm276_vm0, %v1805_v40  ;;  %1871 = vst.msk [vmem:[%s5184_s21 + $0x28] sm:$0xff] %vm276_vm0, %v1807_v38  ;;  %v1811_v54 = vmul.f32 %v3968_v8, %v1661_v26  ;;  %v1812_v41 = vmul.f32 %v3969_v11, %v1665_v34  ;;  %v3948_v56 = vpop.eup %3947  ;;  %v1813_v1 = vmul.f32 %v3970_v52, %v1665_v34  ;;  %v3976_v34 = vld [vmem:[%s4192_s26 + $0x90] sm:$0xff]  ;;  %v3981_v40 = vld [vmem:[%s4192_s26 + $0xe0] sm:$0xff] }
 0x309   : > { %v1814_v59 = vmul.f32 %v3971_v58, %v1669_v35  ;;  %v1815_v32 = vmul.f32 %v3972_v16, %v1669_v35  ;;  %v1816_v62 = vmul.f32 %v3973_v28, %v5190_v33  ;;  %v5247_v20 = vrot.slane %v3948_v56, %v5152_v23  ;;  %1874 = vst.msk [vmem:[%s5184_s21 + $0x40] sm:$0xff] %vm276_vm0, %v1810_v36  ;;  %v3984_v15 = vld [vmem:[%s4192_s26 + $0x110] sm:$0xff]  ;;  %v3989_v52 = vld [vmem:[%s4192_s26 + $0x160] sm:$0xff] }
 0x30a   : > { %v5250_v53 = vrot.slane %v3948_v56, %v5155_v63  ;;  %v5253_v17 = vrot.slane %v3948_v56, %v5158_v4  ;;  %v5256_v5 = vrot.slane %v3948_v56, %v5161_v51  ;;  %1876 = vst.msk [vmem:[%s5184_s21 + $0x50] sm:$0xff] %vm276_vm0, %v1812_v41  ;;  %1873 = vst.msk [vmem:[%s5184_s21 + $0x38] sm:$0xff] %vm276_vm0, %v1809_v24  ;;  %v3985_v24 = vld [vmem:[%s4192_s26 + $0x120] sm:$0xff]  ;;  %v3986_v36 = vld [vmem:[%s4192_s26 + $0x130] sm:$0xff] }
 0x30b   : > { %1875 = vst.msk [vmem:[%s5184_s21 + $0x48] sm:$0xff] %vm276_vm0, %v1811_v54  ;;  %v5267_v60 = vrot.slane %v3948_v56, %v5164_v37  ;;  %v5270_v30 = vrot.slane %v3948_v56, %v5167_v3  ;;  %v5273_v45 = vrot.slane %v3948_v56, %v5170_v44  ;;  %v5276_v39 = vrot.slane %v3948_v56, %v5173_v18  ;;  %v3987_v54 = vld [vmem:[%s4192_s26 + $0x140] sm:$0xff]  ;;  %v3988_v41 = vld [vmem:[%s4192_s26 + $0x150] sm:$0xff] }
 0x30c   : > { %1878 = vst.msk [vmem:[%s5184_s21 + $0x60] sm:$0xff] %vm276_vm0, %v1814_v59  ;;  %1880 = vst.msk [vmem:[%s5184_s21 + $0x70] sm:$0xff] %vm276_vm0, %v1816_v62  ;;  %v1817_v25 = vmul.f32 %v3974_v9, %v5190_v33  ;;  %v1818_v26 = vmul.f32 %v3975_v22, %v5200_v21  ;;  %v1820_v35 = vmul.f32 %v3976_v34, %v5203_v61  ;;  %v3950_v6 = vpop.eup %3949  ;;  %v1930_v58 = vld [vmem:[%s5184_s21] sm:$0xff]  ;;  %v3990_v16 = vld [vmem:[%s4192_s26 + $0x170] sm:$0xff] }
 0x30d   : > { %1877 = vst.msk [vmem:[%s5184_s21 + $0x58] sm:$0xff] %vm276_vm0, %v1813_v1  ;;  %1879 = vst.msk [vmem:[%s5184_s21 + $0x68] sm:$0xff] %vm276_vm0, %v1815_v32  ;;  %v1822_v46 = vmul.f32 %v3977_v14, %v5206_v55  ;;  %v1824_v27 = vmul.f32 %v3978_v12, %v5209_v50  ;;  %v1826_v33 = vmul.f32 %v3979_v47, %v5218_v42  ;;  %v1932_v59 = vld [vmem:[%s5184_s21 + $0x10] sm:$0xff]  ;;  %v3991_v28 = vld [vmem:[%s4192_s26 + $0x180] sm:$0xff] }
 0x30e   : > { %v1828_v10 = vmul.f32 %v3980_v2, %v5221_v0  ;;  %v1830_v13 = vmul.f32 %v3981_v40, %v5224_v29  ;;  %v5303_v31 = vrot.slane %v3950_v6, %v5152_v23  ;;  %v5306_v48 = vrot.slane %v3950_v6, %v5155_v63  ;;  %1882 = vst.msk [vmem:[%s5184_s21 + $0x80] sm:$0xff] %vm276_vm0, %v1818_v26  ;;  %v3992_v9 = vld [vmem:[%s4192_s26 + $0x190] sm:$0xff]  ;;  %v3993_v22 = vld [vmem:[%s4192_s26 + $0x1a0] sm:$0xff] }
 0x30f   : > { %v5309_v38 = vrot.slane %v3950_v6, %v5158_v4  ;;  %v5312_v43 = vrot.slane %v3950_v6, %v5161_v51  ;;  %1884 = vst.msk [vmem:[%s5184_s21 + $0x90] sm:$0xff] %vm276_vm0, %v1820_v35  ;;  %1886 = vst.msk [vmem:[%s5184_s21 + $0xa0] sm:$0xff] %vm276_vm0, %v1822_v46  ;;  %v5323_v23 = vrot.slane %v3950_v6, %v5164_v37  ;;  %v3982_v37 = vld [vmem:[%s4192_s26 + $0xf0] sm:$0xff]  ;;  %v3995_v14 = vld [vmem:[%s4192_s26 + $0x1c0] sm:$0xff]  ;;  %v1994_v40 = vsel %vm276_vm0, %v1930_v58, 0.0 }
 0x310   : > { %1881 = vst.msk [vmem:[%s5184_s21 + $0x78] sm:$0xff] %vm276_vm0, %v1817_v25  ;;  %v5326_v63 = vrot.slane %v3950_v6, %v5167_v3  ;;  %v5329_v4 = vrot.slane %v3950_v6, %v5170_v44  ;;  %v5332_v51 = vrot.slane %v3950_v6, %v5173_v18  ;;  %1888 = vst.msk [vmem:[%s5184_s21 + $0xb0] sm:$0xff] %vm276_vm0, %v1824_v27  ;;  %v3983_v44 = vld [vmem:[%s4192_s26 + $0x100] sm:$0xff]  ;;  %v3994_v34 = vld [vmem:[%s4192_s26 + $0x1b0] sm:$0xff] }
 0x311   : > { %1890 = vst.msk [vmem:[%s5184_s21 + $0xc0] sm:$0xff] %vm276_vm0, %v1826_v33  ;;  %1892 = vst.msk [vmem:[%s5184_s21 + $0xd0] sm:$0xff] %vm276_vm0, %v1828_v10  ;;  %v1832_v3 = vmul.f32 %v3982_v37, %v5227_v49  ;;  %v1834_v18 = vmul.f32 %v3983_v44, %v5247_v20  ;;  %v1836_v7 = vmul.f32 %v3984_v15, %v5250_v53  ;;  %v3996_v6 = vld [vmem:[%s4192_s26 + $0x1d0] sm:$0xff]  ;;  %v3997_v27 = vld [vmem:[%s4192_s26 + $0x1e0] sm:$0xff] }
 0x312   : > { %1894 = vst.msk [vmem:[%s5184_s21 + $0xe0] sm:$0xff] %vm276_vm0, %v1830_v13  ;;  %v1838_v19 = vmul.f32 %v3985_v24, %v5253_v17  ;;  %v1840_v8 = vmul.f32 %v3986_v36, %v5256_v5  ;;  %v1842_v11 = vmul.f32 %v3987_v54, %v5267_v60  ;;  %v1844_v56 = vmul.f32 %v3988_v41, %v5270_v30  ;;  %v1934_v33 = vld [vmem:[%s5184_s21 + $0x20] sm:$0xff]  ;;  %v3998_v2 = vld [vmem:[%s4192_s26 + $0x1f0] sm:$0xff] }
 0x313   : > { %v1846_v1 = vmul.f32 %v3989_v52, %v5273_v45  ;;  %v1848_v32 = vmul.f32 %v3990_v16, %v5276_v39  ;;  %v1850_v62 = vmul.f32 %v3991_v28, %v5303_v31  ;;  %v1852_v25 = vmul.f32 %v3992_v9, %v5306_v48  ;;  %1896 = vst.msk [vmem:[%s5184_s21 + $0xf0] sm:$0xff] %vm276_vm0, %v1832_v3  ;;  %v1936_v37 = vld [vmem:[%s5184_s21 + $0x30] sm:$0xff]  ;;  %v1942_v54 = vld [vmem:[%s5184_s21 + $0x60] sm:$0xff] }
 0x314   : > { %v1854_v26 = vmul.f32 %v3993_v22, %v5309_v38  ;;  %1898 = vst.msk [vmem:[%s5184_s21 + $0x100] sm:$0xff] %vm276_vm0, %v1834_v18  ;;  %1900 = vst.msk [vmem:[%s5184_s21 + $0x110] sm:$0xff] %vm276_vm0, %v1836_v7  ;;  %v1856_v35 = vmul.f32 %v3994_v34, %v5312_v43  ;;  %v1858_v46 = vmul.f32 %v3995_v14, %v5323_v23  ;;  %v1995_v13 = vsel %vm276_vm0, %v1932_v59, 0.0  ;;  %v3999_v18 = vld [vmem:[%s4192_s26 + $0x88] sm:$0xff]  ;;  %v1938_v7 = vld [vmem:[%s5184_s21 + $0x40] sm:$0xff] }
 0x315   : > { %1902 = vst.msk [vmem:[%s5184_s21 + $0x120] sm:$0xff] %vm276_vm0, %v1838_v19  ;;  %v1860_v12 = vmul.f32 %v3996_v6, %v5326_v63  ;;  %v1862_v47 = vmul.f32 %v3997_v27, %v5329_v4  ;;  %1904 = vst.msk [vmem:[%s5184_s21 + $0x130] sm:$0xff] %vm276_vm0, %v1840_v8  ;;  %v1864_v10 = vmul.f32 %v3998_v2, %v5332_v51  ;;  %v1997_v44 = vsel %vm276_vm0, %v1934_v33, 0.0  ;;  %v1940_v19 = vld [vmem:[%s5184_s21 + $0x50] sm:$0xff] }
 0x316   : > { %1906 = vst.msk [vmem:[%s5184_s21 + $0x140] sm:$0xff] %vm276_vm0, %v1842_v11  ;;  %1908 = vst.msk [vmem:[%s5184_s21 + $0x150] sm:$0xff] %vm276_vm0, %v1844_v56  ;;  %v1996_v3 = vadd.f32 %v1995_v13, %v1994_v40  ;;  %v1819_v15 = vmul.f32 %v3999_v18, %v5200_v21  ;;  %v1999_v36 = vsel %vm276_vm0, %v1936_v37, 0.0  ;;  %v2123_v8 = vsel %vm276_vm0, %v1930_v58, -inf  ;;  %v1944_v11 = vld [vmem:[%s5184_s21 + $0x70] sm:$0xff]  ;;  %v1950_v58 = vld [vmem:[%s5184_s21 + $0xa0] sm:$0xff] }
 0x317   : > { %1910 = vst.msk [vmem:[%s5184_s21 + $0x160] sm:$0xff] %vm276_vm0, %v1846_v1  ;;  %1912 = vst.msk [vmem:[%s5184_s21 + $0x170] sm:$0xff] %vm276_vm0, %v1848_v32  ;;  %v2124_v56 = vsel %vm276_vm0, %v1932_v59, -inf  ;;  %v2125_v21 = vsel %vm276_vm0, %v1934_v33, -inf  ;;  %v2127_v52 = vsel %vm276_vm0, %v1936_v37, -inf  ;;  %v1946_v1 = vld [vmem:[%s5184_s21 + $0x80] sm:$0xff] }
 0x318   : > { %1914 = vst.msk [vmem:[%s5184_s21 + $0x180] sm:$0xff] %vm276_vm0, %v1850_v62  ;;  %1916 = vst.msk [vmem:[%s5184_s21 + $0x190] sm:$0xff] %vm276_vm0, %v1852_v25  ;;  %v1998_v24 = vadd.f32 %v1997_v44, %v1996_v3  ;;  %v2001_v16 = vsel %vm276_vm0, %v1938_v7, 0.0  ;;  %v2126_v32 = vmax.f32 %v2123_v8, %v2125_v21  ;;  %v1948_v28 = vld [vmem:[%s5184_s21 + $0x90] sm:$0xff]  ;;  %v2003_v9 = vsel %vm276_vm0, %v1940_v19, 0.0 }
 0x319   : > { %1918 = vst.msk [vmem:[%s5184_s21 + $0x1a0] sm:$0xff] %vm276_vm0, %v1854_v26  ;;  %1920 = vst.msk [vmem:[%s5184_s21 + $0x1b0] sm:$0xff] %vm276_vm0, %v1856_v35  ;;  %v1952_v25 = vld [vmem:[%s5184_s21 + $0xb0] sm:$0xff]  ;;  %v2005_v22 = vsel %vm276_vm0, %v1942_v54, 0.0  ;;  %v2007_v59 = vsel %vm276_vm0, %v1944_v11, 0.0  ;;  %v2128_v26 = vmax.f32 %v2124_v56, %v2127_v52  ;;  %v2129_v34 = vsel %vm276_vm0, %v1938_v7, -inf }
 0x31a   : > { %1922 = vst.msk [vmem:[%s5184_s21 + $0x1c0] sm:$0xff] %vm276_vm0, %v1858_v46  ;;  %1924 = vst.msk [vmem:[%s5184_s21 + $0x1d0] sm:$0xff] %vm276_vm0, %v1860_v12  ;;  %v2000_v41 = vadd.f32 %v1999_v36, %v1998_v24  ;;  %v1954_v35 = vld [vmem:[%s5184_s21 + $0xc0] sm:$0xff]  ;;  %v1956_v14 = vld [vmem:[%s5184_s21 + $0xd0] sm:$0xff]  ;;  %v2009_v6 = vsel %vm276_vm0, %v1946_v1, 0.0  ;;  %v2130_v12 = vmax.f32 %v2126_v32, %v2129_v34  ;;  %v2131_v27 = vsel %vm276_vm0, %v1940_v19, -inf }
 0x31b   : > { %1926 = vst.msk [vmem:[%s5184_s21 + $0x1e0] sm:$0xff] %vm276_vm0, %v1862_v47  ;;  %1928 = vst.msk [vmem:[%s5184_s21 + $0x1f0] sm:$0xff] %vm276_vm0, %v1864_v10  ;;  %v1958_v47 = vld [vmem:[%s5184_s21 + $0xe0] sm:$0xff]  ;;  %v2011_v33 = vsel %vm276_vm0, %v1948_v28, 0.0  ;;  %v2013_v2 = vsel %vm276_vm0, %v1950_v58, 0.0  ;;  %v2132_v10 = vmax.f32 %v2128_v26, %v2131_v27  ;;  %v2133_v40 = vsel %vm276_vm0, %v1942_v54, -inf }
 0x31c   : > { %1883 = vst.msk [vmem:[%s5184_s21 + $0x88] sm:$0xff] %vm276_vm0, %v1819_v15  ;;  %v2002_v62 = vadd.f32 %v2001_v16, %v2000_v41  ;;  %v2015_v37 = vsel %vm276_vm0, %v1952_v25, 0.0  ;;  %v2134_v3 = vmax.f32 %v2130_v12, %v2133_v40  ;;  %v2135_v44 = vsel %vm276_vm0, %v1944_v11, -inf  ;;  %v5457_v19 = vld [vmem:[%s5184_s21 + $0xf0] sm:$0xff]  ;;  %v5460_v36 = vld [vmem:[%s5184_s21 + $0x100] sm:$0xff] }
 0x31d   : > { %v5450_v18 = vsel %vm276_vm0, %v1954_v35, 0.0  ;;  %v5453_v15 = vsel %vm276_vm0, %v1956_v14, 0.0  ;;  %v2136_v7 = vmax.f32 %v2132_v10, %v2135_v44  ;;  %v2137_v24 = vsel %vm276_vm0, %v1946_v1, -inf  ;;  %v5463_v8 = vld [vmem:[%s5184_s21 + $0x110] sm:$0xff]  ;;  %v5470_v21 = vld [vmem:[%s5184_s21 + $0x120] sm:$0xff] }
 0x31e   : > { %v2004_v46 = vadd.f32 %v2003_v9, %v2002_v62  ;;  %v5466_v11 = vsel %vm276_vm0, %v1958_v47, 0.0  ;;  %v2138_v41 = vmax.f32 %v2134_v3, %v2137_v24  ;;  %v2139_v56 = vsel %vm276_vm0, %v1948_v28, -inf  ;;  %v5473_v52 = vld [vmem:[%s5184_s21 + $0x130] sm:$0xff]  ;;  %v5479_v9 = vld [vmem:[%s5184_s21 + $0x140] sm:$0xff] }
 0x31f   : > { %v2140_v1 = vmax.f32 %v2136_v7, %v2139_v56  ;;  %v2141_v16 = vsel %vm276_vm0, %v1950_v58, -inf  ;;  %v2143_v32 = vsel %vm276_vm0, %v1952_v25, -inf  ;;  %v2145_v62 = vsel %vm276_vm0, %v1954_v35, -inf  ;;  %v5490_v12 = vld [vmem:[%s5184_s21 + $0x170] sm:$0xff]  ;;  %v5493_v27 = vld [vmem:[%s5184_s21 + $0x180] sm:$0xff] }
 0x320   : > { %v2006_v13 = vadd.f32 %v2005_v22, %v2004_v46  ;;  %v5482_v22 = vld [vmem:[%s5184_s21 + $0x150] sm:$0xff]  ;;  %v2142_v34 = vmax.f32 %v2138_v41, %v2141_v16  ;;  %v2147_v28 = vsel %vm276_vm0, %v1956_v14, -inf  ;;  %v2149_v46 = vsel %vm276_vm0, %v1958_v47, -inf }
 0x321   : > { %v2144_v58 = vmax.f32 %v2140_v1, %v2143_v32  ;;  %v2151_v25 = vsel %vm276_vm0, %v5457_v19, -inf  ;;  %v2153_v35 = vsel %vm276_vm0, %v5460_v36, -inf  ;;  %v2157_v47 = vsel %vm276_vm0, %v5470_v21, -inf  ;;  %v4000_v1 = vld [vmem:[%s4192_s26 + $0x98] sm:$0xff]  ;;  %v4001_v32 = vld [vmem:[%s4192_s26 + $0xa8] sm:$0xff] }
 0x322   : > { %v2008_v54 = vadd.f32 %v2007_v59, %v2006_v13  ;;  %v5485_v59 = vld [vmem:[%s5184_s21 + $0x160] sm:$0xff]  ;;  %v2146_v14 = vmax.f32 %v2142_v34, %v2145_v62  ;;  %v2159_v40 = vsel %vm276_vm0, %v5473_v52, -inf  ;;  %v2161_v3 = vsel %vm276_vm0, %v5479_v9, -inf }
 0x323   : > { %v2148_v13 = vmax.f32 %v2144_v58, %v2147_v28  ;;  %v2163_v44 = vsel %vm276_vm0, %v5482_v22, -inf  ;;  %v5511_v7 = vsel %vm276_vm0, %v5485_v59, -inf  ;;  %v5519_v41 = vsel %vm276_vm0, %v5493_v27, -inf }
 0x324   : > { %v2010_v26 = vadd.f32 %v2009_v6, %v2008_v54  ;;  %v2155_v6 = vsel %vm276_vm0, %v5463_v8, -inf  ;;  %v2150_v24 = vmax.f32 %v2146_v14, %v2149_v46  ;;  %v5515_v54 = vsel %vm276_vm0, %v5490_v12, -inf  ;;  %v4003_v46 = vld [vmem:[%s4192_s26 + $0xc8] sm:$0xff] }
 0x325   : > { %v2152_v56 = vmax.f32 %v2148_v13, %v2151_v25  ;;  %v1821_v16 = vmul.f32 %v4000_v1, %v5203_v61  ;;  %v1823_v62 = vmul.f32 %v4001_v32, %v5206_v55  ;;  %v1827_v58 = vmul.f32 %v4003_v46, %v5218_v42  ;;  %v4004_v25 = vld [vmem:[%s4192_s26 + $0xd8] sm:$0xff]  ;;  %v4005_v14 = vld [vmem:[%s4192_s26 + $0xe8] sm:$0xff]  ;;  %v5574_v32 = vld [vmem:[%s5184_s21 + $0x190] sm:$0xff] }
 0x326   : > { %v2012_v10 = vadd.f32 %v2011_v33, %v2010_v26  ;;  %v2154_v28 = vmax.f32 %v2150_v24, %v2153_v35  ;;  %v1829_v61 = vmul.f32 %v4004_v25, %v5221_v0  ;;  %v1831_v55 = vmul.f32 %v4005_v14, %v5224_v29  ;;  %v4006_v13 = vld [vmem:[%s4192_s26 + $0xf8] sm:$0xff] }
 0x327   : > { %1885 = vst.msk [vmem:[%s5184_s21 + $0x98] sm:$0xff] %vm276_vm0, %v1821_v16  ;;  %1887 = vst.msk [vmem:[%s5184_s21 + $0xa8] sm:$0xff] %vm276_vm0, %v1823_v62  ;;  %v4008_v29 = vld [vmem:[%s4192_s26 + $0x118] sm:$0xff] }
 0x328   : > { %v2014_v33 = vadd.f32 %v2013_v2, %v2012_v10  ;;  %v4002_v2 = vld [vmem:[%s4192_s26 + $0xb8] sm:$0xff]  ;;  %v2156_v10 = vmax.f32 %v2152_v56, %v2155_v6  ;;  %v2158_v0 = vmax.f32 %v2154_v28, %v2157_v47  ;;  %v4009_v6 = vld [vmem:[%s4192_s26 + $0x128] sm:$0xff]  ;;  %1891 = vst.msk [vmem:[%s5184_s21 + $0xc8] sm:$0xff] %vm276_vm0, %v1827_v58  ;;  %1893 = vst.msk [vmem:[%s5184_s21 + $0xd8] sm:$0xff] %vm276_vm0, %v1829_v61 }
 0x329   : > { %v1825_v26 = vmul.f32 %v4002_v2, %v5209_v50  ;;  %v1833_v50 = vmul.f32 %v4006_v13, %v5227_v49  ;;  %v1837_v49 = vmul.f32 %v4008_v29, %v5250_v53  ;;  %v4010_v24 = vld [vmem:[%s4192_s26 + $0x138] sm:$0xff]  ;;  %v4011_v47 = vld [vmem:[%s4192_s26 + $0x148] sm:$0xff]  ;;  %1895 = vst.msk [vmem:[%s5184_s21 + $0xe8] sm:$0xff] %vm276_vm0, %v1831_v55  ;;  %v5608_v61 = vld [vmem:[%s5184_s21 + $0x1b0] sm:$0xff] }
 0x32a   : > { %v2016_v34 = vadd.f32 %v2015_v37, %v2014_v33  ;;  %v4007_v37 = vld [vmem:[%s4192_s26 + $0x108] sm:$0xff]  ;;  %v2160_v33 = vmax.f32 %v2156_v10, %v2159_v40  ;;  %v1843_v56 = vmul.f32 %v4011_v47, %v5267_v60  ;;  %v4012_v53 = vld [vmem:[%s4192_s26 + $0x158] sm:$0xff]  ;;  %v5625_v13 = vld [vmem:[%s5184_s21 + $0x1c0] sm:$0xff] }
 0x32b   : > { %v1835_v35 = vmul.f32 %v4007_v37, %v5247_v20  ;;  %1889 = vst.msk [vmem:[%s5184_s21 + $0xb8] sm:$0xff] %vm276_vm0, %v1825_v26  ;;  %v1839_v20 = vmul.f32 %v4009_v6, %v5253_v17  ;;  %v1845_v1 = vmul.f32 %v4012_v53, %v5270_v30  ;;  %1897 = vst.msk [vmem:[%s5184_s21 + $0xf8] sm:$0xff] %vm276_vm0, %v1833_v50  ;;  %v4013_v40 = vld [vmem:[%s4192_s26 + $0x168] sm:$0xff]  ;;  %v4014_v16 = vld [vmem:[%s4192_s26 + $0x178] sm:$0xff]  ;;  %v2177_v47 = vsel %vm276_vm0, %v5625_v13, -inf }
 0x32c   : > { %v2018_v42 = vadd.f32 %v5450_v18, %v2016_v34  ;;  %v1841_v18 = vmul.f32 %v4010_v24, %v5256_v5  ;;  %v2162_v5 = vmax.f32 %v2158_v0, %v2161_v3  ;;  %v1847_v60 = vmul.f32 %v4013_v40, %v5273_v45  ;;  %1901 = vst.msk [vmem:[%s5184_s21 + $0x118] sm:$0xff] %vm276_vm0, %v1837_v49  ;;  %v4015_v3 = vld [vmem:[%s4192_s26 + $0x188] sm:$0xff]  ;;  %v4016_v2 = vld [vmem:[%s4192_s26 + $0x198] sm:$0xff]  ;;  %v5595_v34 = vld [vmem:[%s5184_s21 + $0x1a0] sm:$0xff] }
 0x32d   : > { %1899 = vst.msk [vmem:[%s5184_s21 + $0x108] sm:$0xff] %vm276_vm0, %v1835_v35  ;;  %v1849_v30 = vmul.f32 %v4014_v16, %v5276_v39  ;;  %1903 = vst.msk [vmem:[%s5184_s21 + $0x128] sm:$0xff] %vm276_vm0, %v1839_v20  ;;  %v1851_v62 = vmul.f32 %v4015_v3, %v5303_v31  ;;  %v1853_v45 = vmul.f32 %v4016_v2, %v5306_v48  ;;  %v4017_v26 = vld [vmem:[%s4192_s26 + $0x1a8] sm:$0xff]  ;;  %v5592_v31 = vld [vmem:[%s5184_s21 + $0x18] sm:$0xff]  ;;  %v2023_v35 = vsel %vm276_vm0, %v5457_v19, 0.0 }
 0x32e   : > { %v2020_v17 = vadd.f32 %v5453_v15, %v2018_v42  ;;  %v2164_v15 = vmax.f32 %v2160_v33, %v2163_v44  ;;  %v1855_v39 = vmul.f32 %v4017_v26, %v5309_v38  ;;  %1905 = vst.msk [vmem:[%s5184_s21 + $0x138] sm:$0xff] %vm276_vm0, %v1841_v18  ;;  %1907 = vst.msk [vmem:[%s5184_s21 + $0x148] sm:$0xff] %vm276_vm0, %v1843_v56  ;;  %v5589_v44 = vld [vmem:[%s5184_s21 + $0x8] sm:$0xff]  ;;  %v4018_v28 = vld [vmem:[%s4192_s26 + $0x1b8] sm:$0xff]  ;;  %v2058_v50 = vsel %vm276_vm0, %v5592_v31, 0.0 }
 0x32f   : > { %1909 = vst.msk [vmem:[%s5184_s21 + $0x158] sm:$0xff] %vm276_vm0, %v1845_v1  ;;  %v2166_v38 = vmax.f32 %v2162_v5, %v5511_v7  ;;  %v1857_v46 = vmul.f32 %v4018_v28, %v5312_v43  ;;  %v4019_v58 = vld [vmem:[%s4192_s26 + $0x1c8] sm:$0xff]  ;;  %1911 = vst.msk [vmem:[%s5184_s21 + $0x168] sm:$0xff] %vm276_vm0, %v1847_v60  ;;  %v4020_v7 = vld [vmem:[%s4192_s26 + $0x1d8] sm:$0xff]  ;;  %v2173_v42 = vsel %vm276_vm0, %v5595_v34, -inf  ;;  %v2175_v19 = vsel %vm276_vm0, %v5608_v61, -inf }
 0x330   : > { %v2022_v48 = vadd.f32 %v5466_v11, %v2020_v17  ;;  %v1859_v25 = vmul.f32 %v4019_v58, %v5323_v23  ;;  %1913 = vst.msk [vmem:[%s5184_s21 + $0x178] sm:$0xff] %vm276_vm0, %v1849_v30  ;;  %v2168_v11 = vmax.f32 %v2164_v15, %v5515_v54  ;;  %v1861_v10 = vmul.f32 %v4020_v7, %v5326_v63  ;;  %v4021_v43 = vld [vmem:[%s4192_s26 + $0x1e8] sm:$0xff]  ;;  %v4022_v55 = vld [vmem:[%s4192_s26 + $0x1f8] sm:$0xff]  ;;  %v5639_v37 = vld [vmem:[%s5184_s21 + $0x1d0] sm:$0xff]  ;;  %s4129_s26 = smov 1  }
 0x331   : > { %v1863_v14 = vmul.f32 %v4021_v43, %v5329_v4  ;;  %v1865_v23 = vmul.f32 %v4022_v55, %v5332_v51  ;;  %1915 = vst.msk [vmem:[%s5184_s21 + $0x188] sm:$0xff] %vm276_vm0, %v1851_v62  ;;  %1917 = vst.msk [vmem:[%s5184_s21 + $0x198] sm:$0xff] %vm276_vm0, %v1853_v45  ;;  %v1935_v54 = vld [vmem:[%s5184_s21 + $0x28] sm:$0xff]  ;;  %v2170_v63 = vmax.f32 %v2166_v38, %v5519_v41  ;;  %v2171_v4 = vsel %vm276_vm0, %v5574_v32, -inf  ;;  %v1937_v0 = vld [vmem:[%s5184_s21 + $0x38] sm:$0xff] }
 0x332   : > { %1919 = vst.msk [vmem:[%s5184_s21 + $0x1a8] sm:$0xff] %vm276_vm0, %v1855_v39  ;;  %1921 = vst.msk [vmem:[%s5184_s21 + $0x1b8] sm:$0xff] %vm276_vm0, %v1857_v46  ;;  %v2057_v51 = vsel %vm276_vm0, %v5589_v44, 0.0  ;;  %v2172_v41 = vmax.f32 %v2168_v11, %v2171_v4  ;;  %v5653_v49 = vld [vmem:[%s5184_s21 + $0x1e0] sm:$0xff]  ;;  %v2024_v6 = vadd.f32 %v2023_v35, %v2022_v48  ;;  %v2060_v33 = vsel %vm276_vm0, %v1935_v54, 0.0  ;;  %v5659_v24 = vld [vmem:[%s5184_s21 + $0x1f0] sm:$0xff] }
 0x333   : > { %1923 = vst.msk [vmem:[%s5184_s21 + $0x1c8] sm:$0xff] %vm276_vm0, %v1859_v25  ;;  %1925 = vst.msk [vmem:[%s5184_s21 + $0x1d8] sm:$0xff] %vm276_vm0, %v1861_v10  ;;  %v2059_v29 = vadd.f32 %v2058_v50, %v2057_v51  ;;  %v2174_v20 = vmax.f32 %v2170_v63, %v2173_v42  ;;  %v1939_v56 = vld [vmem:[%s5184_s21 + $0x48] sm:$0xff]  ;;  %v2179_v17 = vsel %vm276_vm0, %v5639_v37, -inf  ;;  %v2062_v5 = vsel %vm276_vm0, %v1937_v0, 0.0  ;;  %v1941_v30 = vld [vmem:[%s5184_s21 + $0x58] sm:$0xff] }
 0x334   : > { %1927 = vst.msk [vmem:[%s5184_s21 + $0x1e8] sm:$0xff] %vm276_vm0, %v1863_v14  ;;  %1929 = vst.msk [vmem:[%s5184_s21 + $0x1f8] sm:$0xff] %vm276_vm0, %v1865_v23  ;;  %v2176_v18 = vmax.f32 %v2172_v41, %v2175_v19  ;;  %v2025_v40 = vsel %vm276_vm0, %v5460_v36, 0.0  ;;  %v2181_v16 = vsel %vm276_vm0, %v5653_v49, -inf  ;;  %v2183_v2 = vsel %vm276_vm0, %v5659_v24, -inf  ;;  %v1943_v39 = vld [vmem:[%s5184_s21 + $0x68] sm:$0xff] }
 0x335   : > { %v2061_v53 = vadd.f32 %v2060_v33, %v2059_v29  ;;  %v2178_v1 = vmax.f32 %v2174_v20, %v2177_v47  ;;  %v2026_v3 = vadd.f32 %v2025_v40, %v2024_v6  ;;  %v2064_v45 = vsel %vm276_vm0, %v1939_v56, 0.0  ;;  %v1945_v46 = vld [vmem:[%s5184_s21 + $0x78] sm:$0xff]  ;;  %v1947_v10 = vld [vmem:[%s5184_s21 + $0x88] sm:$0xff] }
 0x336   : > { %v2180_v60 = vmax.f32 %v2176_v18, %v2179_v17  ;;  %v2066_v38 = vsel %vm276_vm0, %v1941_v30, 0.0  ;;  %v2027_v36 = vsel %vm276_vm0, %v5463_v8, 0.0  ;;  %v2068_v11 = vsel %vm276_vm0, %v1943_v39, 0.0  ;;  %v1949_v51 = vld [vmem:[%s5184_s21 + $0x98] sm:$0xff]  ;;  %v1951_v29 = vld [vmem:[%s5184_s21 + $0xa8] sm:$0xff] }
 0x337   : > { %v2063_v15 = vadd.f32 %v2062_v5, %v2061_v53  ;;  %v2182_v62 = vmax.f32 %v2178_v1, %v2181_v16  ;;  %v2028_v25 = vadd.f32 %v2027_v36, %v2026_v3  ;;  %v2186_v7 = vsel %vm276_vm0, %v5589_v44, -inf  ;;  %v1953_v33 = vld [vmem:[%s5184_s21 + $0xb8] sm:$0xff]  ;;  %v1955_v5 = vld [vmem:[%s5184_s21 + $0xc8] sm:$0xff] }
 0x338   : > { %v2184_v26 = vmax.f32 %v2180_v60, %v2183_v2  ;;  %v2187_v14 = vsel %vm276_vm0, %v5592_v31, -inf  ;;  %v2188_v8 = vsel %vm276_vm0, %v1935_v54, -inf  ;;  %v2190_v55 = vsel %vm276_vm0, %v1937_v0, -inf  ;;  %v1957_v40 = vld [vmem:[%s5184_s21 + $0xd8] sm:$0xff] }
 0x339   : > { %v2065_v48 = vadd.f32 %v2064_v45, %v2063_v15  ;;  %v2070_v23 = vsel %vm276_vm0, %v1945_v46, 0.0  ;;  %v2189_v63 = vmax.f32 %v2186_v7, %v2188_v8  ;;  %v2191_v4 = vmax.f32 %v2187_v14, %v2190_v55  ;;  %v1959_v45 = vld [vmem:[%s5184_s21 + $0xe8] sm:$0xff] }
 0x33a   : > { %v2185_v28 = vmax.f32 %v2182_v62, %v2184_v26  ;;  %v2192_v50 = vsel %vm276_vm0, %v1939_v56, -inf  ;;  %v2194_v35 = vsel %vm276_vm0, %v1941_v30, -inf  ;;  %v2029_v41 = vsel %vm276_vm0, %v5470_v21, 0.0  ;;  %v1961_v26 = vld [vmem:[%s5184_s21 + $0xf8] sm:$0xff] }
 0x33b   : > { %v2067_v58 = vadd.f32 %v2066_v38, %v2065_v48  ;;  %v2072_v31 = vsel %vm276_vm0, %v1947_v10, 0.0  ;;  %v2193_v54 = vmax.f32 %v2189_v63, %v2192_v50  ;;  %v2195_v42 = vmax.f32 %v2191_v4, %v2194_v35  ;;  %v1969_v63 = vld [vmem:[%s5184_s21 + $0x138] sm:$0xff] }
 0x33c   : > { %2270 = vrot.lane.b32.xlu1 %v2185_v28, %s4128_s16  ;;  %v2030_v0 = vadd.f32 %v2029_v41, %v2028_v25  ;;  %v2196_v20 = vsel %vm276_vm0, %v1943_v39, -inf  ;;  %v2198_v19 = vsel %vm276_vm0, %v1945_v46, -inf  ;;  %v2074_v18 = vsel %vm276_vm0, %v1949_v51, 0.0  ;;  %v1965_v25 = vld [vmem:[%s5184_s21 + $0x118] sm:$0xff] }
 0x33d   : > { %v2069_v43 = vadd.f32 %v2068_v11, %v2067_v58  ;;  %v2197_v47 = vmax.f32 %v2193_v54, %v2196_v20  ;;  %v2199_v21 = vmax.f32 %v2195_v42, %v2198_v19  ;;  %v2200_v53 = vsel %vm276_vm0, %v1947_v10, -inf  ;;  %v1963_v58 = vld [vmem:[%s5184_s21 + $0x108] sm:$0xff]  ;;  %v5733_v42 = vld [vmem:[%s5184_s21 + $0x158] sm:$0xff] }
 0x33e   : > { %v2202_v1 = vsel %vm276_vm0, %v1949_v51, -inf  ;;  %v2031_v17 = vsel %vm276_vm0, %v5473_v52, 0.0  ;;  %v2076_v60 = vsel %vm276_vm0, %v1951_v29, 0.0  ;;  %v2204_v62 = vsel %vm276_vm0, %v1951_v29, -inf  ;;  %v1971_v54 = vld [vmem:[%s5184_s21 + $0x148] sm:$0xff] }
 0x33f   : > { %v2071_v44 = vadd.f32 %v2070_v23, %v2069_v43  ;;  %v2201_v16 = vmax.f32 %v2197_v47, %v2200_v53  ;;  %v2203_v30 = vmax.f32 %v2199_v21, %v2202_v1  ;;  %v2032_v15 = vadd.f32 %v2031_v17, %v2030_v0  ;;  %v1967_v23 = vld [vmem:[%s5184_s21 + $0x128] sm:$0xff]  ;;  %v5742_v47 = vld [vmem:[%s5184_s21 + $0x178] sm:$0xff] }
 0x340   : > { %v2206_v2 = vsel %vm276_vm0, %v1953_v33, -inf  ;;  %v2078_v39 = vsel %vm276_vm0, %v1953_v33, 0.0  ;;  %v2208_v36 = vsel %vm276_vm0, %v1955_v5, -inf  ;;  %v2210_v28 = vsel %vm276_vm0, %v1957_v40, -inf  ;;  %v5737_v20 = vld [vmem:[%s5184_s21 + $0x168] sm:$0xff] }
 0x341   : > { %v2073_v6 = vadd.f32 %v2072_v31, %v2071_v44  ;;  %v2205_v52 = vmax.f32 %v2201_v16, %v2204_v62  ;;  %v2207_v48 = vmax.f32 %v2203_v30, %v2206_v2  ;;  %v2033_v46 = vsel %vm276_vm0, %v5479_v9, 0.0  ;;  %v5753_v16 = vld [vmem:[%s5184_s21 + $0x198] sm:$0xff] }
 0x342   : > { %v2080_v11 = vsel %vm276_vm0, %v1955_v5, 0.0  ;;  %v2034_v43 = vadd.f32 %v2033_v46, %v2032_v15  ;;  %v2212_v8 = vsel %vm276_vm0, %v1959_v45, -inf  ;;  %v2214_v55 = vsel %vm276_vm0, %v1961_v26, -inf }
 0x343   : > { %v2075_v56 = vadd.f32 %v2074_v18, %v2073_v6  ;;  %v2209_v7 = vmax.f32 %v2205_v52, %v2208_v36  ;;  %v2211_v10 = vmax.f32 %v2207_v48, %v2210_v28  ;;  %v2082_v4 = vsel %vm276_vm0, %v1957_v40, 0.0  ;;  %v5765_v52 = vld [vmem:[%s5184_s21 + $0x1b8] sm:$0xff] }
 0x344   : > { %v2035_v44 = vsel %vm276_vm0, %v5482_v22, 0.0  ;;  %v2216_v35 = vsel %vm276_vm0, %v1963_v58, -inf  ;;  %v2218_v41 = vsel %vm276_vm0, %v1965_v25, -inf  ;;  %v2037_v31 = vsel %vm276_vm0, %v5485_v59, 0.0 }
 0x345   : > { %v2077_v3 = vadd.f32 %v2076_v60, %v2075_v56  ;;  %v2213_v9 = vmax.f32 %v2209_v7, %v2212_v8  ;;  %v2215_v51 = vmax.f32 %v2211_v10, %v2214_v55  ;;  %v2084_v0 = vsel %vm276_vm0, %v1959_v45, 0.0  ;;  %v5750_v60 = vld [vmem:[%s5184_s21 + $0x188] sm:$0xff]  ;;  %v1989_v7 = vld [vmem:[%s5184_s21 + $0x1d8] sm:$0xff] }
 0x346   : > { %v2220_v19 = vsel %vm276_vm0, %v1967_v23, -inf  ;;  %v2222_v33 = vsel %vm276_vm0, %v1969_v63, -inf  ;;  %v2036_v18 = vadd.f32 %v2035_v44, %v2034_v43  ;;  %v2086_v59 = vsel %vm276_vm0, %v1961_v26, 0.0 }
 0x347   : > { %v2079_v38 = vadd.f32 %v2078_v39, %v2077_v3  ;;  %v2217_v29 = vmax.f32 %v2213_v9, %v2216_v35  ;;  %v2219_v6 = vmax.f32 %v2215_v51, %v2218_v41  ;;  %v2088_v21 = vsel %vm276_vm0, %v1963_v58, 0.0  ;;  %v5762_v39 = vld [vmem:[%s5184_s21 + $0x1a8] sm:$0xff]  ;;  %v1993_v51 = vld [vmem:[%s5184_s21 + $0x1f8] sm:$0xff] }
 0x348   : > { %v2224_v17 = vsel %vm276_vm0, %v1971_v54, -inf  ;;  %v2226_v5 = vsel %vm276_vm0, %v5733_v42, -inf  ;;  %v2038_v40 = vadd.f32 %v2037_v31, %v2036_v18  ;;  %v2228_v3 = vsel %vm276_vm0, %v5737_v20, -inf  ;;  %v1991_v9 = vld [vmem:[%s5184_s21 + $0x1e8] sm:$0xff] }
 0x349   : > { %v2081_v14 = vadd.f32 %v2080_v11, %v2079_v38  ;;  %v2221_v56 = vmax.f32 %v2217_v29, %v2220_v19  ;;  %v2223_v53 = vmax.f32 %v2219_v6, %v2222_v33  ;;  %v2039_v62 = vsel %vm276_vm0, %v5490_v12, 0.0 }
 0x34a   : > { %v2230_v45 = vsel %vm276_vm0, %v5742_v47, -inf  ;;  %v2040_v26 = vadd.f32 %v2039_v62, %v2038_v40  ;;  %v2090_v48 = vsel %vm276_vm0, %v1965_v25, 0.0  ;;  %v2041_v28 = vsel %vm276_vm0, %v5493_v27, 0.0  ;;  %v1987_v25 = vld [vmem:[%s5184_s21 + $0x1c8] sm:$0xff] }
 0x34b   : > { %v2083_v50 = vadd.f32 %v2082_v4, %v2081_v14  ;;  %v2225_v30 = vmax.f32 %v2221_v56, %v2224_v17  ;;  %v2227_v15 = vmax.f32 %v2223_v53, %v2226_v5  ;;  %v2232_v46 = vsel %vm276_vm0, %v5750_v60, -inf }
 0x34c   : > { %v2234_v58 = vsel %vm276_vm0, %v5753_v16, -inf  ;;  %v2042_v11 = vadd.f32 %v2041_v28, %v2040_v26  ;;  %v2092_v10 = vsel %vm276_vm0, %v1967_v23, 0.0  ;;  %v2043_v14 = vsel %vm276_vm0, %v5574_v32, 0.0 }
 0x34d   : > { %v2085_v22 = vadd.f32 %v2084_v0, %v2083_v50  ;;  %v2229_v38 = vmax.f32 %v2225_v30, %v2228_v3  ;;  %v2231_v36 = vmax.f32 %v2227_v15, %v2230_v45  ;;  %v2236_v57 = vsel %vm276_vm0, %v5762_v39, -inf }
 0x34e   : > { %v2238_v55 = vsel %vm276_vm0, %v5765_v52, -inf  ;;  %v2044_v4 = vadd.f32 %v2043_v14, %v2042_v11  ;;  %v2094_v44 = vsel %vm276_vm0, %v1969_v63, 0.0  ;;  %v2045_v23 = vsel %vm276_vm0, %v5595_v34, 0.0 }
 0x34f   : > { %v2087_v1 = vadd.f32 %v2086_v59, %v2085_v22  ;;  %v2233_v43 = vmax.f32 %v2229_v38, %v2232_v46  ;;  %v2235_v27 = vmax.f32 %v2231_v36, %v2234_v58  ;;  %v2240_v32 = vsel %vm276_vm0, %v1987_v25, -inf }
 0x350   : > { %v2242_v31 = vsel %vm276_vm0, %v1989_v7, -inf  ;;  %v2046_v0 = vadd.f32 %v2045_v23, %v2044_v4  ;;  %v2096_v29 = vsel %vm276_vm0, %v1971_v54, 0.0  ;;  %v2047_v19 = vsel %vm276_vm0, %v5608_v61, 0.0 }
 0x351   : > { %v2089_v2 = vadd.f32 %v2088_v21, %v2087_v1  ;;  %v2237_v50 = vmax.f32 %v2233_v43, %v2236_v57  ;;  %v2239_v35 = vmax.f32 %v2235_v27, %v2238_v55  ;;  %v2244_v63 = vsel %vm276_vm0, %v1991_v9, -inf }
 0x352   : > { %v2246_v18 = vsel %vm276_vm0, %v1993_v51, -inf  ;;  %v2048_v59 = vadd.f32 %v2047_v19, %v2046_v0  ;;  %v2098_v34 = vsel %vm276_vm0, %v5733_v42, 0.0  ;;  %v2049_v53 = vsel %vm276_vm0, %v5625_v13, 0.0 }
 0x353   : > { %v2091_v12 = vadd.f32 %v2090_v48, %v2089_v2  ;;  %v2241_v6 = vmax.f32 %v2237_v50, %v2240_v32  ;;  %v2243_v22 = vmax.f32 %v2239_v35, %v2242_v31  ;;  %v2100_v17 = vsel %vm276_vm0, %v5737_v20, 0.0 }
 0x354   : > { %v2050_v1 = vadd.f32 %v2049_v53, %v2048_v59  ;;  %v2051_v5 = vsel %vm276_vm0, %v5639_v37, 0.0  ;;  %v2102_v42 = vsel %vm276_vm0, %v5742_v47, 0.0  ;;  %v2053_v15 = vsel %vm276_vm0, %v5653_v49, 0.0 }
 0x355   : > { %v2093_v8 = vadd.f32 %v2092_v10, %v2091_v12  ;;  %v2245_v21 = vmax.f32 %v2241_v6, %v2244_v63  ;;  %v2247_v56 = vmax.f32 %v2243_v22, %v2246_v18  ;;  %v2104_v62 = vsel %vm276_vm0, %v5750_v60, 0.0 }
 0x356   : > { %v2052_v30 = vadd.f32 %v2051_v5, %v2050_v1  ;;  %v2055_v20 = vsel %vm276_vm0, %v5659_v24, 0.0  ;;  %v2106_v45 = vsel %vm276_vm0, %v5753_v16, 0.0  ;;  %v2108_v47 = vsel %vm276_vm0, %v5762_v39, 0.0 }
 0x357   : > { %v2095_v41 = vadd.f32 %v2094_v44, %v2093_v8  ;;  %v2248_v61 = vmax.f32 %v2245_v21, %v2247_v56  ;;  %v2110_v49 = vsel %vm276_vm0, %v5765_v52, 0.0  ;;  %v2112_v36 = vsel %vm276_vm0, %v1987_v25, 0.0 }
 0x358   : > { %v2054_v3 = vadd.f32 %v2053_v15, %v2052_v30  ;;  %v2114_v28 = vsel %vm276_vm0, %v1989_v7, 0.0  ;;  %v2116_v16 = vsel %vm276_vm0, %v1991_v9, 0.0  ;;  %v2118_v58 = vsel %vm276_vm0, %v1993_v51, 0.0 }
 0x359   : > { %v2097_v33 = vadd.f32 %v2096_v29, %v2095_v41  ;;  %2272 = vrot.lane.b32.xlu1 %v2248_v61, %s4128_s16  ;;  %v2946_v25 = vstv %s5826_s22  ;;  %v3002_v43 = vstv %s5829_s23  ;;  %v3086_v8 = vstv %s5832_s24  ;;  %s5936_s22 = sld [smem:[#allocation3 + $0x42]]  ;;  %s5942_s23 = sld [smem:[#allocation3 + $0x45]] }
 0x35a   : > { %v2056_v37 = vadd.f32 %v2055_v20, %v2054_v3  ;;  %v3142_v55 = vstv %s5838_s25  ;;  %v3200_v51 = vstv %s5845_s27  ;;  %v3256_v50 = vstv %s5850_s29  ;;  %s5946_s24 = sld [smem:[#allocation3 + $0x4]]  ;;  %s5953_s25 = sld [smem:[#allocation3 + $0x5]] }
 0x35b   : > { %v2099_v54 = vadd.f32 %v2098_v34, %v2097_v33  ;;  %v3314_v32 = vstv %s5863_s7  ;;  %v3370_v22 = vstv %s5866_s8  ;;  %v3454_v59 = vstv %s5869_s9  ;;  %s5963_s27 = sld [smem:[#allocation3 + $0x6]]  ;;  %s4135_s29 = smov 123  }
 0x35c   : > { %v2121_v48 = vmul.f32 0.03125, %v2056_v37  ;;  %v3510_v56 = vstv %s5877_s10  ;;  %v2918_v5 = vstv %s5887_s11  ;;  %v2988_v37 = vstv %s5908_s14  ;;  %s5970_s7 = sld [smem:[#allocation3 + $0x7]]  ;;  %s5976_s8 = sld [smem:[#allocation3 + $0x8]] }
 0x35d   : > { %v2101_v40 = vadd.f32 %v2100_v17, %v2099_v54  ;;  %s5982_s9 = sld [smem:[#allocation3 + $0x9]]  ;;  %s5988_s10 = sld [smem:[#allocation3 + $0xa]] }
 0x35e   : > { %2259 = vrot.lane.b32.xlu0 %v2121_v48, %s4128_s16  ;;  %s5994_s11 = sld [smem:[#allocation3 + $0xb]]  ;;  %s6014_s14 = sld [smem:[#allocation3 + $0xe]] }
 0x35f   : > { %v2103_v13 = vadd.f32 %v2102_v42, %v2101_v40  ;;  %v2932_v42 = vstv %s5893_s12  ;;  %s6002_s12 = sld [smem:[#allocation3 + $0xc]] }
 0x361   : > { %v2105_v2 = vadd.f32 %v2104_v62, %v2103_v13  ;;  %v2974_v62 = vstv %s5902_s13  ;;  %s6008_s13 = sld [smem:[#allocation3 + $0xd]] }
 0x363   : > { %v2107_v26 = vadd.f32 %v2106_v45, %v2105_v2 }
 0x365   : > { %v2109_v38 = vadd.f32 %v2108_v47, %v2107_v26 }
 0x367   : > { %v2111_v60 = vadd.f32 %v2110_v49, %v2109_v38  ;;  %v3056_v38 = vstv %s5916_s17  ;;  %s6022_s17 = sld [smem:[#allocation3 + $0xf]] }
 0x369   : > { %v2113_v24 = vadd.f32 %v2112_v36, %v2111_v60  ;;  %v3070_v36 = vstv %s5922_s18  ;;  %s6029_s18 = sld [smem:[#allocation3 + $0x10]] }
 0x36b   : > { %v2115_v12 = vadd.f32 %v2114_v28, %v2113_v24 }
 0x36d   : > { %v2117_v46 = vadd.f32 %v2116_v16, %v2115_v12  ;;  %v3114_v12 = vstv %s5930_s19  ;;  %s6036_s19 = sld [smem:[#allocation3 + $0x11]] }
 0x36f   : > { %v2119_v11 = vadd.f32 %v2118_v58, %v2117_v46  ;;  %v3128_v58 = vstv %s5936_s22  ;;  %s6041_s22 = sld [smem:[#allocation3 + $0x12]] }
 0x371   : > { %v2122_v39 = vmul.f32 0.03125, %v2119_v11 }
 0x373   : > { %2261 = vrot.lane.b32.xlu1 %v2122_v39, %s4128_s16 }
 0x3ae   : > { %v2271_v52 = vpop.permute.xlu1 %2270 }
 0x3af   : > { %2277 = vst.msk [vmem:[#allocation2 + $0x1b] sm:$0xff] %vm2265_vm12, %v2271_v52  ;;  %v3170_v52 = vstv %s5942_s23  ;;  %s6048_s23 = sld [smem:[#allocation3 + $0x13]] }
 0x3b6   : > { %v5834_v7 = vld [vmem:[#allocation2 + $0x18] sm:$0xff] }
 0x3b7   : > { %v2947_v10 = vmul.f32 %v2946_v25, %v5834_v7  ;;  %v3003_v27 = vmul.f32 %v3002_v43, %v5834_v7  ;;  %v5842_v14 = vld [vmem:[#allocation2 + $0x1a] sm:$0xff]  ;;  %v2919_v28 = vmul.f32 %v2918_v5, %v5834_v7  ;;  %v2933_v46 = vmul.f32 %v2932_v42, %v5834_v7 }
 0x3b8   : > { %v3087_v57 = vmul.f32 %v3086_v8, %v5842_v14  ;;  %v3143_v4 = vmul.f32 %v3142_v55, %v5842_v14  ;;  %v5854_v9 = vld [vmem:[#allocation2 + $0x1b] sm:$0xff]  ;;  %v2975_v39 = vmul.f32 %v2974_v62, %v5834_v7 }
 0x3b9   : > { %2951 = vrot.lane.b32.xlu1 %v2947_v10, %s4129_s26  ;;  %v3201_v44 = vmul.f32 %v3200_v51, %v5854_v9  ;;  %v3257_v35 = vmul.f32 %v3256_v50, %v5854_v9 }
 0x3bd   : > { %3007 = vrot.lane.b32.xlu1 %v3003_v27, %s4130_s28  ;;  %v2989_v27 = vmul.f32 %v2988_v37, %v5834_v7 }
 0x3c1   : > { %3091 = vrot.lane.b32.xlu1 %v3087_v57, %s4128_s16 }
 0x3c5   : > { %3147 = vrot.lane.b32.xlu1 %v3143_v4, %s4131_s30 }
 0x3c9   : > { %3205 = vrot.lane.b32.xlu1 %v3201_v44, %s4132_s5  ;;  %v2334_v44 = vstv %s5963_s27  ;;  %s6067_s27 = sld [smem:[#allocation3 + $0x16]] }
 0x3cb   : > { %v2273_v23 = vpop.permute.xlu1 %2272 }
 0x3cc   : > { %2278 = vst.msk [vmem:[#allocation2 + $0x23] sm:$0xff] %vm2265_vm12, %v2273_v23  ;;  %v2350_v23 = vstv %s5970_s7  ;;  %s6076_s7 = sld [smem:[#allocation3 + $0x17]] }
 0x3cd   : > { %3261 = vrot.lane.b32.xlu1 %v3257_v35, %s4133_s6 }
 0x3d0   : > { %v2260_v41 = vpop.permute.xlu0 %2259 }
 0x3d1   : > { %2266 = vst.msk [vmem:[#allocation2 + $0x3] sm:$0xff] %vm2265_vm12, %v2260_v41  ;;  %v3115_v41 = vmul.f32 %v3114_v12, %v5842_v14 }
 0x3d3   : > { %v2916_v31 = vld [vmem:[#allocation2 + $0x20] sm:$0xff] }
 0x3d4   : > { %v2948_v0 = vmul.f32 %v2946_v25, %v2916_v31  ;;  %v5872_v29 = vld [vmem:[#allocation2 + $0x1c] sm:$0xff]  ;;  %v3004_v19 = vmul.f32 %v3002_v43, %v2916_v31  ;;  %v2920_v40 = vmul.f32 %v2918_v5, %v2916_v31  ;;  %v5910_v15 = vld [vmem:[#allocation2 + $0x24] sm:$0xff]  ;;  %v2934_v13 = vmul.f32 %v2932_v42, %v2916_v31 }
 0x3d5   : > { %v3315_v6 = vmul.f32 %v3314_v32, %v5872_v29  ;;  %v5880_v33 = vld [vmem:[#allocation2 + $0x22] sm:$0xff]  ;;  %v3371_v63 = vmul.f32 %v3370_v22, %v5872_v29  ;;  %v3316_v3 = vmul.f32 %v3314_v32, %v5910_v15  ;;  %v2976_v20 = vmul.f32 %v2974_v62, %v2916_v31 }
 0x3d6   : > { %2953 = vrot.lane.b32.xlu0 %v2948_v0, %s4129_s26  ;;  %v3451_v18 = vld [vmem:[#allocation2 + $0x1e] sm:$0xff]  ;;  %v3088_v34 = vmul.f32 %v3086_v8, %v5880_v33  ;;  %v3144_v53 = vmul.f32 %v3142_v55, %v5880_v33  ;;  %v3372_v2 = vmul.f32 %v3370_v22, %v5910_v15  ;;  %v5924_v45 = vld [vmem:[#allocation2 + $0x26] sm:$0xff]  ;;  %v2990_v26 = vmul.f32 %v2988_v37, %v2916_v31 }
 0x3d7   : > { %3319 = vrot.lane.b32.xlu1 %v3315_v6, %s4129_s26  ;;  %v3455_v21 = vmul.f32 %v3454_v59, %v3451_v18  ;;  %v5895_v1 = vld [vmem:[#allocation2 + $0x23] sm:$0xff]  ;;  %v3511_v17 = vmul.f32 %v3510_v56, %v3451_v18  ;;  %v3456_v47 = vmul.f32 %v3454_v59, %v5924_v45  ;;  %v3512_v60 = vmul.f32 %v3510_v56, %v5924_v45  ;;  %v3015_v8 = vld [vmem:[#allocation2 + $0x19] sm:$0xff] }
 0x3d8   : > { %v3202_v61 = vmul.f32 %v3200_v51, %v5895_v1  ;;  %v3258_v30 = vmul.f32 %v3256_v50, %v5895_v1  ;;  %v3016_v48 = vld [vmem:[#allocation2 + $0x21] sm:$0xff]  ;;  %v3116_v16 = vmul.f32 %v3114_v12, %v5880_v33  ;;  %v3130_v11 = vmul.f32 %v3128_v58, %v5880_v33 }
 0x3d9   : > { %v3058_v49 = vmul.f32 %v3056_v38, %v3016_v48  ;;  %v3072_v24 = vmul.f32 %v3070_v36, %v3016_v48  ;;  %v3172_v25 = vmul.f32 %v3170_v52, %v5880_v33  ;;  %v2306_v43 = vstv %s5946_s24  ;;  %v5998_v33 = vld [vmem:[#allocation2] sm:$0xff]  ;;  %s6055_s24 = sld [smem:[#allocation3 + $0x14]] }
 0x3da   : > { %3009 = vrot.lane.b32.xlu0 %v3004_v19, %s4130_s28  ;;  %v2320_v55 = vstv %s5953_s25  ;;  %v3057_v4 = vmul.f32 %v3056_v38, %v3015_v8  ;;  %v3071_v7 = vmul.f32 %v3070_v36, %v3015_v8  ;;  %v2364_v31 = vstv %s5976_s8  ;;  %s6060_s25 = sld [smem:[#allocation3 + $0x15]]  ;;  %s4136_s8 = smov 122  }
 0x3db   : > { %3375 = vrot.lane.b32.xlu1 %v3371_v63, %s4130_s28  ;;  %v3129_v0 = vmul.f32 %v3128_v58, %v5842_v14  ;;  %v2378_v22 = vstv %s5982_s9  ;;  %v3171_v19 = vmul.f32 %v3170_v52, %v5842_v14  ;;  %v2392_v18 = vstv %s5988_s10  ;;  %s6085_s9 = sld [smem:[#allocation3 + $0x18]]  ;;  %s6094_s10 = sld [smem:[#allocation3 + $0x19]] }
 0x3dc   : > { %v2307_v59 = vmul.f32 %v2306_v43, %v5998_v33  ;;  %v2321_v14 = vmul.f32 %v2320_v55, %v5998_v33  ;;  %v2450_v62 = vstv %s6014_s14  ;;  %v2478_v38 = vstv %s6029_s18  ;;  %s6130_s14 = sld [smem:[#allocation3 + $0x23]] }
 0x3dd   : > { %s6153_s18 = sld [smem:[#allocation3 + $0x2b]] }
 0x3de   : > { %3093 = vrot.lane.b32.xlu0 %v3088_v34, %s4128_s16 }
 0x3df   : > { %3459 = vrot.lane.b32.xlu1 %v3455_v21, %s4128_s16  ;;  %v2406_v21 = vstv %s5994_s11  ;;  %v2534_v8 = vstv %s6055_s24  ;;  %s6103_s11 = sld [smem:[#allocation3 + $0x1a]]  ;;  %s6196_s24 = sld [smem:[#allocation3 + $0x21]] }
 0x3e2   : > { %3149 = vrot.lane.b32.xlu0 %v3144_v53, %s4131_s30  ;;  %v2420_v53 = vstv %s6002_s12  ;;  %s6112_s12 = sld [smem:[#allocation3 + $0x1b]] }
 0x3e3   : > { %3515 = vrot.lane.b32.xlu1 %v3511_v17, %s4131_s30  ;;  %v2335_v17 = vmul.f32 %v2334_v44, %v5998_v33 }
 0x3e5   : > { %v2262_v54 = vpop.permute.xlu1 %2261 }
 0x3e6   : > { %2267 = vst.msk [vmem:[#allocation2 + $0xb] sm:$0xff] %vm2265_vm12, %v2262_v54  ;;  %3207 = vrot.lane.b32.xlu0 %v3202_v61, %s4132_s5  ;;  %v2347_v61 = vld [vmem:[#allocation2 + $0x1] sm:$0xff] }
 0x3e7   : > { %2925 = vrot.lane.b32.xlu1 %v2920_v40, %s4129_s26  ;;  %v2434_v40 = vstv %s6008_s13  ;;  %v2351_v42 = vmul.f32 %v2350_v23, %v2347_v61  ;;  %v2379_v48 = vmul.f32 %v2378_v22, %v2347_v61  ;;  %v2421_v58 = vmul.f32 %v2420_v53, %v2347_v61  ;;  %s6121_s13 = sld [smem:[#allocation3 + $0x20]] }
 0x3ea   : > { %3263 = vrot.lane.b32.xlu0 %v3258_v30, %s4133_s6 }
 0x3eb   : > { %2939 = vrot.lane.b32.xlu1 %v2934_v13, %s4129_s26 }
 0x3ed   : > { %v5960_v10 = vld [vmem:[#allocation2 + $0x8] sm:$0xff] }
 0x3ee   : > { %3321 = vrot.lane.b32.xlu0 %v3316_v3, %s4129_s26  ;;  %v2308_v57 = vmul.f32 %v2306_v43, %v5960_v10  ;;  %v2322_v51 = vmul.f32 %v2320_v55, %v5960_v10  ;;  %v2336_v50 = vmul.f32 %v2334_v44, %v5960_v10  ;;  %v2348_v35 = vld [vmem:[#allocation2 + $0x9] sm:$0xff] }
 0x3ef   : > { %2981 = vrot.lane.b32.xlu1 %v2976_v20, %s4130_s28  ;;  %v2352_v32 = vmul.f32 %v2350_v23, %v2348_v35  ;;  %v2366_v6 = vmul.f32 %v2364_v31, %v2348_v35  ;;  %v2380_v63 = vmul.f32 %v2378_v22, %v2348_v35  ;;  %v2394_v34 = vmul.f32 %v2392_v18, %v2348_v35  ;;  %v2448_v3 = vld [vmem:[#allocation2 + $0xa] sm:$0xff]  ;;  %v2447_v43 = vld [vmem:[#allocation2 + $0x2] sm:$0xff] }
 0x3f0   : > { %v2408_v56 = vmul.f32 %v2406_v21, %v2348_v35  ;;  %v2422_v5 = vmul.f32 %v2420_v53, %v2348_v35  ;;  %v2436_v13 = vmul.f32 %v2434_v40, %v2348_v35  ;;  %v2365_v20 = vmul.f32 %v2364_v31, %v2347_v61  ;;  %v2548_v44 = vld [vmem:[#allocation2 + $0xb] sm:$0xff] }
 0x3f1   : > { %v2480_v36 = vmul.f32 %v2478_v38, %v2448_v3  ;;  %v2451_v55 = vmul.f32 %v2450_v62, %v2447_v43 }
 0x3f2   : > { %3377 = vrot.lane.b32.xlu0 %v3372_v2, %s4130_s28  ;;  %v2452_v2 = vmul.f32 %v2450_v62, %v2448_v3 }
 0x3f3   : > { %2995 = vrot.lane.b32.xlu1 %v2990_v26, %s4130_s28  ;;  %v2464_v26 = vstv %s6022_s17  ;;  %s6141_s17 = sld [smem:[#allocation3 + $0x27]] }
 0x3f4   : > { %v2465_v35 = vmul.f32 %v2464_v26, %v2447_v43 }
 0x3f6   : > { %3461 = vrot.lane.b32.xlu0 %v3456_v47, %s4128_s16  ;;  %v2466_v47 = vmul.f32 %v2464_v26, %v2448_v3 }
 0x3f7   : > { %3063 = vrot.lane.b32.xlu1 %v3058_v49, %s4134_s20 }
 0x3fa   : > { %3517 = vrot.lane.b32.xlu0 %v3512_v60, %s4131_s30  ;;  %v2393_v60 = vmul.f32 %v2392_v18, %v2347_v61 }
 0x3fb   : > { %3077 = vrot.lane.b32.xlu1 %v3072_v24, %s4134_s20  ;;  %v2492_v24 = vstv %s6036_s19  ;;  %s6165_s19 = sld [smem:[#allocation3 + $0x2f]] }
 0x3fc   : > { %v2494_v12 = vmul.f32 %v2492_v24, %v2448_v3  ;;  %v2493_v18 = vmul.f32 %v2492_v24, %v2447_v43 }
 0x3fe   : > { %2923 = vrot.lane.b32.xlu0 %v2919_v28, %s4129_s26  ;;  %v2407_v28 = vmul.f32 %v2406_v21, %v2347_v61  ;;  %v2592_v21 = vstv %s6085_s9  ;;  %s6242_s9 = sld [smem:[#allocation3 + $0x51]] }
 0x3ff   : > { %3121 = vrot.lane.b32.xlu1 %v3116_v16, %s4131_s30 }
 0x402   : > { %2937 = vrot.lane.b32.xlu0 %v2933_v46, %s4129_s26  ;;  %v2506_v46 = vstv %s6041_s22  ;;  %s6182_s22 = sld [smem:[#allocation3 + $0x46]] }
 0x403   : > { %3135 = vrot.lane.b32.xlu1 %v3130_v11, %s4131_s30  ;;  %v2508_v11 = vmul.f32 %v2506_v46, %v2448_v3 }
 0x406   : > { %2979 = vrot.lane.b32.xlu0 %v2975_v39, %s4130_s28  ;;  %v2520_v39 = vstv %s6048_s23  ;;  %s6194_s23 = sld [smem:[#allocation3 + $0x49]] }
 0x407   : > { %3177 = vrot.lane.b32.xlu1 %v3172_v25, %s4135_s29  ;;  %v2435_v25 = vmul.f32 %v2434_v40, %v2347_v61  ;;  %v2606_v61 = vstv %s6094_s10  ;;  %v2521_v40 = vmul.f32 %v2520_v39, %v2447_v43  ;;  %s6255_s10 = sld [smem:[#allocation3 + $0x52]] }
 0x40a   : > { %2993 = vrot.lane.b32.xlu0 %v2989_v27, %s4130_s28  ;;  %v2522_v27 = vmul.f32 %v2520_v39, %v2448_v3 }
 0x40b   : > { %2313 = vrot.lane.b32.xlu1 %v2308_v57, %s4134_s20 }
 0x40e   : > { %3061 = vrot.lane.b32.xlu0 %v3057_v4, %s4134_s20 }
 0x40f   : > { %2327 = vrot.lane.b32.xlu1 %v2322_v51, %s4134_s20  ;;  %v2536_v51 = vmul.f32 %v2534_v8, %v2448_v3  ;;  %v2620_v3 = vstv %s6103_s11  ;;  %s6293_s11 = sld [smem:[#allocation3 + $0x25]] }
 0x412   : > { %3075 = vrot.lane.b32.xlu0 %v3071_v7, %s4134_s20  ;;  %v2550_v7 = vstv %s6060_s25  ;;  %s6208_s25 = sld [smem:[#allocation3 + $0x4a]] }
 0x413   : > { %2341 = vrot.lane.b32.xlu1 %v2336_v50, %s4134_s20 }
 0x416   : > { %3119 = vrot.lane.b32.xlu0 %v3115_v41, %s4131_s30  ;;  %v2552_v41 = vmul.f32 %v2550_v7, %v2548_v44 }
 0x417   : > { %2357 = vrot.lane.b32.xlu1 %v2352_v32, %s4128_s16  ;;  %v2564_v32 = vstv %s6067_s27  ;;  %s6216_s27 = sld [smem:[#allocation3 + $0x4d]] }
 0x418   : > { %v2566_v22 = vmul.f32 %v2564_v32, %v2548_v44 }
 0x41a   : > { %3133 = vrot.lane.b32.xlu0 %v3129_v0, %s4131_s30  ;;  %v2479_v0 = vmul.f32 %v2478_v38, %v2447_v43 }
 0x41b   : > { %2371 = vrot.lane.b32.xlu1 %v2366_v6, %s4131_s30 }
 0x41e   : > { %3175 = vrot.lane.b32.xlu0 %v3171_v19, %s4135_s29  ;;  %v2578_v19 = vstv %s6076_s7  ;;  %s6228_s7 = sld [smem:[#allocation3 + $0x4e]] }
 0x41f   : > { %2385 = vrot.lane.b32.xlu1 %v2380_v63, %s4131_s30 }
 0x422   : > { %2311 = vrot.lane.b32.xlu0 %v2307_v59, %s4134_s20 }
 0x423   : > { %2399 = vrot.lane.b32.xlu1 %v2394_v34, %s4131_s30  ;;  %v2580_v34 = vmul.f32 %v2578_v19, %v2548_v44 }
 0x426   : > { %2325 = vrot.lane.b32.xlu0 %v2321_v14, %s4134_s20 }
 0x427   : > { %2413 = vrot.lane.b32.xlu1 %v2408_v56, %s4131_s30  ;;  %v2507_v56 = vmul.f32 %v2506_v46, %v2447_v43 }
 0x42a   : > { %2339 = vrot.lane.b32.xlu0 %v2335_v17, %s4134_s20  ;;  %v2594_v17 = vmul.f32 %v2592_v21, %v2548_v44 }
 0x42b   : > { %v6017_v54 = vpop.permute.xlu1 %2951  ;;  %2427 = vrot.lane.b32.xlu1 %v2422_v5, %s4135_s29 }
 0x42e   : > { %2355 = vrot.lane.b32.xlu0 %v2351_v42, %s4128_s16 }
 0x42f   : > { %v6025_v30 = vpop.permute.xlu1 %3007  ;;  %2441 = vrot.lane.b32.xlu1 %v2436_v13, %s4135_s29  ;;  %v2608_v13 = vmul.f32 %v2606_v61, %v2548_v44 }
 0x432   : > { %2369 = vrot.lane.b32.xlu0 %v2365_v20, %s4131_s30  ;;  %v2535_v20 = vmul.f32 %v2534_v8, %v2447_v43  ;;  %v2718_v43 = vstv %s6130_s14  ;;  %s6326_s14 = sld [smem:[#allocation3 + $0x2a]] }
 0x433   : > { %v6032_v37 = vpop.permute.xlu1 %3091  ;;  %2457 = vrot.lane.b32.xlu1 %v2452_v2, %s4132_s5  ;;  %v2547_v2 = vld [vmem:[#allocation2 + $0x3] sm:$0xff] }
 0x434   : > { %v2579_v8 = vmul.f32 %v2578_v19, %v2547_v2 }
 0x436   : > { %2383 = vrot.lane.b32.xlu0 %v2379_v48, %s4131_s30  ;;  %v2622_v48 = vmul.f32 %v2620_v3, %v2548_v44 }
 0x437   : > { %2471 = vrot.lane.b32.xlu1 %v2466_v47, %s4132_s5  ;;  %v6044_v49 = vpop.permute.xlu1 %3147  ;;  %v2634_v47 = vstv %s6112_s12  ;;  %s6304_s12 = sld [smem:[#allocation3 + $0x26]] }
 0x438   : > { %v2636_v24 = vmul.f32 %v2634_v47, %v2548_v44  ;;  %v2774_v44 = vstv %s6141_s17  ;;  %s6337_s17 = sld [smem:[#allocation3 + $0x2d]] }
 0x43a   : > { %2397 = vrot.lane.b32.xlu0 %v2393_v60, %s4131_s30  ;;  %v2551_v60 = vmul.f32 %v2550_v7, %v2547_v2 }
 0x43b   : > { %2485 = vrot.lane.b32.xlu1 %v2480_v36, %s4133_s6  ;;  %v6051_v16 = vpop.permute.xlu1 %3205 }
 0x43e   : > { %2411 = vrot.lane.b32.xlu0 %v2407_v28, %s4131_s30  ;;  %v6138_v28 = vld [vmem:[#allocation2 + $0xc] sm:$0xff] }
 0x43f   : > { %2499 = vrot.lane.b32.xlu1 %v2494_v12, %s4133_s6  ;;  %v6063_v52 = vpop.permute.xlu1 %3261  ;;  %v2674_v12 = vstv %s6121_s13  ;;  %s6315_s13 = sld [smem:[#allocation3 + $0x29]] }
 0x440   : > { %v2676_v39 = vmul.f32 %v2674_v12, %v6138_v28 }
 0x442   : > { %2425 = vrot.lane.b32.xlu0 %v2421_v58, %s4135_s29  ;;  %v2565_v58 = vmul.f32 %v2564_v32, %v2547_v2 }
 0x443   : > { %2513 = vrot.lane.b32.xlu1 %v2508_v11, %s4133_s6 }
 0x446   : > { %2439 = vrot.lane.b32.xlu0 %v2435_v25, %s4135_s29  ;;  %v6150_v25 = vld [vmem:[#allocation2 + $0x5] sm:$0xff] }
 0x447   : > { %2527 = vrot.lane.b32.xlu1 %v2522_v27, %s4133_s6  ;;  %v2775_v32 = vmul.f32 %v2774_v44, %v6150_v25 }
 0x448   : > { %v6070_v57 = vpop.permute.xlu0 %2953 }
 0x449   : > { %v6072_v4 = vpop.permute.xlu1 %3319 }
 0x44a   : > { %2455 = vrot.lane.b32.xlu0 %v2451_v55, %s4132_s5 }
 0x44b   : > { %2541 = vrot.lane.b32.xlu1 %v2536_v51, %s4136_s8  ;;  %v2719_v51 = vmul.f32 %v2718_v43, %v6150_v25 }
 0x44c   : > { %v6079_v50 = vpop.permute.xlu0 %3009 }
 0x44d   : > { %v6081_v23 = vpop.permute.xlu1 %3375 }
 0x44e   : > { %2469 = vrot.lane.b32.xlu0 %v2465_v35, %s4132_s5  ;;  %v2593_v35 = vmul.f32 %v2592_v21, %v2547_v2 }
 0x44f   : > { %2557 = vrot.lane.b32.xlu1 %v2552_v41, %s4129_s26 }
 0x450   : > { %v6088_v31 = vpop.permute.xlu0 %3093 }
 0x451   : > { %v6090_v6 = vpop.permute.xlu1 %3459 }
 0x452   : > { %2483 = vrot.lane.b32.xlu0 %v2479_v0, %s4133_s6  ;;  %v6176_v0 = vld [vmem:[#allocation2 + $0x6] sm:$0xff] }
 0x453   : > { %2571 = vrot.lane.b32.xlu1 %v2566_v22, %s4129_s26  ;;  %v7118_v22 = vstv %s6153_s18 }
 0x454   : > { %v6097_v63 = vpop.permute.xlu0 %3149  ;;  %v2833_v21 = vmul.f32 %v7118_v22, %v6176_v0 }
 0x455   : > { %v6099_v59 = vpop.permute.xlu1 %3515 }
 0x456   : > { %2497 = vrot.lane.b32.xlu0 %v2493_v18, %s4133_s6  ;;  %v2607_v18 = vmul.f32 %v2606_v61, %v2547_v2 }
 0x457   : > { %2585 = vrot.lane.b32.xlu1 %v2580_v34, %s4129_s26 }
 0x458   : > { %v6106_v14 = vpop.permute.xlu0 %3207 }
 0x459   : > { %v6108_v53 = vpop.permute.xlu1 %2925 }
 0x45a   : > { %7138 = vst [vmem:[#allocation6_spill] sm:$0xff] %v6108_v53  ;;  %2511 = vrot.lane.b32.xlu0 %v2507_v56, %s4133_s6  ;;  %v7117_v56 = vstv %s6165_s19 }
 0x45b   : > { %2599 = vrot.lane.b32.xlu1 %v2594_v17, %s4130_s28 }
 0x45c   : > { %v6115_v5 = vpop.permute.xlu0 %3263 }
 0x45d   : > { %v6117_v42 = vpop.permute.xlu1 %2939 }
 0x45e   : > { %7139 = vst [vmem:[#allocation7_spill] sm:$0xff] %v6117_v42  ;;  %2525 = vrot.lane.b32.xlu0 %v2521_v40, %s4133_s6  ;;  %v2621_v40 = vmul.f32 %v2620_v3, %v2547_v2  ;;  %v6210_v3 = vld [vmem:[#allocation2 + $0x4] sm:$0xff] }
 0x45f   : > { %2613 = vrot.lane.b32.xlu1 %v2608_v13, %s4130_s28  ;;  %v2889_v13 = vmul.f32 %v7117_v56, %v6176_v0 }
 0x460   : > { %v6124_v62 = vpop.permute.xlu0 %3321 }
 0x461   : > { %v6126_v26 = vpop.permute.xlu1 %2981 }
 0x462   : > { %7140 = vst [vmem:[#allocation8_spill] sm:$0xff] %v6126_v26  ;;  %2539 = vrot.lane.b32.xlu0 %v2535_v20, %s4136_s8 }
 0x463   : > { %2627 = vrot.lane.b32.xlu1 %v2622_v48, %s4130_s28  ;;  %v2635_v48 = vmul.f32 %v2634_v47, %v2547_v2  ;;  %v2675_v2 = vmul.f32 %v2674_v12, %v6210_v3  ;;  %v3228_v47 = vstv %s6194_s23  ;;  %v6235_v12 = vld [vmem:[#allocation2 + $0xd] sm:$0xff]  ;;  %s6378_s23 = sld [smem:[#allocation3 + $0x5a]] }
 0x464   : > { %v6133_v38 = vpop.permute.xlu0 %3377 }
 0x465   : > { %7141 = vst [vmem:[#allocation9_spill] sm:$0xff] %v6133_v38  ;;  %v6135_v36 = vpop.permute.xlu1 %2995  ;;  %v7162_v38 = vstv %s6315_s13 }
 0x466   : > { %7142 = vst [vmem:[#allocation10_spill] sm:$0xff] %v6135_v36  ;;  %2555 = vrot.lane.b32.xlu0 %v2551_v60, %s4129_s26  ;;  %v3186_v60 = vstv %s6182_s22  ;;  %v7120_v36 = vstv %s6326_s14  ;;  %s6371_s22 = sld [smem:[#allocation3 + $0x2]] }
 0x467   : > { %2641 = vrot.lane.b32.xlu1 %v2636_v24, %s4130_s28 }
 0x468   : > { %v6144_v46 = vpop.permute.xlu0 %3461 }
 0x469   : > { %7143 = vst [vmem:[#allocation11_spill] sm:$0xff] %v6144_v46  ;;  %v6146_v11 = vpop.permute.xlu1 %3063 }
 0x46a   : > { %7144 = vst [vmem:[#allocation12_spill] sm:$0xff] %v6146_v11  ;;  %2569 = vrot.lane.b32.xlu0 %v2565_v58, %s4129_s26  ;;  %v3188_v58 = vmul.f32 %v3186_v60, %v5895_v1 }
 0x46b   : > { %2681 = vrot.lane.b32.xlu1 %v2676_v39, %s4134_s20 }
 0x46c   : > { %v6156_v27 = vpop.permute.xlu0 %3517 }
 0x46d   : > { %7145 = vst [vmem:[#allocation13_spill] sm:$0xff] %v6156_v27  ;;  %v6158_v55 = vpop.permute.xlu1 %3077 }
 0x46e   : > { %7146 = vst [vmem:[#allocation14_spill] sm:$0xff] %v6158_v55  ;;  %2583 = vrot.lane.b32.xlu0 %v2579_v8, %s4129_s26  ;;  %v2688_v8 = vstv %s6196_s24  ;;  %s6392_s24 = sld [smem:[#allocation3 + $0x5d]] }
 0x46f   : > { %2723 = vrot.lane.b32.xlu1 %v2719_v51, %s4128_s16 }
 0x470   : > { %v6168_v7 = vpop.permute.xlu0 %2923 }
 0x471   : > { %7147 = vst [vmem:[#allocation15_spill] sm:$0xff] %v6168_v7  ;;  %v6170_v41 = vpop.permute.xlu1 %3121  ;;  %v2690_v7 = vmul.f32 %v2688_v8, %v6138_v28 }
 0x472   : > { %7148 = vst [vmem:[#allocation16_spill] sm:$0xff] %v6170_v41  ;;  %2597 = vrot.lane.b32.xlu0 %v2593_v35, %s4130_s28  ;;  %v3230_v35 = vmul.f32 %v3228_v47, %v5895_v1 }
 0x473   : > { %2779 = vrot.lane.b32.xlu1 %v2775_v32, %s4131_s30 }
 0x474   : > { %v6180_v19 = vpop.permute.xlu0 %2937 }
 0x475   : > { %7149 = vst [vmem:[#allocation17_spill] sm:$0xff] %v6180_v19  ;;  %v6184_v34 = vpop.permute.xlu1 %3135 }
 0x476   : > { %7150 = vst [vmem:[#allocation18_spill] sm:$0xff] %v6184_v34  ;;  %2611 = vrot.lane.b32.xlu0 %v2607_v18, %s4130_s28  ;;  %v2689_v18 = vmul.f32 %v2688_v8, %v6210_v3  ;;  %v2746_v34 = vstv %s6293_s11  ;;  %s6468_s11 = sld [smem:[#allocation3 + $0x1d]] }
 0x477   : > { %2837 = vrot.lane.b32.xlu1 %v2833_v21, %s4132_s5  ;;  %v3242_v21 = vstv %s6208_s25  ;;  %s6394_s25 = sld [smem:[#allocation3]] }
 0x478   : > { %v6192_v17 = vpop.permute.xlu0 %2979 }
 0x479   : > { %7151 = vst [vmem:[#allocation19_spill] sm:$0xff] %v6192_v17  ;;  %v6198_v61 = vpop.permute.xlu1 %3177 }
 0x47a   : > { %7152 = vst [vmem:[#allocation20_spill] sm:$0xff] %v6198_v61  ;;  %2625 = vrot.lane.b32.xlu0 %v2621_v40, %s4130_s28  ;;  %v2760_v61 = vstv %s6304_s12  ;;  %s6504_s12 = sld [smem:[#allocation3 + $0x1f]] }
 0x47b   : > { %2893 = vrot.lane.b32.xlu1 %v2889_v13, %s4133_s6  ;;  %v3244_v13 = vmul.f32 %v3242_v21, %v5895_v1  ;;  %v3300_v1 = vstv %s6228_s7  ;;  %s6429_s7 = sld [smem:[#allocation3 + $0x61]] }
 0x47c   : > { %v6205_v20 = vpop.permute.xlu0 %2993 }
 0x47d   : > { %7153 = vst [vmem:[#allocation21_spill] sm:$0xff] %v6205_v20  ;;  %v6212_v24 = vpop.permute.xlu1 %2313 }
 0x47e   : > { %2639 = vrot.lane.b32.xlu0 %v2635_v48, %s4130_s28  ;;  %v3286_v48 = vstv %s6216_s27  ;;  %s6412_s27 = sld [smem:[#allocation3 + $0x5e]] }
 0x47f   : > { %3193 = vrot.lane.b32.xlu1 %v3188_v58, %s4132_s5  ;;  %v3288_v56 = vmul.f32 %v3286_v48, %v5910_v15 }
 0x480   : > { %v6219_v39 = vpop.permute.xlu0 %3061 }
 0x481   : > { %7154 = vst [vmem:[#allocation22_spill] sm:$0xff] %v6219_v39  ;;  %v6224_v51 = vpop.permute.xlu1 %2327  ;;  %v3356_v39 = vstv %s6255_s10  ;;  %s6450_s10 = sld [smem:[#allocation3 + $0x3]] }
 0x482   : > { %2679 = vrot.lane.b32.xlu0 %v2675_v2, %s4134_s20  ;;  %v2720_v2 = vmul.f32 %v2718_v43, %v6235_v12  ;;  %v6263_v43 = vld [vmem:[#allocation2 + $0xe] sm:$0xff] }
 0x483   : > { %3235 = vrot.lane.b32.xlu1 %v3230_v35, %s4133_s6  ;;  %7158 = vst [vmem:[#allocation26_spill] sm:$0xff] %v6263_v43 }
 0x484   : > { %v6231_v32 = vpop.permute.xlu0 %3075 }
 0x485   : > { %7155 = vst [vmem:[#allocation23_spill] sm:$0xff] %v6231_v32  ;;  %v6237_v40 = vpop.permute.xlu1 %2341  ;;  %v3302_v32 = vmul.f32 %v3300_v1, %v5910_v15 }
 0x486   : > { %2693 = vrot.lane.b32.xlu0 %v2689_v18, %s4134_s20 }
 0x487   : > { %3249 = vrot.lane.b32.xlu1 %v3244_v13, %s4133_s6  ;;  %v2776_v13 = vmul.f32 %v2774_v44, %v6235_v12 }
 0x488   : > { %v6245_v58 = vpop.permute.xlu0 %3119 }
 0x489   : > { %7156 = vst [vmem:[#allocation24_spill] sm:$0xff] %v6245_v58  ;;  %v6250_v35 = vpop.permute.xlu1 %2357 }
 0x48a   : > { %2725 = vrot.lane.b32.xlu0 %v2720_v2, %s4128_s16  ;;  %v3342_v2 = vstv %s6242_s9  ;;  %s6281_s16 = sld [smem:[#allocation3 + $0x22]]  ;;  %s6448_s9 = sld [smem:[#allocation3 + $0x24]] }
 0x48b   : > { %3293 = vrot.lane.b32.xlu1 %v3288_v56, %s4129_s26  ;;  %v7160_v56 = vstv %s6153_s18  ;;  %v3344_v44 = vmul.f32 %v3342_v2, %v5910_v15  ;;  %s6350_s18 = sld [smem:[#allocation3 + $0x2e]] }
 0x48c   : > { %v6258_v18 = vpop.permute.xlu0 %3133 }
 0x48d   : > { %7157 = vst [vmem:[#allocation25_spill] sm:$0xff] %v6258_v18  ;;  %v6265_v22 = vpop.permute.xlu1 %2371  ;;  %v2834_v18 = vmul.f32 %v7160_v56, %v6263_v43  ;;  %v3358_v56 = vmul.f32 %v3356_v39, %v5910_v15 }
 0x48e   : > { %2781 = vrot.lane.b32.xlu0 %v2776_v13, %s4131_s30 }
 0x48f   : > { %3307 = vrot.lane.b32.xlu1 %v3302_v32, %s4129_s26  ;;  %v7161_v32 = vstv %s6165_s19  ;;  %s6356_s19 = sld [smem:[#allocation3 + $0x1]] }
 0x490   : > { %v6271_v58 = vpop.permute.xlu0 %3175 }
 0x491   : > { %7159 = vst [vmem:[#allocation27_spill] sm:$0xff] %v6271_v58  ;;  %v6276_v20 = vpop.permute.xlu1 %2385  ;;  %v2890_v58 = vmul.f32 %v7161_v32, %v6263_v43  ;;  %v2702_v32 = vstv %s6281_s16  ;;  %s6453_s16 = sld [smem:[#allocation3 + $0x1c]] }
 0x492   : > { %2839 = vrot.lane.b32.xlu0 %v2834_v18, %s4132_s5 }
 0x493   : > { %3349 = vrot.lane.b32.xlu1 %v3344_v44, %s4130_s28  ;;  %v3187_v44 = vmul.f32 %v3186_v60, %v5854_v9  ;;  %v2704_v60 = vmul.f32 %v2702_v32, %v6138_v28 }
 0x494   : > { %v6284_v13 = vpop.permute.xlu0 %2311 }
 0x495   : > { %v6289_v19 = vpop.permute.xlu1 %2399 }
 0x496   : > { %2895 = vrot.lane.b32.xlu0 %v2890_v58, %s4133_s6  ;;  %v3229_v58 = vmul.f32 %v3228_v47, %v5854_v9  ;;  %v2748_v47 = vmul.f32 %v2746_v34, %v6235_v12 }
 0x497   : > { %3363 = vrot.lane.b32.xlu1 %v3358_v56, %s4130_s28 }
 0x498   : > { %v6296_v18 = vpop.permute.xlu0 %2325 }
 0x499   : > { %v6299_v17 = vpop.permute.xlu1 %2413 }
 0x49a   : > { %3191 = vrot.lane.b32.xlu0 %v3187_v44, %s4132_s5 }
 0x49b   : > { %2695 = vrot.lane.b32.xlu1 %v2690_v7, %s4134_s20  ;;  %v3243_v7 = vmul.f32 %v3242_v21, %v5854_v9  ;;  %v2762_v9 = vmul.f32 %v2760_v61, %v6235_v12  ;;  %v7119_v21 = vstv %s6315_s13  ;;  %s6593_s13 = sld [smem:[#allocation3 + $0x3b]] }
 0x49c   : > { %v6307_v15 = vpop.permute.xlu0 %2339 }
 0x49d   : > { %v6310_v56 = vpop.permute.xlu1 %2427 }
 0x49e   : > { %3233 = vrot.lane.b32.xlu0 %v3229_v58, %s4133_s6 }
 0x49f   : > { %2709 = vrot.lane.b32.xlu1 %v2704_v60, %s4134_s20  ;;  %v3287_v60 = vmul.f32 %v3286_v48, %v5872_v29  ;;  %v2804_v48 = vmul.f32 %v7119_v21, %v6235_v12  ;;  %v2820_v21 = vmul.f32 %v7120_v36, %v6263_v43 }
 0x4a0   : > { %v6318_v8 = vpop.permute.xlu0 %2355 }
 0x4a1   : > { %v6321_v44 = vpop.permute.xlu1 %2441 }
 0x4a2   : > { %3247 = vrot.lane.b32.xlu0 %v3243_v7, %s4133_s6 }
 0x4a3   : > { %2753 = vrot.lane.b32.xlu1 %v2748_v47, %s4131_s30  ;;  %v3301_v47 = vmul.f32 %v3300_v1, %v5872_v29 }
 0x4a4   : > { %v6329_v58 = vpop.permute.xlu0 %2369 }
 0x4a5   : > { %v6332_v55 = vpop.permute.xlu1 %2457 }
 0x4a6   : > { %3291 = vrot.lane.b32.xlu0 %v3287_v60, %s4129_s26 }
 0x4a7   : > { %2767 = vrot.lane.b32.xlu1 %v2762_v9, %s4131_s30  ;;  %v3343_v9 = vmul.f32 %v3342_v2, %v5872_v29  ;;  %v3357_v2 = vmul.f32 %v3356_v39, %v5872_v29  ;;  %v2703_v29 = vmul.f32 %v2702_v32, %v6210_v3  ;;  %v7125_v39 = vstv %s6356_s19 }
 0x4a8   : > { %v6340_v7 = vpop.permute.xlu0 %2383 }
 0x4a9   : > { %v6343_v41 = vpop.permute.xlu1 %2471 }
 0x4aa   : > { %3305 = vrot.lane.b32.xlu0 %v3301_v47, %s4129_s26  ;;  %v7121_v47 = vstv %s6337_s17  ;;  %s6365_s26 = sld [smem:[#allocation3 + $0x59]] }
 0x4ab   : > { %2809 = vrot.lane.b32.xlu1 %v2804_v48, %s4135_s29  ;;  %v2862_v36 = vmul.f32 %v7121_v47, %v6263_v43 }
 0x4ac   : > { %v6353_v60 = vpop.permute.xlu0 %2397 }
 0x4ad   : > { %v6358_v1 = vpop.permute.xlu1 %2485 }
 0x4ae   : > { %3347 = vrot.lane.b32.xlu0 %v3343_v9, %s4130_s28  ;;  %v7122_v9 = vstv %s6350_s18 }
 0x4af   : > { %2825 = vrot.lane.b32.xlu1 %v2820_v21, %s4132_s5  ;;  %v2876_v47 = vmul.f32 %v7122_v9, %v6263_v43  ;;  %v2747_v9 = vmul.f32 %v2746_v34, %v6150_v25  ;;  %v7127_v43 = vstv %s6371_s22 }
 0x4b0   : > { %v6368_v48 = vpop.permute.xlu0 %2411  ;;  %v7126_v26 = vstv %s6365_s26  ;;  %v2296_v34 = vmul.f32 %v7127_v43, %v5960_v10  ;;  %v3482_v43 = vstv %s6392_s24  ;;  %s6680_s24 = sld [smem:[#allocation3 + $0x39]] }
 0x4b1   : > { %v2500_v11 = vpop.permute.xlu1 %2499 }
 0x4b2   : > { %3361 = vrot.lane.b32.xlu0 %v3357_v2, %s4130_s28  ;;  %v6389_v2 = vld [vmem:[#allocation2 + $0x25] sm:$0xff] }
 0x4b3   : > { %2867 = vrot.lane.b32.xlu1 %v2862_v36, %s4133_s6  ;;  %v2290_v36 = vmul.f32 %v7125_v39, %v5960_v10  ;;  %v3426_v53 = vmul.f32 %v7126_v26, %v6389_v2  ;;  %v2761_v26 = vmul.f32 %v2760_v61, %v6150_v25 }
 0x4b4   : > { %v6381_v21 = vpop.permute.xlu0 %2425 }
 0x4b5   : > { %v2514_v42 = vpop.permute.xlu1 %2513  ;;  %v2332_v27 = vadd.f32 %v6224_v51, %v2290_v36  ;;  %v2346_v36 = vadd.f32 %v6237_v40, %v2296_v34 }
 0x4b6   : > { %2707 = vrot.lane.b32.xlu0 %v2703_v29, %s4134_s20 }
 0x4b7   : > { %2881 = vrot.lane.b32.xlu1 %v2876_v47, %s4133_s6  ;;  %v7128_v47 = vstv %s6378_s23  ;;  %v2390_v39 = vadd.f32 %v6276_v20, %v2332_v27  ;;  %v7134_v27 = vstv %s6394_s25  ;;  %v2404_v61 = vadd.f32 %v6289_v19, %v2346_v36 }
 0x4b8   : > { %v6400_v32 = vpop.permute.xlu0 %2439 }
 0x4b9   : > { %v6404_v29 = vpop.permute.xlu1 %2527 }
 0x4ba   : > { %2751 = vrot.lane.b32.xlu0 %v2747_v9, %s4131_s30  ;;  %v3440_v9 = vmul.f32 %v7128_v47, %v6389_v2  ;;  %v2803_v47 = vmul.f32 %v7162_v38, %v6150_v25 }
 0x4bb   : > { %3431 = vrot.lane.b32.xlu1 %v3426_v53, %s4134_s20  ;;  %v2446_v53 = vadd.f32 %v6321_v44, %v2390_v39  ;;  %v2284_v44 = vmul.f32 %v7134_v27, %v5960_v10  ;;  %v2462_v39 = vadd.f32 %v6332_v55, %v2404_v61  ;;  %v7163_v55 = vstv %s6326_s14  ;;  %s6613_s14 = sld [smem:[#allocation3 + $0x57]] }
 0x4bc   : > { %v6419_v46 = vpop.permute.xlu0 %2455 }
 0x4bd   : > { %v2542_v51 = vpop.permute.xlu1 %2541  ;;  %v2504_v40 = vadd.f32 %v2500_v11, %v2446_v53  ;;  %v2318_v38 = vadd.f32 %v6212_v24, %v2284_v44  ;;  %v2518_v36 = vadd.f32 %v2514_v42, %v2462_v39  ;;  %v7129_v24 = vstv %s6429_s7 }
 0x4be   : > { %2765 = vrot.lane.b32.xlu0 %v2761_v26, %s4131_s30  ;;  %v3484_v26 = vmul.f32 %v3482_v43, %v5924_v45  ;;  %v7164_v44 = vstv %s6337_s17  ;;  %s6628_s17 = sld [smem:[#allocation3 + $0x28]] }
 0x4bf   : > { %3445 = vrot.lane.b32.xlu1 %v3440_v9, %s4134_s20  ;;  %v7133_v9 = vstv %s6412_s27  ;;  %v2861_v39 = vmul.f32 %v7164_v44, %v6176_v0  ;;  %v6488_v44 = vld [vmem:[#allocation2 + $0x1d] sm:$0xff] }
 0x4c0   : > { %v6434_v20 = vpop.permute.xlu0 %2469  ;;  %v3498_v61 = vmul.f32 %v7133_v9, %v5924_v45 }
 0x4c1   : > { %v2558_v34 = vpop.permute.xlu1 %2557 }
 0x4c2   : > { %2807 = vrot.lane.b32.xlu0 %v2803_v47, %s4135_s29  ;;  %v2562_v19 = vadd.f32 %v2558_v34, %v2504_v40  ;;  %v2819_v47 = vmul.f32 %v7163_v55, %v6176_v0  ;;  %v2376_v40 = vadd.f32 %v6265_v22, %v2318_v38  ;;  %v3540_v22 = vmul.f32 %v7129_v24, %v5924_v45 }
 0x4c3   : > { %3489 = vrot.lane.b32.xlu1 %v3484_v26, %s4131_s30 }
 0x4c4   : > { %v6456_v11 = vpop.permute.xlu0 %2483  ;;  %v2432_v42 = vadd.f32 %v6310_v56, %v2376_v40  ;;  %v7131_v56 = vstv %s6453_s16 }
 0x4c5   : > { %v2572_v53 = vpop.permute.xlu1 %2571  ;;  %v2652_v24 = vmul.f32 %v7131_v56, %v6138_v28 }
 0x4c6   : > { %2823 = vrot.lane.b32.xlu0 %v2819_v47, %s4132_s5  ;;  %v2576_v34 = vadd.f32 %v2572_v53, %v2518_v36  ;;  %v2490_v38 = vadd.f32 %v6358_v1, %v2432_v42  ;;  %v7132_v47 = vstv %s6448_s9  ;;  %v7130_v36 = vstv %s6450_s10  ;;  %s6483_s5 = sld [smem:[#allocation3 + $0x1e]] }
 0x4c7   : > { %3503 = vrot.lane.b32.xlu1 %v3498_v61, %s4131_s30  ;;  %v7165_v61 = vstv %s6350_s18  ;;  %v2734_v42 = vmul.f32 %v7132_v47, %v6235_v12  ;;  %s6638_s18 = sld [smem:[#allocation3 + $0x2c]] }
 0x4c8   : > { %v2498_v26 = vpop.permute.xlu0 %2497  ;;  %v2875_v40 = vmul.f32 %v7165_v61, %v6176_v0  ;;  %v2546_v45 = vadd.f32 %v2542_v51, %v2490_v38  ;;  %v7166_v61 = vstv %s6356_s19  ;;  %v2656_v38 = vstv %s6468_s11  ;;  %s6648_s19 = sld [smem:[#allocation3 + $0x30]]  ;;  %s6732_s11 = sld [smem:[#allocation3 + $0x56]] }
 0x4c9   : > { %v2586_v55 = vpop.permute.xlu1 %2585  ;;  %v2289_v51 = vmul.f32 %v7166_v61, %v5998_v33  ;;  %v2658_v9 = vmul.f32 %v2656_v38, %v6138_v28 }
 0x4ca   : > { %2865 = vrot.lane.b32.xlu0 %v2861_v39, %s4133_s6  ;;  %v2302_v39 = vmul.f32 %v7130_v36, %v5960_v10 }
 0x4cb   : > { %3545 = vrot.lane.b32.xlu1 %v3540_v22, %s4135_s29  ;;  %v2331_v56 = vadd.f32 %v6296_v18, %v2289_v51 }
 0x4cc   : > { %v2512_v53 = vpop.permute.xlu0 %2511  ;;  %v2362_v10 = vadd.f32 %v6250_v35, %v2302_v39  ;;  %v7168_v35 = vstv %s6371_s22  ;;  %s6667_s22 = sld [smem:[#allocation3 + $0x3c]] }
 0x4cd   : > { %v2600_v1 = vpop.permute.xlu1 %2599  ;;  %v2295_v39 = vmul.f32 %v7168_v35, %v5998_v33  ;;  %v2389_v27 = vadd.f32 %v6340_v7, %v2331_v56  ;;  %v2668_v35 = vstv %s6504_s12  ;;  %s6760_s12 = sld [smem:[#allocation3 + $0x5c]] }
 0x4ce   : > { %2879 = vrot.lane.b32.xlu0 %v2875_v40, %s4133_s6  ;;  %v2604_v22 = vadd.f32 %v2600_v1, %v2546_v45  ;;  %v7167_v40 = vstv %s6365_s26  ;;  %v2418_v61 = vadd.f32 %v6299_v17, %v2362_v10  ;;  %v7169_v17 = vstv %s6378_s23  ;;  %s6657_s26 = sld [smem:[#allocation3 + $0x34]]  ;;  %s6676_s23 = sld [smem:[#allocation3 + $0x40]] }
 0x4cf   : > { %2739 = vrot.lane.b32.xlu1 %v2734_v42, %s4131_s30  ;;  %v3425_v45 = vmul.f32 %v7167_v40, %v6488_v44  ;;  %v2662_v40 = vstv %s6483_s5  ;;  %s6742_s5 = sld [smem:[#allocation3 + $0x58]] }
 0x4d0   : > { %v6508_v36 = vpop.permute.xlu0 %2525  ;;  %v2654_v1 = vadd.f32 %v2652_v24, %v2604_v22  ;;  %v2476_v24 = vadd.f32 %v6343_v41, %v2418_v61  ;;  %v3439_v22 = vmul.f32 %v7169_v17, %v6488_v44  ;;  %v2664_v41 = vmul.f32 %v2662_v40, %v6138_v28 }
 0x4d1   : > { %v2614_v47 = vpop.permute.xlu1 %2613 }
 0x4d2   : > { %3429 = vrot.lane.b32.xlu0 %v3425_v45, %s4134_s20  ;;  %v2618_v42 = vadd.f32 %v2614_v47, %v2562_v19  ;;  %v2345_v19 = vadd.f32 %v6307_v15, %v2295_v39  ;;  %v2445_v47 = vadd.f32 %v6400_v32, %v2389_v27  ;;  %v2532_v45 = vadd.f32 %v6404_v29, %v2476_v24 }
 0x4d3   : > { %v7170_v29 = vstv %s6394_s25  ;;  %s6686_s25 = sld [smem:[#allocation3 + $0x44]] }
 0x4d4   : > { %v2540_v18 = vpop.permute.xlu0 %2539  ;;  %v6528_v51 = vadd.f32 %v2658_v9, %v2618_v42  ;;  %v2403_v56 = vadd.f32 %v6353_v60, %v2345_v19  ;;  %v2503_v61 = vadd.f32 %v2498_v26, %v2445_v47  ;;  %v6539_v42 = vld [vmem:[#allocation2 + $0x1e] sm:$0xff]  ;;  %v2590_v32 = vadd.f32 %v2586_v55, %v2532_v45 }
 0x4d5   : > { %v2628_v10 = vpop.permute.xlu1 %2627  ;;  %v3483_v15 = vmul.f32 %v6539_v42, %v3482_v43  ;;  %v2670_v26 = vmul.f32 %v2668_v35, %v6138_v28  ;;  %v7171_v55 = vstv %s6412_s27  ;;  %s6690_s27 = sld [smem:[#allocation3 + $0x3a]] }
 0x4d6   : > { %3443 = vrot.lane.b32.xlu0 %v3439_v22, %s4134_s20  ;;  %v2632_v7 = vadd.f32 %v2628_v10, %v2576_v34  ;;  %v2283_v34 = vmul.f32 %v7170_v29, %v5998_v33  ;;  %v2461_v39 = vadd.f32 %v6419_v46, %v2403_v56  ;;  %v3497_v47 = vmul.f32 %v6539_v42, %v7171_v55 }
 0x4d8   : > { %v2556_v9 = vpop.permute.xlu0 %2555  ;;  %v6544_v27 = vadd.f32 %v2664_v41, %v2632_v7  ;;  %v2317_v22 = vadd.f32 %v6284_v13, %v2283_v34  ;;  %v2517_v19 = vadd.f32 %v2512_v53, %v2461_v39  ;;  %v7172_v53 = vstv %s6429_s7  ;;  %s6698_s7 = sld [smem:[#allocation3 + $0x48]] }
 0x4d9   : > { %v2561_v24 = vadd.f32 %v2556_v9, %v2503_v61  ;;  %v2642_v17 = vpop.permute.xlu1 %2641  ;;  %v3539_v56 = vmul.f32 %v6539_v42, %v7172_v53 }
 0x4da   : > { %3487 = vrot.lane.b32.xlu0 %v3483_v15, %s4131_s30  ;;  %v2646_v60 = vadd.f32 %v2642_v17, %v2590_v32  ;;  %v2375_v46 = vadd.f32 %v6329_v58, %v2317_v22  ;;  %v7173_v32 = vstv %s6448_s9  ;;  %s6712_s9 = sld [smem:[#allocation3 + $0x4c]] }
 0x4db   : > { %v2733_v29 = vmul.f32 %v7173_v32, %v6150_v25 }
 0x4dc   : > { %v2570_v43 = vpop.permute.xlu0 %2569  ;;  %v2672_v10 = vadd.f32 %v2670_v26, %v2646_v60  ;;  %v2431_v28 = vadd.f32 %v6381_v21, %v2375_v46  ;;  %v7175_v21 = vstv %s6453_s16  ;;  %s6729_s16 = sld [smem:[#allocation3 + $0x50]] }
 0x4dd   : > { %v2575_v45 = vadd.f32 %v2570_v43, %v2517_v19  ;;  %v2682_v7 = vpop.permute.xlu1 %2681  ;;  %v2651_v17 = vmul.f32 %v7175_v21, %v6210_v3  ;;  %v2657_v43 = vmul.f32 %v2656_v38, %v6210_v3  ;;  %v2669_v38 = vmul.f32 %v2668_v35, %v6210_v3 }
 0x4de   : > { %3501 = vrot.lane.b32.xlu0 %v3497_v47, %s4131_s30  ;;  %v6558_v41 = vadd.f32 %v2682_v7, %v2654_v1  ;;  %v2489_v61 = vadd.f32 %v6456_v11, %v2431_v28  ;;  %v7174_v1 = vstv %s6450_s10  ;;  %v3036_v35 = vstv %s6593_s13  ;;  %s6717_s10 = sld [smem:[#allocation3 + $0x55]]  ;;  %s6779_s13 = sld [smem:[#allocation3 + $0x60]] }
 0x4df   : > { %v2301_v34 = vmul.f32 %v7174_v1, %v5998_v33 }
 0x4e0   : > { %v2584_v13 = vpop.permute.xlu0 %2583  ;;  %v2545_v58 = vadd.f32 %v2540_v18, %v2489_v61 }
 0x4e1   : > { %v2724_v9 = vpop.permute.xlu1 %2723  ;;  %v2361_v11 = vadd.f32 %v6318_v8, %v2301_v34  ;;  %v2663_v8 = vmul.f32 %v2662_v40, %v6210_v3 }
 0x4e2   : > { %3543 = vrot.lane.b32.xlu0 %v3539_v56, %s4135_s29 }
 0x4e3   : > { %v2417_v18 = vadd.f32 %v6368_v48, %v2361_v11 }
 0x4e4   : > { %v2598_v15 = vpop.permute.xlu0 %2597 }
 0x4e5   : > { %v2603_v39 = vadd.f32 %v2598_v15, %v2545_v58  ;;  %v2780_v60 = vpop.permute.xlu1 %2779  ;;  %v2475_v33 = vadd.f32 %v6434_v20, %v2417_v18 }
 0x4e6   : > { %2737 = vrot.lane.b32.xlu0 %v2733_v29, %s4131_s30 }
 0x4e7   : > { %v2653_v26 = vadd.f32 %v2651_v17, %v2603_v39  ;;  %v2531_v7 = vadd.f32 %v6508_v36, %v2475_v33  ;;  %v6607_v17 = vld [vmem:[#allocation2 + $0x19] sm:$0xff] }
 0x4e8   : > { %v2612_v22 = vpop.permute.xlu0 %2611 }
 0x4e9   : > { %v2617_v19 = vadd.f32 %v2612_v22, %v2561_v24  ;;  %v2838_v55 = vpop.permute.xlu1 %2837  ;;  %v2589_v56 = vadd.f32 %v2584_v13, %v2531_v7 }
 0x4eb   : > { %v6582_v47 = vadd.f32 %v2657_v43, %v2617_v19 }
 0x4ec   : > { %v2626_v46 = vpop.permute.xlu0 %2625 }
 0x4ed   : > { %v2631_v28 = vadd.f32 %v2626_v46, %v2575_v45  ;;  %v2894_v53 = vpop.permute.xlu1 %2893 }
 0x4ef   : > { %v6588_v61 = vadd.f32 %v2663_v8, %v2631_v28 }
 0x4f0   : > { %v2640_v48 = vpop.permute.xlu0 %2639 }
 0x4f1   : > { %v2645_v24 = vadd.f32 %v2640_v48, %v2589_v56  ;;  %v6591_v58 = vpop.permute.xlu1 %3193  ;;  %v3404_v56 = vstv %s6613_s14 }
 0x4f3   : > { %v2671_v20 = vadd.f32 %v2669_v38, %v2645_v24  ;;  %v3405_v38 = vmul.f32 %v3404_v56, %v6488_v44 }
 0x4f4   : > { %v2680_v15 = vpop.permute.xlu0 %2679 }
 0x4f5   : > { %v2729_v36 = vadd.f32 %v2724_v9, %v2671_v20  ;;  %v6595_v45 = vadd.f32 %v2680_v15, %v2653_v26  ;;  %v6597_v32 = vpop.permute.xlu1 %3235  ;;  %v3037_v9 = vmul.f32 %v6607_v17, %v3036_v35 }
 0x4f7   : > { %v2785_v40 = vadd.f32 %v2780_v60, %v2729_v36 }
 0x4f8   : > { %v6599_v13 = vpop.permute.xlu0 %2693 }
 0x4f9   : > { %v2843_v29 = vadd.f32 %v2838_v55, %v2785_v40  ;;  %v6601_v1 = vpop.permute.xlu1 %3249 }
 0x4fb   : > { %v2899_v34 = vadd.f32 %v2894_v53, %v2843_v29 }
 0x4fc   : > { %v2726_v3 = vpop.permute.xlu0 %2725 }
 0x4fd   : > { %v2957_v39 = vadd.f32 %v6017_v54, %v2899_v34  ;;  %v6605_v21 = vpop.permute.xlu1 %3293  ;;  %v2730_v18 = vadd.f32 %v2726_v3, %v2672_v10 }
 0x4ff   : > { %v3013_v11 = vadd.f32 %v6025_v30, %v2957_v39 }
 0x500   : > { %v2782_v26 = vpop.permute.xlu0 %2781 }
 0x501   : > { %v3039_v60 = vadd.f32 %v3037_v9, %v3013_v11  ;;  %v6611_v22 = vpop.permute.xlu1 %3307  ;;  %v2786_v55 = vadd.f32 %v2782_v26, %v2730_v18 }
 0x503   : > { %v3097_v19 = vadd.f32 %v6032_v37, %v3039_v60  ;;  %v7176_v60 = vld [vmem:[#allocation9_spill] sm:$0xff] }
 0x504   : > { %v2840_v43 = vpop.permute.xlu0 %2839 }
 0x505   : > { %v3153_v54 = vadd.f32 %v6044_v49, %v3097_v19  ;;  %v6617_v33 = vpop.permute.xlu1 %3349  ;;  %v2844_v7 = vadd.f32 %v2840_v43, %v2786_v55  ;;  %v6630_v49 = vld [vmem:[#allocation2 + $0x21] sm:$0xff]  ;;  %v7177_v55 = vld [vmem:[#allocation11_spill] sm:$0xff] }
 0x507   : > { %v3211_v46 = vadd.f32 %v6051_v16, %v3153_v54  ;;  %v3038_v16 = vmul.f32 %v6630_v49, %v3036_v35  ;;  %v2788_v35 = vstv %s6628_s17 }
 0x508   : > { %v2896_v30 = vpop.permute.xlu0 %2895  ;;  %v2789_v9 = vmul.f32 %v2788_v35, %v6150_v25  ;;  %v2902_v25 = vstv %s6648_s19 }
 0x509   : > { %v3267_v28 = vadd.f32 %v6063_v52, %v3211_v46  ;;  %v2900_v53 = vadd.f32 %v2896_v30, %v2844_v7  ;;  %v6621_v8 = vpop.permute.xlu1 %3363  ;;  %v2903_v46 = vmul.f32 %v2902_v25, %v6176_v0 }
 0x50b   : > { %v2958_v10 = vadd.f32 %v6070_v57, %v2900_v53  ;;  %v3325_v37 = vadd.f32 %v6072_v4, %v3267_v28  ;;  %v2960_v28 = vstv %s6657_s26  ;;  %v7178_v53 = vld [vmem:[#allocation13_spill] sm:$0xff] }
 0x50c   : > { %v6626_v48 = vpop.permute.xlu0 %3191 }
 0x50d   : > { %v3014_v24 = vadd.f32 %v6079_v50, %v2958_v10  ;;  %v3381_v52 = vadd.f32 %v6081_v23, %v3325_v37  ;;  %v2696_v20 = vpop.permute.xlu1 %2695 }
 0x50e   : > { %v2700_v7 = vadd.f32 %v2696_v20, %v6528_v51  ;;  %v3042_v51 = vstv %s6667_s22 }
 0x50f   : > { %v3040_v15 = vadd.f32 %v3038_v16, %v3014_v24  ;;  %v3407_v57 = vadd.f32 %v3405_v38, %v3381_v52  ;;  %v4026_v16 = vld [vmem:[#allocation2 + $0x18] sm:$0xff]  ;;  %v2790_v38 = vmul.f32 %v2788_v35, %v6235_v12  ;;  %v7180_v12 = vld [vmem:[#allocation26_spill] sm:$0xff]  ;;  %v3024_v35 = vstv %s6680_s24 }
 0x510   : > { %v6636_v36 = vpop.permute.xlu0 %3233 }
 0x511   : > { %v3098_v4 = vadd.f32 %v6088_v31, %v3040_v15  ;;  %v3465_v40 = vadd.f32 %v6090_v6, %v3407_v57  ;;  %v2710_v29 = vpop.permute.xlu1 %2709  ;;  %v3043_v57 = vmul.f32 %v6607_v17, %v3042_v51 }
 0x512   : > { %v2714_v34 = vadd.f32 %v2710_v29, %v6544_v27 }
 0x513   : > { %v3154_v50 = vadd.f32 %v6097_v63, %v3098_v4  ;;  %v3521_v23 = vadd.f32 %v6099_v59, %v3465_v40  ;;  %v2846_v63 = vstv %s6638_s18  ;;  %v3100_v40 = vstv %s6676_s23 }
 0x514   : > { %v6645_v3 = vpop.permute.xlu0 %3247  ;;  %v2847_v26 = vmul.f32 %v2846_v63, %v6176_v0  ;;  %v2961_v0 = vmul.f32 %v4026_v16, %v2960_v28  ;;  %v3214_v16 = vstv %s6698_s7 }
 0x515   : > { %v3212_v39 = vadd.f32 %v6106_v14, %v3154_v50  ;;  %3563 = vrot.lane.b32.xlu0 %v3521_v23, %s4131_s30  ;;  %v2754_v31 = vpop.permute.xlu1 %2753  ;;  %v2848_v23 = vmul.f32 %v2846_v63, %v7180_v12  ;;  %v3156_v63 = vstv %s6686_s25 }
 0x516   : > { %v2758_v37 = vadd.f32 %v2754_v31, %v2700_v7  ;;  %v3026_v31 = vmul.f32 %v6630_v49, %v3024_v35  ;;  %v7184_v7 = vld [vmem:[#allocation10_spill] sm:$0xff] }
 0x517   : > { %v3268_v6 = vadd.f32 %v6115_v5, %v3212_v39  ;;  %v3406_v5 = vmul.f32 %v3404_v56, %v6389_v2 }
 0x518   : > { %v6654_v27 = vpop.permute.xlu0 %3291 }
 0x519   : > { %2793 = vrot.lane.b32.xlu0 %v2789_v9, %s4135_s29  ;;  %v3326_v59 = vadd.f32 %v6124_v62, %v3268_v6  ;;  %v2768_v11 = vpop.permute.xlu1 %2767  ;;  %v7181_v6 = vld [vmem:[#allocation8_spill] sm:$0xff] }
 0x51a   : > { %v2772_v14 = vadd.f32 %v2768_v11, %v2714_v34  ;;  %v7179_v34 = vld [vmem:[#allocation6_spill] sm:$0xff]  ;;  %v4027_v11 = vld [vmem:[#allocation2 + $0x1a] sm:$0xff] }
 0x51b   : > { %v3382_v18 = vadd.f32 %v7176_v60, %v3326_v59 }
 0x51c   : > { %v6664_v19 = vpop.permute.xlu0 %3305 }
 0x51d   : > { %2851 = vrot.lane.b32.xlu0 %v2847_v26, %s4133_s6  ;;  %v3408_v43 = vadd.f32 %v3406_v5, %v3382_v18  ;;  %v2810_v54 = vpop.permute.xlu1 %2809  ;;  %v7182_v18 = vld [vmem:[#allocation7_spill] sm:$0xff] }
 0x51e   : > { %v2814_v52 = vadd.f32 %v2810_v54, %v2758_v37  ;;  %v3030_v54 = vstv %s6690_s27  ;;  %v7185_v37 = vld [vmem:[#allocation16_spill] sm:$0xff] }
 0x51f   : > { %v3466_v62 = vadd.f32 %v7177_v55, %v3408_v43  ;;  %v2904_v43 = vmul.f32 %v2902_v25, %v7180_v12  ;;  %v7183_v55 = vld [vmem:[#allocation12_spill] sm:$0xff] }
 0x520   : > { %v6673_v30 = vpop.permute.xlu0 %3347 }
 0x521   : > { %v3522_v56 = vadd.f32 %v7178_v53, %v3466_v62  ;;  %2907 = vrot.lane.b32.xlu0 %v2903_v46, %s4136_s8  ;;  %v2826_v10 = vpop.permute.xlu1 %2825  ;;  %v3032_v46 = vmul.f32 %v6630_v49, %v3030_v54 }
 0x522   : > { %v2830_v29 = vadd.f32 %v2826_v10, %v2772_v14  ;;  %v3101_v14 = vmul.f32 %v4027_v11, %v3100_v40 }
 0x523   : > { %3565 = vrot.lane.b32.xlu1 %v3522_v56, %s4131_s30  ;;  %v3157_v56 = vmul.f32 %v4027_v11, %v3156_v63 }
 0x524   : > { %v6683_v24 = vpop.permute.xlu0 %3361 }
 0x525   : > { %2965 = vrot.lane.b32.xlu0 %v2961_v0, %s4130_s28  ;;  %v2868_v20 = vpop.permute.xlu1 %2867 }
 0x526   : > { %v2872_v15 = vadd.f32 %v2868_v20, %v2814_v52  ;;  %v4028_v52 = vld [vmem:[#allocation2 + $0x20] sm:$0xff]  ;;  %v7186_v20 = vld [vmem:[#allocation14_spill] sm:$0xff] }
 0x527   : > { %2795 = vrot.lane.b32.xlu1 %v2790_v38, %s4135_s29  ;;  %v2962_v38 = vmul.f32 %v4028_v52, %v2960_v28  ;;  %v3270_v28 = vstv %s6712_s9  ;;  %v7189_v52 = vld [vmem:[#allocation15_spill] sm:$0xff] }
 0x528   : > { %v6694_v4 = vpop.permute.xlu0 %2707  ;;  %v2930_v50 = vadd.f32 %v7179_v34, %v2872_v15  ;;  %v4029_v34 = vld [vmem:[#allocation2 + $0x1b] sm:$0xff] }
 0x529   : > { %3047 = vrot.lane.b32.xlu0 %v3043_v57, %s4134_s20  ;;  %v2882_v39 = vpop.permute.xlu1 %2881  ;;  %v7187_v57 = vld [vmem:[#allocation20_spill] sm:$0xff] }
 0x52a   : > { %v2986_v9 = vadd.f32 %v7181_v6, %v2930_v50  ;;  %v2886_v59 = vadd.f32 %v2882_v39, %v2830_v29  ;;  %v3215_v50 = vmul.f32 %v4029_v34, %v3214_v16  ;;  %v3044_v6 = vmul.f32 %v6630_v49, %v3042_v51 }
 0x52b   : > { %2853 = vrot.lane.b32.xlu1 %v2848_v23, %s4133_s6  ;;  %v7188_v23 = vld [vmem:[#allocation18_spill] sm:$0xff] }
 0x52c   : > { %v2752_v26 = vpop.permute.xlu0 %2751  ;;  %v3028_v60 = vadd.f32 %v3026_v31, %v2986_v9  ;;  %v2944_v5 = vadd.f32 %v7182_v18, %v2886_v59  ;;  %v3392_v9 = vstv %s6717_s10 }
 0x52d   : > { %3105 = vrot.lane.b32.xlu0 %v3101_v14, %s4131_s30  ;;  %v2699_v14 = vadd.f32 %v6599_v13, %v6582_v47  ;;  %v3394_v51 = vmul.f32 %v3392_v9, %v6389_v2  ;;  %v6765_v13 = vpop.permute.xlu1 %3431 }
 0x52e   : > { %v3068_v62 = vadd.f32 %v7183_v55, %v3028_v60  ;;  %v3000_v53 = vadd.f32 %v7184_v7, %v2944_v5  ;;  %v3328_v5 = vstv %s6729_s16  ;;  %v3398_v55 = vstv %s6732_s11 }
 0x52f   : > { %2909 = vrot.lane.b32.xlu1 %v2904_v43, %s4136_s8 }
 0x530   : > { %v2766_v10 = vpop.permute.xlu0 %2765  ;;  %v3126_v25 = vadd.f32 %v7185_v37, %v3068_v62  ;;  %v3034_v0 = vadd.f32 %v3032_v46, %v3000_v53  ;;  %v3410_v37 = vstv %s6742_s5 }
 0x531   : > { %3161 = vrot.lane.b32.xlu0 %v3157_v56, %s4135_s29 }
 0x532   : > { %v3082_v15 = vadd.f32 %v7186_v20, %v3034_v0  ;;  %v3182_v29 = vadd.f32 %v7187_v57, %v3126_v25  ;;  %v3446_v20 = vpop.permute.xlu1 %3445 }
 0x533   : > { %2967 = vrot.lane.b32.xlu1 %v2962_v38, %s4130_s28 }
 0x534   : > { %v2808_v12 = vpop.permute.xlu0 %2807  ;;  %v3140_v39 = vadd.f32 %v7188_v23, %v3082_v15  ;;  %v3240_v31 = vadd.f32 %v6597_v32, %v3182_v29  ;;  %v3271_v32 = vmul.f32 %v4029_v34, %v3270_v28  ;;  %v7190_v29 = vld [vmem:[#allocation19_spill] sm:$0xff] }
 0x535   : > { %3219 = vrot.lane.b32.xlu0 %v3215_v50, %s4133_s6 }
 0x536   : > { %v3298_v59 = vadd.f32 %v6605_v21, %v3240_v31  ;;  %v3198_v11 = vadd.f32 %v6591_v58, %v3140_v39  ;;  %v2757_v58 = vadd.f32 %v2752_v26, %v2699_v14  ;;  %v4030_v21 = vld [vmem:[#allocation2 + $0x22] sm:$0xff]  ;;  %v3524_v14 = vstv %s6779_s13 }
 0x537   : > { %3049 = vrot.lane.b32.xlu1 %v3044_v6, %s4134_s20  ;;  %v3102_v47 = vmul.f32 %v4030_v21, %v3100_v40  ;;  %v4031_v26 = vld [vmem:[#allocation2 + $0x1c] sm:$0xff]  ;;  %v3400_v40 = vmul.f32 %v3398_v55, %v6389_v2  ;;  %v7191_v31 = vld [vmem:[#allocation17_spill] sm:$0xff] }
 0x538   : > { %v2824_v60 = vpop.permute.xlu0 %2823  ;;  %v3354_v18 = vadd.f32 %v6617_v33, %v3298_v59  ;;  %v3254_v43 = vadd.f32 %v6601_v1, %v3198_v11  ;;  %v2713_v1 = vadd.f32 %v6694_v4, %v6588_v61  ;;  %v2813_v46 = vadd.f32 %v2808_v12, %v2757_v58  ;;  %v4032_v12 = vld [vmem:[#allocation2 + $0x23] sm:$0xff] }
 0x539   : > { %3275 = vrot.lane.b32.xlu0 %v3271_v32, %s4136_s8  ;;  %v3329_v7 = vmul.f32 %v4031_v26, %v3328_v5  ;;  %v3158_v61 = vmul.f32 %v4030_v21, %v3156_v63  ;;  %v3025_v63 = vmul.f32 %v6607_v17, %v3024_v35  ;;  %v3216_v23 = vmul.f32 %v4032_v12, %v3214_v16  ;;  %v7192_v32 = vld [vmem:[#allocation22_spill] sm:$0xff]  ;;  %v7196_v26 = vld [vmem:[#allocation27_spill] sm:$0xff] }
 0x53a   : > { %v6768_v62 = vadd.f32 %v3394_v51, %v3354_v18  ;;  %v3312_v33 = vadd.f32 %v6611_v22, %v3254_v43  ;;  %v2771_v22 = vadd.f32 %v2766_v10, %v2713_v1  ;;  %v3468_v10 = vstv %s6760_s12  ;;  %v7193_v51 = vld [vmem:[#allocation21_spill] sm:$0xff]  ;;  %v7194_v43 = vld [vmem:[#allocation24_spill] sm:$0xff]  ;;  %v7195_v1 = vld [vmem:[#allocation23_spill] sm:$0xff] }
 0x53b   : > { %3107 = vrot.lane.b32.xlu1 %v3102_v47, %s4131_s30  ;;  %v3469_v59 = vmul.f32 %v6539_v42, %v3468_v10  ;;  %v3031_v35 = vmul.f32 %v6607_v17, %v3030_v54  ;;  %v3272_v16 = vmul.f32 %v4032_v12, %v3270_v28  ;;  %v3525_v47 = vmul.f32 %v6539_v42, %v3524_v14  ;;  %v4033_v54 = vld [vmem:[#allocation2 + $0x24] sm:$0xff] }
 0x53c   : > { %v2866_v53 = vpop.permute.xlu0 %2865  ;;  %v3368_v56 = vadd.f32 %v6621_v8, %v3312_v33  ;;  %v2829_v0 = vadd.f32 %v2824_v60, %v2771_v22  ;;  %v3411_v8 = vmul.f32 %v3410_v37, %v6488_v44  ;;  %v7197_v28 = vld [vmem:[#allocation25_spill] sm:$0xff]  ;;  %v3490_v22 = vpop.permute.xlu1 %3489 }
 0x53d   : > { %v2871_v25 = vadd.f32 %v2866_v53, %v2813_v46  ;;  %3333 = vrot.lane.b32.xlu0 %v3329_v7, %s4130_s28  ;;  %v3330_v53 = vmul.f32 %v4033_v54, %v3328_v5  ;;  %v3393_v5 = vmul.f32 %v3392_v9, %v6488_v44  ;;  %v3399_v9 = vmul.f32 %v3398_v55, %v6488_v44 }
 0x53e   : > { %v3402_v4 = vadd.f32 %v3400_v40, %v3368_v56 }
 0x53f   : > { %v2929_v38 = vadd.f32 %v7189_v52, %v2871_v25  ;;  %3163 = vrot.lane.b32.xlu1 %v3158_v61, %s4135_s29 }
 0x540   : > { %v2880_v15 = vpop.permute.xlu0 %2879  ;;  %v6787_v57 = vadd.f32 %v3446_v20, %v3402_v4  ;;  %v3412_v4 = vmul.f32 %v3410_v37, %v6389_v2 }
 0x541   : > { %v2985_v34 = vadd.f32 %v7190_v29, %v2929_v38  ;;  %v2885_v50 = vadd.f32 %v2880_v15, %v2829_v0  ;;  %3415 = vrot.lane.b32.xlu0 %v3411_v8, %s4134_s20  ;;  %v3436_v38 = vadd.f32 %v6765_v13, %v6768_v62  ;;  %v4034_v8 = vld [vmem:[#allocation2 + $0x26] sm:$0xff]  ;;  %v3504_v15 = vpop.permute.xlu1 %3503 }
 0x543   : > { %v3027_v39 = vadd.f32 %v3025_v63, %v2985_v34  ;;  %v2943_v6 = vadd.f32 %v7191_v31, %v2885_v50  ;;  %3221 = vrot.lane.b32.xlu1 %v3216_v23, %s4133_s6  ;;  %v3494_v63 = vadd.f32 %v3490_v22, %v3436_v38  ;;  %v3526_v50 = vmul.f32 %v4034_v8, %v3524_v14 }
 0x544   : > { %v3430_v11 = vpop.permute.xlu0 %3429 }
 0x545   : > { %v3067_v60 = vadd.f32 %v7192_v32, %v3027_v39  ;;  %v2999_v18 = vadd.f32 %v7193_v51, %v2943_v6  ;;  %3473 = vrot.lane.b32.xlu0 %v3469_v59, %s4131_s30  ;;  %v3508_v32 = vadd.f32 %v3504_v15, %v6787_v57 }
 0x547   : > { %v3125_v58 = vadd.f32 %v7194_v43, %v3067_v60  ;;  %v3033_v21 = vadd.f32 %v3031_v35, %v2999_v18  ;;  %3277 = vrot.lane.b32.xlu1 %v3272_v16, %s4136_s8 }
 0x548   : > { %v3444_v33 = vpop.permute.xlu0 %3443 }
 0x549   : > { %v3081_v46 = vadd.f32 %v7195_v1, %v3033_v21  ;;  %v3181_v7 = vadd.f32 %v7196_v26, %v3125_v58  ;;  %3529 = vrot.lane.b32.xlu0 %v3525_v47, %s4135_s29 }
 0x54b   : > { %v3139_v40 = vadd.f32 %v7197_v28, %v3081_v46  ;;  %v3239_v56 = vadd.f32 %v6636_v36, %v3181_v7  ;;  %3335 = vrot.lane.b32.xlu1 %v3330_v53, %s4130_s28  ;;  %s3858_s28 = sld [smem:[#allocation3 + $0x38]] }
 0x54c   : > { %v3488_v25 = vpop.permute.xlu0 %3487 }
 0x54d   : > { %v3297_v42 = vadd.f32 %v6654_v27, %v3239_v56  ;;  %v3197_v61 = vadd.f32 %v6626_v48, %v3139_v40  ;;  %v3470_v48 = vmul.f32 %v4034_v8, %v3468_v10 }
 0x54f   : > { %v3353_v0 = vadd.f32 %v6673_v30, %v3297_v42  ;;  %v3253_v52 = vadd.f32 %v6645_v3, %v3197_v61  ;;  %3417 = vrot.lane.b32.xlu1 %v3412_v4, %s4134_s20 }
 0x550   : > { %v3502_v36 = vpop.permute.xlu0 %3501 }
 0x551   : > { %v3395_v20 = vadd.f32 %v3393_v5, %v3353_v0  ;;  %v3311_v27 = vadd.f32 %v6664_v19, %v3253_v52  ;;  %v3546_v19 = vpop.permute.xlu1 %3545  ;;  %v3018_v35 = vstv %s3858_s28 }
 0x552   : > { %v3550_v10 = vadd.f32 %v3546_v19, %v3494_v63  ;;  %v3019_v58 = vmul.f32 %v6607_v17, %v3018_v35 }
 0x553   : > { %v3435_v37 = vadd.f32 %v3430_v11, %v3395_v20  ;;  %v3367_v30 = vadd.f32 %v6683_v24, %v3311_v27  ;;  %3475 = vrot.lane.b32.xlu1 %v3470_v48, %s4131_s30 }
 0x554   : > { %v3544_v3 = vpop.permute.xlu0 %3543 }
 0x555   : > { %v3401_v29 = vadd.f32 %v3399_v9, %v3367_v30  ;;  %v3493_v34 = vadd.f32 %v3488_v25, %v3435_v37  ;;  %v2740_v59 = vpop.permute.xlu1 %2739  ;;  %v3020_v25 = vmul.f32 %v6630_v49, %v3018_v35 }
 0x556   : > { %v2744_v46 = vadd.f32 %v2740_v59, %v6558_v41 }
 0x557   : > { %v3549_v13 = vadd.f32 %v3544_v3, %v3493_v34  ;;  %3531 = vrot.lane.b32.xlu1 %v3526_v50, %s4135_s29  ;;  %v3449_v24 = vadd.f32 %v3444_v33, %v3401_v29 }
 0x558   : > { %v2738_v62 = vpop.permute.xlu0 %2737 }
 0x559   : > { %v2743_v12 = vadd.f32 %v2738_v62, %v6595_v45  ;;  %3553 = vrot.lane.b32.xlu0 %v3549_v13, %s4131_s30  ;;  %v3507_v55 = vadd.f32 %v3502_v36, %v3449_v24 }
 0x55b   : > { %3555 = vrot.lane.b32.xlu1 %v3550_v10, %s4131_s30  ;;  %s3886_s30 = sld [smem:[#allocation3 + $0x54]] }
 0x561   : > { %v3386_v36 = vstv %s3886_s30 }
 0x562   : > { %v3387_v8 = vmul.f32 %v3386_v36, %v6488_v44  ;;  %v3388_v13 = vmul.f32 %v3386_v36, %v6389_v2 }
 0x587   : > { %v3564_v23 = vpop.permute.xlu0 %3563 }
 0x588   : > { %v3569_v39 = vadd.f32 %v3564_v23, %v3507_v55 }
 0x58a   : > { %3573 = vrot.lane.b32.xlu0 %v3569_v39, %s4133_s6 }
 0x58b   : > { %v2794_v31 = vpop.permute.xlu0 %2793 }
 0x58c   : > { %v2799_v11 = vadd.f32 %v2794_v31, %v2743_v12 }
 0x58f   : > { %v2852_v6 = vpop.permute.xlu0 %2851 }
 0x590   : > { %v2857_v60 = vadd.f32 %v2852_v6, %v2799_v11 }
 0x593   : > { %v2908_v14 = vpop.permute.xlu0 %2907 }
 0x594   : > { %v2913_v18 = vadd.f32 %v2908_v14, %v2857_v60 }
 0x595   : > { %v3566_v45 = vpop.permute.xlu1 %3565 }
 0x596   : > { %v3570_v51 = vadd.f32 %v3566_v45, %v3508_v32 }
 0x597   : > { %v2966_v16 = vpop.permute.xlu0 %2965 }
 0x598   : > { %3575 = vrot.lane.b32.xlu1 %v3570_v51, %s4133_s6  ;;  %v2971_v43 = vadd.f32 %v2966_v16, %v2913_v18 }
 0x599   : > { %v2796_v21 = vpop.permute.xlu1 %2795 }
 0x59a   : > { %v3021_v47 = vadd.f32 %v3019_v58, %v2971_v43  ;;  %v2800_v7 = vadd.f32 %v2796_v21, %v2744_v46  ;;  %v4036_v46 = vld [vmem:[%s5184_s21 + $0x10] sm:$0xff] }
 0x59b   : > { %v3048_v33 = vpop.permute.xlu0 %3047 }
 0x59c   : > { %v3053_v56 = vadd.f32 %v3048_v33, %v3021_v47  ;;  %v4035_v33 = vld [vmem:[%s5184_s21] sm:$0xff] }
 0x59d   : > { %v2854_v1 = vpop.permute.xlu1 %2853 }
 0x59e   : > { %v2858_v54 = vadd.f32 %v2854_v1, %v2800_v7  ;;  %v4037_v7 = vld [vmem:[%s5184_s21 + $0x20] sm:$0xff] }
 0x59f   : > { %v3106_v26 = vpop.permute.xlu0 %3105 }
 0x5a0   : > { %v3111_v17 = vadd.f32 %v3106_v26, %v3053_v56  ;;  %v4040_v56 = vld [vmem:[%s5184_s21 + $0x50] sm:$0xff] }
 0x5a1   : > { %v2910_v57 = vpop.permute.xlu1 %2909 }
 0x5a2   : > { %v2914_v28 = vadd.f32 %v2910_v57, %v2858_v54  ;;  %v4038_v54 = vld [vmem:[%s5184_s21 + $0x30] sm:$0xff] }
 0x5a3   : > { %v3162_v53 = vpop.permute.xlu0 %3161 }
 0x5a4   : > { %v3167_v0 = vadd.f32 %v3162_v53, %v3111_v17  ;;  %v4042_v17 = vld [vmem:[%s5184_s21 + $0x70] sm:$0xff] }
 0x5a5   : > { %v2968_v40 = vpop.permute.xlu1 %2967 }
 0x5a6   : > { %v2972_v22 = vadd.f32 %v2968_v40, %v2914_v28  ;;  %v4039_v28 = vld [vmem:[%s5184_s21 + $0x40] sm:$0xff] }
 0x5a7   : > { %v3220_v42 = vpop.permute.xlu0 %3219 }
 0x5a8   : > { %v3022_v61 = vadd.f32 %v3020_v25, %v2972_v22  ;;  %v3225_v52 = vadd.f32 %v3220_v42, %v3167_v0  ;;  %v4041_v25 = vld [vmem:[%s5184_s21 + $0x60] sm:$0xff] }
 0x5a9   : > { %v3050_v4 = vpop.permute.xlu1 %3049 }
 0x5aa   : > { %v3054_v37 = vadd.f32 %v3050_v4, %v3022_v61  ;;  %v4043_v4 = vld [vmem:[%s5184_s21 + $0x80] sm:$0xff] }
 0x5ab   : > { %v3276_v5 = vpop.permute.xlu0 %3275 }
 0x5ac   : > { %v3281_v38 = vadd.f32 %v3276_v5, %v3225_v52  ;;  %v4044_v5 = vld [vmem:[%s5184_s21 + $0x90] sm:$0xff] }
 0x5ad   : > { %v3108_v41 = vpop.permute.xlu1 %3107 }
 0x5ae   : > { %v3112_v9 = vadd.f32 %v3108_v41, %v3054_v37  ;;  %v4045_v41 = vld [vmem:[%s5184_s21 + $0xa0] sm:$0xff] }
 0x5af   : > { %v3334_v20 = vpop.permute.xlu0 %3333  ;;  %v4049_v37 = vld [vmem:[%s5184_s21 + $0xe0] sm:$0xff] }
 0x5b0   : > { %v3339_v27 = vadd.f32 %v3334_v20, %v3281_v38  ;;  %v4046_v38 = vld [vmem:[%s5184_s21 + $0xb0] sm:$0xff] }
 0x5b1   : > { %v3164_v48 = vpop.permute.xlu1 %3163 }
 0x5b2   : > { %v3389_v15 = vadd.f32 %v3387_v8, %v3339_v27  ;;  %v3168_v49 = vadd.f32 %v3164_v48, %v3112_v9  ;;  %v4047_v27 = vld [vmem:[%s5184_s21 + $0xc0] sm:$0xff]  ;;  %v4048_v48 = vld [vmem:[%s5184_s21 + $0xd0] sm:$0xff] }
 0x5b3   : > { %v3416_v62 = vpop.permute.xlu0 %3415  ;;  %v4050_v9 = vld [vmem:[%s5184_s21 + $0xf0] sm:$0xff] }
 0x5b4   : > { %v3421_v55 = vadd.f32 %v3416_v62, %v3389_v15 }
 0x5b5   : > { %v3222_v30 = vpop.permute.xlu1 %3221 }
 0x5b6   : > { %v3226_v63 = vadd.f32 %v3222_v30, %v3168_v49 }
 0x5b7   : > { %v3474_v10 = vpop.permute.xlu0 %3473 }
 0x5b8   : > { %v3479_v44 = vadd.f32 %v3474_v10, %v3421_v55  ;;  %v4056_v55 = vld [vmem:[%s5184_s21 + $0x150] sm:$0xff] }
 0x5b9   : > { %v3278_v3 = vpop.permute.xlu1 %3277 }
 0x5ba   : > { %v3282_v29 = vadd.f32 %v3278_v3, %v3226_v63  ;;  %v4051_v3 = vld [vmem:[%s5184_s21 + $0x100] sm:$0xff] }
 0x5bb   : > { %v3530_v24 = vpop.permute.xlu0 %3529 }
 0x5bc   : > { %v3535_v39 = vadd.f32 %v3530_v24, %v3479_v44 }
 0x5bd   : > { %v3336_v34 = vpop.permute.xlu1 %3335 }
 0x5be   : > { %v3340_v50 = vadd.f32 %v3336_v34, %v3282_v29  ;;  %v4052_v29 = vld [vmem:[%s5184_s21 + $0x110] sm:$0xff] }
 0x5c0   : > { %v3390_v19 = vadd.f32 %v3388_v13, %v3340_v50  ;;  %v4053_v50 = vld [vmem:[%s5184_s21 + $0x120] sm:$0xff] }
 0x5c1   : > { %v3418_v12 = vpop.permute.xlu1 %3417 }
 0x5c2   : > { %v3422_v60 = vadd.f32 %v3418_v12, %v3390_v19  ;;  %v4054_v19 = vld [vmem:[%s5184_s21 + $0x130] sm:$0xff]  ;;  %v4055_v12 = vld [vmem:[%s5184_s21 + $0x140] sm:$0xff] }
 0x5c5   : > { %v3476_v31 = vpop.permute.xlu1 %3475 }
 0x5c6   : > { %v3480_v2 = vadd.f32 %v3476_v31, %v3422_v60  ;;  %v4058_v31 = vld [vmem:[%s5184_s21 + $0x170] sm:$0xff]  ;;  %v4061_v60 = vld [vmem:[%s5184_s21 + $0x1a0] sm:$0xff] }
 0x5c9   : > { %v3532_v32 = vpop.permute.xlu1 %3531 }
 0x5ca   : > { %v3536_v35 = vadd.f32 %v3532_v32, %v3480_v2 }
 0x5cb   : > { %v3554_v23 = vpop.permute.xlu0 %3553 }
 0x5cc   : > { %v3559_v6 = vadd.f32 %v3554_v23, %v3535_v39  ;;  %v4057_v23 = vld [vmem:[%s5184_s21 + $0x160] sm:$0xff] }
 0x5cd   : > { %v3556_v45 = vpop.permute.xlu1 %3555 }
 0x5ce   : > { %v3560_v51 = vadd.f32 %v3556_v45, %v3536_v35  ;;  %v4062_v45 = vld [vmem:[%s5184_s21 + $0x1b0] sm:$0xff] }
 0x5fc   : > { %v3574_v59 = vpop.permute.xlu0 %3573 }
 0x5fd   : > { %v3579_v11 = vadd.f32 %v3574_v59, %v3559_v6  ;;  %v4059_v59 = vld [vmem:[%s5184_s21 + $0x180] sm:$0xff] }
 0x5ff   : > { %v3900_v14 = vmul.f32 -1.442695, %v3579_v11 }
 0x601   : > { %3951 = vpow2.f32 %v3900_v14  ;;  %v4060_v14 = vld [vmem:[%s5184_s21 + $0x190] sm:$0xff] }
 0x60a   : > { %v3576_v18 = vpop.permute.xlu1 %3575 }
 0x60b   : > { %v3952_v16 = vpop.eup %3951  ;;  %v3580_v58 = vadd.f32 %v3576_v18, %v3560_v51  ;;  %v4063_v51 = vld [vmem:[%s5184_s21 + $0x1c0] sm:$0xff] }
 0x60c   : > { %v3587_v43 = vadd.f32 1.0, %v3952_v16  ;;  %v4064_v16 = vld [vmem:[%s5184_s21 + $0x1d0] sm:$0xff] }
 0x60d   : > { %v3901_v21 = vmul.f32 -1.442695, %v3580_v58  ;;  %v4065_v58 = vld [vmem:[%s5184_s21 + $0x1e0] sm:$0xff] }
 0x60e   : > { %3953 = vrcp.f32 %v3587_v43 }
 0x60f   : > { %3955 = vpow2.f32 %v3901_v21 }
 0x618   : > { %v6847_v47 = vpop.eup %3953 }
 0x619   : > { %v3593_v1 = vmul.f32 %v4035_v33, %v6847_v47  ;;  %v3595_v26 = vmul.f32 %v4036_v46, %v6847_v47  ;;  %v3597_v57 = vmul.f32 %v4037_v7, %v6847_v47  ;;  %v3599_v53 = vmul.f32 %v4038_v54, %v6847_v47  ;;  %v3956_v10 = vpop.eup %3955  ;;  %v4066_v33 = vld [vmem:[%s5184_s21 + $0x1f0] sm:$0xff] }
 0x61a   : > { %v3601_v40 = vmul.f32 %v4039_v28, %v6847_v47  ;;  %v3603_v22 = vmul.f32 %v4040_v56, %v6847_v47  ;;  %v3605_v42 = vmul.f32 %v4041_v25, %v6847_v47  ;;  %v3607_v61 = vmul.f32 %v4042_v17, %v6847_v47 }
 0x61b   : > { %v3609_v0 = vmul.f32 %v4043_v4, %v6847_v47  ;;  %v3611_v52 = vmul.f32 %v4044_v5, %v6847_v47  ;;  %v3613_v36 = vmul.f32 %v4045_v41, %v6847_v47  ;;  %v3615_v20 = vmul.f32 %v4046_v38, %v6847_v47  ;;  %3657 = vst.msk [vmem:[%s5184_s21] sm:$0xff] %vm276_vm0, %v3593_v1 }
 0x61c   : > { %3659 = vst.msk [vmem:[%s5184_s21 + $0x10] sm:$0xff] %vm276_vm0, %v3595_v26  ;;  %3661 = vst.msk [vmem:[%s5184_s21 + $0x20] sm:$0xff] %vm276_vm0, %v3597_v57  ;;  %v3617_v8 = vmul.f32 %v4047_v27, %v6847_v47  ;;  %v3619_v15 = vmul.f32 %v4048_v48, %v6847_v47  ;;  %v3621_v30 = vmul.f32 %v4049_v37, %v6847_v47  ;;  %v4067_v26 = vld [vmem:[%s5184_s21 + $0x8] sm:$0xff]  ;;  %v4068_v57 = vld [vmem:[%s5184_s21 + $0x18] sm:$0xff] }
 0x61d   : > { %3663 = vst.msk [vmem:[%s5184_s21 + $0x30] sm:$0xff] %vm276_vm0, %v3599_v53  ;;  %v3623_v49 = vmul.f32 %v4050_v9, %v6847_v47  ;;  %3665 = vst.msk [vmem:[%s5184_s21 + $0x40] sm:$0xff] %vm276_vm0, %v3601_v40  ;;  %v3625_v63 = vmul.f32 %v4051_v3, %v6847_v47  ;;  %v3627_v34 = vmul.f32 %v4052_v29, %v6847_v47  ;;  %v4069_v53 = vld [vmem:[%s5184_s21 + $0x28] sm:$0xff]  ;;  %v4070_v40 = vld [vmem:[%s5184_s21 + $0x38] sm:$0xff] }
 0x61e   : > { %3667 = vst.msk [vmem:[%s5184_s21 + $0x50] sm:$0xff] %vm276_vm0, %v3603_v22  ;;  %3669 = vst.msk [vmem:[%s5184_s21 + $0x60] sm:$0xff] %vm276_vm0, %v3605_v42  ;;  %v3629_v13 = vmul.f32 %v4053_v50, %v6847_v47  ;;  %v3631_v62 = vmul.f32 %v4054_v19, %v6847_v47  ;;  %v3633_v24 = vmul.f32 %v4055_v12, %v6847_v47  ;;  %v4071_v22 = vld [vmem:[%s5184_s21 + $0x48] sm:$0xff]  ;;  %v4072_v42 = vld [vmem:[%s5184_s21 + $0x58] sm:$0xff] }
 0x61f   : > { %3671 = vst.msk [vmem:[%s5184_s21 + $0x70] sm:$0xff] %vm276_vm0, %v3607_v61  ;;  %3673 = vst.msk [vmem:[%s5184_s21 + $0x80] sm:$0xff] %vm276_vm0, %v3609_v0  ;;  %v3635_v44 = vmul.f32 %v4056_v55, %v6847_v47  ;;  %v3637_v39 = vmul.f32 %v4057_v23, %v6847_v47  ;;  %v3639_v6 = vmul.f32 %v4058_v31, %v6847_v47  ;;  %v4073_v61 = vld [vmem:[%s5184_s21 + $0x68] sm:$0xff]  ;;  %v4074_v0 = vld [vmem:[%s5184_s21 + $0x78] sm:$0xff] }
 0x620   : > { %3675 = vst.msk [vmem:[%s5184_s21 + $0x90] sm:$0xff] %vm276_vm0, %v3611_v52  ;;  %3677 = vst.msk [vmem:[%s5184_s21 + $0xa0] sm:$0xff] %vm276_vm0, %v3613_v36  ;;  %v3641_v11 = vmul.f32 %v4059_v59, %v6847_v47  ;;  %v3643_v32 = vmul.f32 %v4060_v14, %v6847_v47  ;;  %v3645_v2 = vmul.f32 %v4061_v60, %v6847_v47  ;;  %v4075_v52 = vld [vmem:[%s5184_s21 + $0x88] sm:$0xff]  ;;  %v4076_v36 = vld [vmem:[%s5184_s21 + $0x98] sm:$0xff] }
 0x621   : > { %3679 = vst.msk [vmem:[%s5184_s21 + $0xb0] sm:$0xff] %vm276_vm0, %v3615_v20  ;;  %3681 = vst.msk [vmem:[%s5184_s21 + $0xc0] sm:$0xff] %vm276_vm0, %v3617_v8  ;;  %v3647_v35 = vmul.f32 %v4062_v45, %v6847_v47  ;;  %v3649_v18 = vmul.f32 %v4063_v51, %v6847_v47  ;;  %v3651_v43 = vmul.f32 %v4064_v16, %v6847_v47  ;;  %v4077_v20 = vld [vmem:[%s5184_s21 + $0xa8] sm:$0xff]  ;;  %v4078_v8 = vld [vmem:[%s5184_s21 + $0xb8] sm:$0xff] }
 0x622   : > { %3683 = vst.msk [vmem:[%s5184_s21 + $0xd0] sm:$0xff] %vm276_vm0, %v3619_v15  ;;  %3685 = vst.msk [vmem:[%s5184_s21 + $0xe0] sm:$0xff] %vm276_vm0, %v3621_v30  ;;  %v3653_v21 = vmul.f32 %v4065_v58, %v6847_v47  ;;  %v3655_v1 = vmul.f32 %v4066_v33, %v6847_v47  ;;  %v3588_v47 = vadd.f32 1.0, %v3956_v10  ;;  %v4079_v15 = vld [vmem:[%s5184_s21 + $0xc8] sm:$0xff]  ;;  %v4080_v30 = vld [vmem:[%s5184_s21 + $0xd8] sm:$0xff] }
 0x623   : > { %3687 = vst.msk [vmem:[%s5184_s21 + $0xf0] sm:$0xff] %vm276_vm0, %v3623_v49  ;;  %3689 = vst.msk [vmem:[%s5184_s21 + $0x100] sm:$0xff] %vm276_vm0, %v3625_v63  ;;  %v4081_v49 = vld [vmem:[%s5184_s21 + $0xe8] sm:$0xff]  ;;  %v4082_v63 = vld [vmem:[%s5184_s21 + $0xf8] sm:$0xff] }
 0x624   : > { %3691 = vst.msk [vmem:[%s5184_s21 + $0x110] sm:$0xff] %vm276_vm0, %v3627_v34  ;;  %3693 = vst.msk [vmem:[%s5184_s21 + $0x120] sm:$0xff] %vm276_vm0, %v3629_v13  ;;  %3957 = vrcp.f32 %v3588_v47  ;;  %v4083_v34 = vld [vmem:[%s5184_s21 + $0x108] sm:$0xff]  ;;  %v4084_v13 = vld [vmem:[%s5184_s21 + $0x118] sm:$0xff] }
 0x625   : > { %3695 = vst.msk [vmem:[%s5184_s21 + $0x130] sm:$0xff] %vm276_vm0, %v3631_v62  ;;  %3697 = vst.msk [vmem:[%s5184_s21 + $0x140] sm:$0xff] %vm276_vm0, %v3633_v24  ;;  %v4085_v62 = vld [vmem:[%s5184_s21 + $0x128] sm:$0xff]  ;;  %v4086_v12 = vld [vmem:[%s5184_s21 + $0x138] sm:$0xff] }
 0x626   : > { %3699 = vst.msk [vmem:[%s5184_s21 + $0x150] sm:$0xff] %vm276_vm0, %v3635_v44  ;;  %3701 = vst.msk [vmem:[%s5184_s21 + $0x160] sm:$0xff] %vm276_vm0, %v3637_v39  ;;  %v4087_v55 = vld [vmem:[%s5184_s21 + $0x148] sm:$0xff]  ;;  %v4088_v23 = vld [vmem:[%s5184_s21 + $0x158] sm:$0xff] }
 0x627   : > { %3703 = vst.msk [vmem:[%s5184_s21 + $0x170] sm:$0xff] %vm276_vm0, %v3639_v6  ;;  %3705 = vst.msk [vmem:[%s5184_s21 + $0x180] sm:$0xff] %vm276_vm0, %v3641_v11  ;;  %v4089_v31 = vld [vmem:[%s5184_s21 + $0x168] sm:$0xff]  ;;  %v4090_v59 = vld [vmem:[%s5184_s21 + $0x178] sm:$0xff] }
 0x628   : > { %3707 = vst.msk [vmem:[%s5184_s21 + $0x190] sm:$0xff] %vm276_vm0, %v3643_v32  ;;  %3709 = vst.msk [vmem:[%s5184_s21 + $0x1a0] sm:$0xff] %vm276_vm0, %v3645_v2  ;;  %v4091_v14 = vld [vmem:[%s5184_s21 + $0x188] sm:$0xff]  ;;  %v4092_v60 = vld [vmem:[%s5184_s21 + $0x198] sm:$0xff] }
 0x629   : > { %3711 = vst.msk [vmem:[%s5184_s21 + $0x1b0] sm:$0xff] %vm276_vm0, %v3647_v35  ;;  %3713 = vst.msk [vmem:[%s5184_s21 + $0x1c0] sm:$0xff] %vm276_vm0, %v3649_v18  ;;  %v4093_v45 = vld [vmem:[%s5184_s21 + $0x1a8] sm:$0xff]  ;;  %v4094_v51 = vld [vmem:[%s5184_s21 + $0x1b8] sm:$0xff] }
 0x62a   : > { %3715 = vst.msk [vmem:[%s5184_s21 + $0x1d0] sm:$0xff] %vm276_vm0, %v3651_v43  ;;  %3717 = vst.msk [vmem:[%s5184_s21 + $0x1e0] sm:$0xff] %vm276_vm0, %v3653_v21  ;;  %v4095_v16 = vld [vmem:[%s5184_s21 + $0x1c8] sm:$0xff]  ;;  %v4096_v58 = vld [vmem:[%s5184_s21 + $0x1d8] sm:$0xff] }
 0x62b   : > { %3719 = vst.msk [vmem:[%s5184_s21 + $0x1f0] sm:$0xff] %vm276_vm0, %v3655_v1  ;;  %v4097_v33 = vld [vmem:[%s5184_s21 + $0x1e8] sm:$0xff]  ;;  %v4098_v47 = vld [vmem:[%s5184_s21 + $0x1f8] sm:$0xff] }
 0x62e   : > { %v6977_v46 = vpop.eup %3957 }
 0x62f   : > { %v3594_v7 = vmul.f32 %v4067_v26, %v6977_v46  ;;  %v3596_v54 = vmul.f32 %v4068_v57, %v6977_v46  ;;  %v3598_v28 = vmul.f32 %v4069_v53, %v6977_v46  ;;  %v3600_v56 = vmul.f32 %v4070_v40, %v6977_v46 }
 0x630   : > { %v3602_v25 = vmul.f32 %v4071_v22, %v6977_v46  ;;  %v3604_v17 = vmul.f32 %v4072_v42, %v6977_v46  ;;  %v3606_v4 = vmul.f32 %v4073_v61, %v6977_v46  ;;  %v3608_v5 = vmul.f32 %v4074_v0, %v6977_v46 }
 0x631   : > { %v3610_v41 = vmul.f32 %v4075_v52, %v6977_v46  ;;  %v3612_v38 = vmul.f32 %v4076_v36, %v6977_v46  ;;  %v3614_v27 = vmul.f32 %v4077_v20, %v6977_v46  ;;  %v3616_v48 = vmul.f32 %v4078_v8, %v6977_v46  ;;  %3658 = vst.msk [vmem:[%s5184_s21 + $0x8] sm:$0xff] %vm276_vm0, %v3594_v7 }
 0x632   : > { %3660 = vst.msk [vmem:[%s5184_s21 + $0x18] sm:$0xff] %vm276_vm0, %v3596_v54  ;;  %3662 = vst.msk [vmem:[%s5184_s21 + $0x28] sm:$0xff] %vm276_vm0, %v3598_v28  ;;  %v3618_v37 = vmul.f32 %v4079_v15, %v6977_v46  ;;  %v3620_v9 = vmul.f32 %v4080_v30, %v6977_v46  ;;  %v3622_v3 = vmul.f32 %v4081_v49, %v6977_v46 }
 0x633   : > { %3664 = vst.msk [vmem:[%s5184_s21 + $0x38] sm:$0xff] %vm276_vm0, %v3600_v56  ;;  %v3624_v29 = vmul.f32 %v4082_v63, %v6977_v46  ;;  %3666 = vst.msk [vmem:[%s5184_s21 + $0x48] sm:$0xff] %vm276_vm0, %v3602_v25  ;;  %v3626_v50 = vmul.f32 %v4083_v34, %v6977_v46  ;;  %v3628_v19 = vmul.f32 %v4084_v13, %v6977_v46 }
 0x634   : > { %3668 = vst.msk [vmem:[%s5184_s21 + $0x58] sm:$0xff] %vm276_vm0, %v3604_v17  ;;  %3670 = vst.msk [vmem:[%s5184_s21 + $0x68] sm:$0xff] %vm276_vm0, %v3606_v4  ;;  %v3630_v10 = vmul.f32 %v4085_v62, %v6977_v46  ;;  %v3632_v24 = vmul.f32 %v4086_v12, %v6977_v46  ;;  %v3634_v44 = vmul.f32 %v4087_v55, %v6977_v46 }
 0x635   : > { %3672 = vst.msk [vmem:[%s5184_s21 + $0x78] sm:$0xff] %vm276_vm0, %v3608_v5  ;;  %3674 = vst.msk [vmem:[%s5184_s21 + $0x88] sm:$0xff] %vm276_vm0, %v3610_v41  ;;  %v3636_v39 = vmul.f32 %v4088_v23, %v6977_v46  ;;  %v3638_v6 = vmul.f32 %v4089_v31, %v6977_v46  ;;  %v3640_v11 = vmul.f32 %v4090_v59, %v6977_v46 }
 0x636   : > { %3676 = vst.msk [vmem:[%s5184_s21 + $0x98] sm:$0xff] %vm276_vm0, %v3612_v38  ;;  %3678 = vst.msk [vmem:[%s5184_s21 + $0xa8] sm:$0xff] %vm276_vm0, %v3614_v27  ;;  %v3642_v32 = vmul.f32 %v4091_v14, %v6977_v46  ;;  %v3644_v2 = vmul.f32 %v4092_v60, %v6977_v46  ;;  %v3646_v35 = vmul.f32 %v4093_v45, %v6977_v46 }
 0x637   : > { %3680 = vst.msk [vmem:[%s5184_s21 + $0xb8] sm:$0xff] %vm276_vm0, %v3616_v48  ;;  %3682 = vst.msk [vmem:[%s5184_s21 + $0xc8] sm:$0xff] %vm276_vm0, %v3618_v37  ;;  %v3648_v18 = vmul.f32 %v4094_v51, %v6977_v46  ;;  %v3650_v43 = vmul.f32 %v4095_v16, %v6977_v46  ;;  %v3652_v21 = vmul.f32 %v4096_v58, %v6977_v46 }
 0x638   : > { %3684 = vst.msk [vmem:[%s5184_s21 + $0xd8] sm:$0xff] %vm276_vm0, %v3620_v9  ;;  %3686 = vst.msk [vmem:[%s5184_s21 + $0xe8] sm:$0xff] %vm276_vm0, %v3622_v3  ;;  %v3654_v1 = vmul.f32 %v4097_v33, %v6977_v46  ;;  %v3656_v26 = vmul.f32 %v4098_v47, %v6977_v46 }
 0x639   : > { %3688 = vst.msk [vmem:[%s5184_s21 + $0xf8] sm:$0xff] %vm276_vm0, %v3624_v29  ;;  %3690 = vst.msk [vmem:[%s5184_s21 + $0x108] sm:$0xff] %vm276_vm0, %v3626_v50 }
 0x63a   : > { %3692 = vst.msk [vmem:[%s5184_s21 + $0x118] sm:$0xff] %vm276_vm0, %v3628_v19  ;;  %3694 = vst.msk [vmem:[%s5184_s21 + $0x128] sm:$0xff] %vm276_vm0, %v3630_v10 }
 0x63b   : > { %3696 = vst.msk [vmem:[%s5184_s21 + $0x138] sm:$0xff] %vm276_vm0, %v3632_v24  ;;  %3698 = vst.msk [vmem:[%s5184_s21 + $0x148] sm:$0xff] %vm276_vm0, %v3634_v44 }
 0x63c   : > { %3700 = vst.msk [vmem:[%s5184_s21 + $0x158] sm:$0xff] %vm276_vm0, %v3636_v39  ;;  %3702 = vst.msk [vmem:[%s5184_s21 + $0x168] sm:$0xff] %vm276_vm0, %v3638_v6 }
 0x63d   : > { %3704 = vst.msk [vmem:[%s5184_s21 + $0x178] sm:$0xff] %vm276_vm0, %v3640_v11  ;;  %3706 = vst.msk [vmem:[%s5184_s21 + $0x188] sm:$0xff] %vm276_vm0, %v3642_v32 }
 0x63e   : > { %3708 = vst.msk [vmem:[%s5184_s21 + $0x198] sm:$0xff] %vm276_vm0, %v3644_v2  ;;  %3710 = vst.msk [vmem:[%s5184_s21 + $0x1a8] sm:$0xff] %vm276_vm0, %v3646_v35 }
 0x63f   : > { %3712 = vst.msk [vmem:[%s5184_s21 + $0x1b8] sm:$0xff] %vm276_vm0, %v3648_v18  ;;  %3714 = vst.msk [vmem:[%s5184_s21 + $0x1c8] sm:$0xff] %vm276_vm0, %v3650_v43 }
 0x640   : > { %3716 = vst.msk [vmem:[%s5184_s21 + $0x1d8] sm:$0xff] %vm276_vm0, %v3652_v21  ;;  %3718 = vst.msk [vmem:[%s5184_s21 + $0x1e8] sm:$0xff] %vm276_vm0, %v3654_v1 }
 0x641   : > { %3720 = vst.msk [vmem:[%s5184_s21 + $0x1f8] sm:$0xff] %vm276_vm0, %v3656_v26 }
 0x642 PF: > { %s15_s15 = sadd.s32 1, %s4124_s15  }
 0x643   : > { %p12_p1 = scmp.ge.s32.totalorder %s15_s15, 4  }
 0x645   :  { %14 = sbr.rel (!%p12_p1) target bundleno = 1 (0x1), region = 72 }
 0x64c   :  { %3742 = vsyncpa [#allocation4], 1 }
 0x64d   :  { %3744 = vsyncpa [#allocation4 + $0x1], 1 }

</bundles_post_ra>
